<compile_context>
chip_gen: v7x
topology: tpu7x:2x2x1
jax: 0.10.0
libtpu: 0.0.40
codegen_flags: <defaults>
</compile_context>

<pallas_src>
import functools

import jax
import jax.numpy as jnp
from jax.experimental import pallas as pl
from jax.experimental.pallas import tpu as pltpu

H_DIM = 400     # logical hidden dim (PyTorch h_dim)
H_PAD = 512     # padded hidden dim (4 x 128 lanes)


def _disc_kernel(xT_ref,        # (2, bm)    f32  input tile, batch on lanes
                 l1_ref,        # (512, 3)   f32  [w1^T | b1]
                 w2_ref,        # (512, 512) bf16 w2^T
                 b2_ref,        # (512, 1)   f32
                 w3_ref,        # (512, 512) bf16 w3^T
                 b3_ref,        # (512, 1)   f32
                 w4_ref,        # (1, 512)   bf16 w4^T
                 b4_ref,        # (1, 1)     f32  scalar in SMEM
                 o_ref,         # (1, bm)    f32  lane-dense output row
                 *, bf16_epilogue):
    act = jnp.bfloat16 if bf16_epilogue else jnp.float32
    xT = xT_ref[...]                                           # (2, bm) f32

    # Layer 1 on the VPU (K=2 would waste the MXU): h1^T[j,m] =
    #   w1^T[j,0]*x[m,0] + w1^T[j,1]*x[m,1] + b1[j]
    h = (l1_ref[:, 0:1] * xT[0:1, :]
         + l1_ref[:, 1:2] * xT[1:2, :]
         + l1_ref[:, 2:3])                                     # (512, bm) f32
    h = jnp.maximum(h, 0.0)

    # Layers 2/3: canonical (512,512)x(512,bm) bf16 MXU matmuls, f32 acc.
    # Epilogue (bias + ReLU) in bf16 on v6e/v7x, f32 on v5e.
    h = jnp.dot(w2_ref[...], h.astype(jnp.bfloat16),
                preferred_element_type=jnp.float32)            # (512, bm) f32
    h = jnp.maximum(h.astype(act) + b2_ref[...].astype(act), 0.0)
    h = jnp.dot(w3_ref[...], h.astype(jnp.bfloat16),
                preferred_element_type=jnp.float32)
    h = jnp.maximum(h.astype(act) + b3_ref[...].astype(act), 0.0)

    # Layer 4: (1,512)x(512,bm) -> lane-dense (1,bm) row directly, no
    # activation transpose anywhere.
    logit = jnp.dot(w4_ref[...], h.astype(jnp.bfloat16),
                    preferred_element_type=jnp.float32)        # (1, bm) f32
    logit = logit + b4_ref[0, 0]                               # SMEM scalar
    o_ref[...] = jax.nn.sigmoid(logit).astype(o_ref.dtype)


def _default_bf16_epilogue():
    """bf16 bias+ReLU only where the VPU natively supports bf16 (v6e/v7x)."""
    try:
        kind = jax.devices()[0].device_kind.lower()
    except Exception:
        return False
    return any(tag in kind for tag in ("v6", "v7", "7x"))


def _choose_bm(B):
    """>=2 balanced 128-multiple tiles when possible (v7x megacore), capped at
    1024 rows so (512,bm) f32 intermediates stay a few MiB on every chip."""
    bm = 128 * pl.cdiv(pl.cdiv(B, 2), 128)
    return max(128, min(1024, bm))


def discriminator_forward(x, packed_params, *, bm=None, bf16_epilogue=None):
    """x: (B, 2) float32. Returns (B,) float32, matching output.view(-1)."""
    if bf16_epilogue is None:
        bf16_epilogue = _default_bf16_epilogue()
    l1, w2t, b2c, w3t, b3c, w4t, b4 = packed_params

    B = x.shape[0]
    if bm is None:
        bm = _choose_bm(B)
    assert bm % 128 == 0, "bm must be a multiple of 128 for lane-dense output"
    nb = pl.cdiv(B, bm)
    b_pad = nb * bm

    # Batch on lanes: transpose the tiny (B,2) input on the host side and
    # zero-pad the batch so any B works.
    xT = x.T
    if b_pad != B:
        xT = jnp.pad(xT, ((0, 0), (0, b_pad - B)))

    # Weights/biases: constant block index across the grid -> fetched once.
    const = lambda shape: pl.BlockSpec(shape, lambda i: (0, 0))

    kernel = functools.partial(_disc_kernel, bf16_epilogue=bf16_epilogue)
    out = pl.pallas_call(
        kernel,
        out_shape=jax.ShapeDtypeStruct((1, b_pad), jnp.float32),
        grid_spec=pltpu.PrefetchScalarGridSpec(
            num_scalar_prefetch=0,
            grid=(nb,),
            in_specs=[
                pl.BlockSpec((2, bm), lambda i: (0, i)),        # x^T tile
                const(l1.shape),
                const(w2t.shape), const(b2c.shape),
                const(w3t.shape), const(b3c.shape),
                const(w4t.shape),
                pl.BlockSpec(memory_space=pltpu.MemorySpace.SMEM),  # b4 scalar
            ],
            out_specs=pl.BlockSpec((1, bm), lambda i: (0, i)),  # lane-dense row
        ),
        compiler_params=pltpu.CompilerParams(
            dimension_semantics=("parallel",),
            vmem_limit_bytes=32 * 1024 * 1024),
    )(xT, l1, w2t, b2c, w3t, b3c, w4t, b4)
    return out.reshape(-1)[:B]


def init_params(key):
    """Deterministic init mirroring nn.Linear default (U[-1/sqrt(fan_in), +]).

    Weights stored as (in_features, out_features) f32 at the logical 400 dim.
    """
    dims = [(2, H_DIM), (H_DIM, H_DIM), (H_DIM, H_DIM), (H_DIM, 1)]
    params = []
    keys = jax.random.split(key, 2 * len(dims))
    for li, (fan_in, fan_out) in enumerate(dims):
        bound = 1.0 / jnp.sqrt(jnp.float32(fan_in))
        w = jax.random.uniform(keys[2 * li], (fan_in, fan_out),
                               minval=-bound, maxval=bound, dtype=jnp.float32)
        b = jax.random.uniform(keys[2 * li + 1], (1, fan_out),
                               minval=-bound, maxval=bound, dtype=jnp.float32)
        params += [w, b]
    return tuple(params)


def pack_params(params):
    """Pad hidden dim 400->512 with zeros (ReLU-preserving), transpose all
    weights to the batch-on-lanes orientation, cast the big matmul weights to
    bf16, and stack [w1^T | b1] into one f32 block."""
    w1, b1, w2, b2, w3, b3, w4, b4 = params
    pc = H_PAD - H_DIM
    w1p = jnp.pad(w1, ((0, 0), (0, pc)))                       # (2, 512)
    b1p = jnp.pad(b1, ((0, 0), (0, pc)))                       # (1, 512)
    l1 = jnp.concatenate([w1p.T, b1p.T], axis=1).astype(jnp.float32)  # (512,3)
    w2t = jnp.pad(w2, ((0, pc), (0, pc))).T.astype(jnp.bfloat16)      # (512,512)
    w3t = jnp.pad(w3, ((0, pc), (0, pc))).T.astype(jnp.bfloat16)
    b2c = jnp.pad(b2, ((0, 0), (0, pc))).T.astype(jnp.float32)        # (512,1)
    b3c = jnp.pad(b3, ((0, 0), (0, pc))).T.astype(jnp.float32)
    w4t = jnp.pad(w4, ((0, pc), (0, 0))).T.astype(jnp.bfloat16)       # (1,512)
    b4p = b4.reshape(1, 1).astype(jnp.float32)                        # (1,1)
    return (l1, w2t, b2c, w3t, b3c, w4t, b4p)


def reference_forward(x, packed_params, *, bf16_epilogue):
    """Pure-JAX reference mirroring the kernel's quantization exactly."""
    l1, w2t, b2c, w3t, b3c, w4t, b4 = packed_params
    f32 = lambda a: a.astype(jnp.float32)
    q = lambda a: a.astype(jnp.bfloat16)
    hp = jax.lax.Precision.HIGHEST

    w1 = l1[:, 0:2]            # (512, 2)
    b1 = l1[:, 2]              # (512,)
    h = jnp.maximum(jnp.dot(x, w1.T, precision=hp) + b1, 0.0)   # (B,512) f32

    def layer(h, wt, b_col):
        acc = jnp.dot(f32(q(h)), f32(wt).T, precision=hp)        # (B,512) f32
        if bf16_epilogue:
            return jnp.maximum(q(acc) + q(b_col)[:, 0], 0.0)     # bf16
        return jnp.maximum(acc + b_col[:, 0], 0.0)               # f32

    h = layer(h, w2t, b2c)
    h = layer(h, w3t, b3c)
    logit = jnp.dot(f32(q(h)), f32(w4t)[0], precision=hp) + b4[0, 0]
    return jax.nn.sigmoid(logit)


if __name__ == "__main__":
    key = jax.random.PRNGKey(0)
    pkey, xkey = jax.random.split(key)
    params = init_params(pkey)
    packed = pack_params(params)

    B = 300  # not a multiple of bm: exercises batch padding and a 2-step grid
    x = jax.random.normal(xkey, (B, 2), dtype=jnp.float32)

    bf16_ep = _default_bf16_epilogue()
    out = discriminator_forward(x, packed, bf16_epilogue=bf16_ep)
    out = jax.block_until_ready(out)

    ref = reference_forward(x, packed, bf16_epilogue=bf16_ep)
    assert out.shape == (B,)
    max_err = float(jnp.max(jnp.abs(out - ref)))
    assert jnp.allclose(out, ref, atol=3e-3, rtol=3e-3), (
        f"mismatch vs reference: max abs diff {max_err}")

    print("KERNEL_OK")
</pallas_src>

<mosaic_0001>
module attributes {stable_mosaic.version = 11 : i64} {
  func.func @_disc_kernel(%arg0: i32, %arg1: memref<2x256xf32, #tpu.memory_space<vmem>>, %arg2: memref<512x3xf32, #tpu.memory_space<vmem>>, %arg3: memref<512x512xbf16, #tpu.memory_space<vmem>>, %arg4: memref<512x1xf32, #tpu.memory_space<vmem>>, %arg5: memref<512x512xbf16, #tpu.memory_space<vmem>>, %arg6: memref<512x1xf32, #tpu.memory_space<vmem>>, %arg7: memref<1x512xbf16, #tpu.memory_space<vmem>>, %arg8: memref<1x1xf32, #tpu.memory_space<smem>>, %arg9: memref<1x256xf32, #tpu.memory_space<vmem>>) attributes {dimension_semantics = [#tpu.dimension_semantics<parallel>], iteration_bounds = array<i64: 2>, scalar_prefetch = 0 : i64, scratch_operands = 0 : i64, tpu.core_type = #tpu.core_type<tc>, window_params = [{transform_indices = @transform_0, window_bounds = array<i64: 2, 256>}, {pipeline_mode = #tpu.pipeline_mode<synchronous>, transform_indices = @transform_1, window_bounds = array<i64: 512, 3>}, {pipeline_mode = #tpu.pipeline_mode<synchronous>, transform_indices = @transform_2, window_bounds = array<i64: 512, 512>}, {pipeline_mode = #tpu.pipeline_mode<synchronous>, transform_indices = @transform_3, window_bounds = array<i64: 512, 1>}, {pipeline_mode = #tpu.pipeline_mode<synchronous>, transform_indices = @transform_4, window_bounds = array<i64: 512, 512>}, {pipeline_mode = #tpu.pipeline_mode<synchronous>, transform_indices = @transform_5, window_bounds = array<i64: 512, 1>}, {pipeline_mode = #tpu.pipeline_mode<synchronous>, transform_indices = @transform_6, window_bounds = array<i64: 1, 512>}, {transform_indices = @transform_7, window_bounds = array<i64: 1, 1>}, {transform_indices = @transform_8, window_bounds = array<i64: 1, 256>}]} {
    %c0 = arith.constant 0 : index
    %c0_0 = arith.constant 0 : index
    %0 = vector.load %arg1[%c0, %c0_0] : memref<2x256xf32, #tpu.memory_space<vmem>>, vector<2x256xf32>
    %c0_1 = arith.constant 0 : index
    %c0_2 = arith.constant 0 : index
    %1 = vector.load %arg2[%c0_1, %c0_2] : memref<512x3xf32, #tpu.memory_space<vmem>>, vector<512x1xf32>
    %2 = vector.extract_strided_slice %0 {offsets = [0, 0], sizes = [1, 256], strides = [1, 1]} : vector<2x256xf32> to vector<1x256xf32>
    %3 = vector.broadcast %1 : vector<512x1xf32> to vector<512x256xf32>
    %4 = vector.broadcast %2 : vector<1x256xf32> to vector<512x256xf32>
    %5 = arith.mulf %3, %4 : vector<512x256xf32>
    %c0_3 = arith.constant 0 : index
    %c1 = arith.constant 1 : index
    %6 = vector.load %arg2[%c0_3, %c1] : memref<512x3xf32, #tpu.memory_space<vmem>>, vector<512x1xf32>
    %7 = vector.extract_strided_slice %0 {offsets = [1, 0], sizes = [1, 256], strides = [1, 1]} : vector<2x256xf32> to vector<1x256xf32>
    %8 = vector.broadcast %6 : vector<512x1xf32> to vector<512x256xf32>
    %9 = vector.broadcast %7 : vector<1x256xf32> to vector<512x256xf32>
    %10 = arith.mulf %8, %9 : vector<512x256xf32>
    %11 = arith.addf %5, %10 : vector<512x256xf32>
    %c0_4 = arith.constant 0 : index
    %c2 = arith.constant 2 : index
    %12 = vector.load %arg2[%c0_4, %c2] : memref<512x3xf32, #tpu.memory_space<vmem>>, vector<512x1xf32>
    %13 = vector.broadcast %12 : vector<512x1xf32> to vector<512x256xf32>
    %14 = arith.addf %11, %13 : vector<512x256xf32>
    %cst = arith.constant 0.000000e+00 : f32
    %15 = vector.broadcast %cst : f32 to vector<512x256xf32>
    %16 = arith.maximumf %14, %15 : vector<512x256xf32>
    %c0_5 = arith.constant 0 : index
    %c0_6 = arith.constant 0 : index
    %17 = vector.load %arg3[%c0_5, %c0_6] : memref<512x512xbf16, #tpu.memory_space<vmem>>, vector<512x512xbf16>
    %18 = arith.truncf %16 : vector<512x256xf32> to vector<512x256xbf16>
    %cst_7 = arith.constant dense<0.000000e+00> : vector<512x256xf32>
    %19 = tpu.matmul %17, %18, %cst_7 {dimension_numbers = #tpu.dot_dimension_numbers<[1], [0], [0], [1], [0, 0, 1, 1], [], []>} : vector<512x512xbf16>, vector<512x256xbf16>, vector<512x256xf32> -> vector<512x256xf32>
    %c0_8 = arith.constant 0 : index
    %c0_9 = arith.constant 0 : index
    %20 = vector.load %arg4[%c0_8, %c0_9] : memref<512x1xf32, #tpu.memory_space<vmem>>, vector<512x1xf32>
    %21 = vector.broadcast %20 : vector<512x1xf32> to vector<512x256xf32>
    %22 = arith.addf %19, %21 : vector<512x256xf32>
    %cst_10 = arith.constant 0.000000e+00 : f32
    %23 = vector.broadcast %cst_10 : f32 to vector<512x256xf32>
    %24 = arith.maximumf %22, %23 : vector<512x256xf32>
    %c0_11 = arith.constant 0 : index
    %c0_12 = arith.constant 0 : index
    %25 = vector.load %arg5[%c0_11, %c0_12] : memref<512x512xbf16, #tpu.memory_space<vmem>>, vector<512x512xbf16>
    %26 = arith.truncf %24 : vector<512x256xf32> to vector<512x256xbf16>
    %cst_13 = arith.constant dense<0.000000e+00> : vector<512x256xf32>
    %27 = tpu.matmul %25, %26, %cst_13 {dimension_numbers = #tpu.dot_dimension_numbers<[1], [0], [0], [1], [0, 0, 1, 1], [], []>} : vector<512x512xbf16>, vector<512x256xbf16>, vector<512x256xf32> -> vector<512x256xf32>
    %c0_14 = arith.constant 0 : index
    %c0_15 = arith.constant 0 : index
    %28 = vector.load %arg6[%c0_14, %c0_15] : memref<512x1xf32, #tpu.memory_space<vmem>>, vector<512x1xf32>
    %29 = vector.broadcast %28 : vector<512x1xf32> to vector<512x256xf32>
    %30 = arith.addf %27, %29 : vector<512x256xf32>
    %cst_16 = arith.constant 0.000000e+00 : f32
    %31 = vector.broadcast %cst_16 : f32 to vector<512x256xf32>
    %32 = arith.maximumf %30, %31 : vector<512x256xf32>
    %c0_17 = arith.constant 0 : index
    %c0_18 = arith.constant 0 : index
    %33 = vector.load %arg7[%c0_17, %c0_18] : memref<1x512xbf16, #tpu.memory_space<vmem>>, vector<1x512xbf16>
    %34 = arith.truncf %32 : vector<512x256xf32> to vector<512x256xbf16>
    %cst_19 = arith.constant dense<0.000000e+00> : vector<1x256xf32>
    %35 = tpu.matmul %33, %34, %cst_19 {dimension_numbers = #tpu.dot_dimension_numbers<[1], [0], [0], [1], [0, 0, 1, 1], [], []>} : vector<1x512xbf16>, vector<512x256xbf16>, vector<1x256xf32> -> vector<1x256xf32>
    %c0_20 = arith.constant 0 : index
    %c0_21 = arith.constant 0 : index
    %36 = memref.load %arg8[%c0_20, %c0_21] : memref<1x1xf32, #tpu.memory_space<smem>>
    %37 = vector.broadcast %36 : f32 to vector<1x256xf32>
    %38 = arith.addf %35, %37 : vector<1x256xf32>
    %39 = arith.negf %38 : vector<1x256xf32>
    %40 = math.exp %39 : vector<1x256xf32>
    %cst_22 = arith.constant 1.000000e+00 : f32
    %41 = vector.broadcast %cst_22 : f32 to vector<1x256xf32>
    %42 = arith.addf %41, %40 : vector<1x256xf32>
    %43 = arith.divf %41, %42 : vector<1x256xf32>
    %c0_23 = arith.constant 0 : index
    %c0_24 = arith.constant 0 : index
    %44 = vector.load %arg9[%c0_23, %c0_24] : memref<1x256xf32, #tpu.memory_space<vmem>>, vector<1x256xf32>
    tpu.vector_store %arg9[%c0_23, %c0_24], %43 {strides = array<i32>} : memref<1x256xf32, #tpu.memory_space<vmem>>, vector<1x256xf32>,
    return
  }
  func.func @transform_0(%arg0: i32) -> (i32, i32) {
    %c0_i32 = arith.constant 0 : i32
    %c0_i32_0 = arith.constant 0 : i32
    return %c0_i32, %arg0 : i32, i32
  }
  func.func @transform_1(%arg0: i32) -> (i32, i32) {
    %c0_i32 = arith.constant 0 : i32
    %c0_i32_0 = arith.constant 0 : i32
    %c0_i32_1 = arith.constant 0 : i32
    return %c0_i32, %c0_i32_0 : i32, i32
  }
  func.func @transform_2(%arg0: i32) -> (i32, i32) {
    %c0_i32 = arith.constant 0 : i32
    %c0_i32_0 = arith.constant 0 : i32
    %c0_i32_1 = arith.constant 0 : i32
    return %c0_i32, %c0_i32_0 : i32, i32
  }
  func.func @transform_3(%arg0: i32) -> (i32, i32) {
    %c0_i32 = arith.constant 0 : i32
    %c0_i32_0 = arith.constant 0 : i32
    %c0_i32_1 = arith.constant 0 : i32
    return %c0_i32, %c0_i32_0 : i32, i32
  }
  func.func @transform_4(%arg0: i32) -> (i32, i32) {
    %c0_i32 = arith.constant 0 : i32
    %c0_i32_0 = arith.constant 0 : i32
    %c0_i32_1 = arith.constant 0 : i32
    return %c0_i32, %c0_i32_0 : i32, i32
  }
  func.func @transform_5(%arg0: i32) -> (i32, i32) {
    %c0_i32 = arith.constant 0 : i32
    %c0_i32_0 = arith.constant 0 : i32
    %c0_i32_1 = arith.constant 0 : i32
    return %c0_i32, %c0_i32_0 : i32, i32
  }
  func.func @transform_6(%arg0: i32) -> (i32, i32) {
    %c0_i32 = arith.constant 0 : i32
    %c0_i32_0 = arith.constant 0 : i32
    %c0_i32_1 = arith.constant 0 : i32
    return %c0_i32, %c0_i32_0 : i32, i32
  }
  func.func @transform_7(%arg0: i32) -> (i32, i32) {
    %c0_i32 = arith.constant 0 : i32
    %c0_i32_0 = arith.constant 0 : i32
    %c0_i32_1 = arith.constant 0 : i32
    return %c0_i32, %c0_i32_0 : i32, i32
  }
  func.func @transform_8(%arg0: i32) -> (i32, i32) {
    %c0_i32 = arith.constant 0 : i32
    %c0_i32_0 = arith.constant 0 : i32
    return %c0_i32, %arg0 : i32, i32
  }
}

</mosaic_0001>

<bundles_post_ra>
// kernel: tpu_custom_call.1
= control target key start
LH: loop header
LB: loop body
LE: loop exit
PB: predicated region body
PF: predicated region fallthrough
CT: control target
= control target key end

     0   :  { %s10157_s0 = inlined_call_operand.vmem [shape: f32[2,512], index: 0, kind: input, shape index: {}]   ;;  %s10158_s1 = inlined_call_operand.vmem [shape: f32[512,3], index: 1, kind: input, shape index: {}]   ;;  %s10159_s2 = inlined_call_operand.vmem [shape: bf16[512,512], index: 2, kind: input, shape index: {}]   ;;  %s10160_s3 = inlined_call_operand.vmem [shape: f32[512,1], index: 3, kind: input, shape index: {}]   ;;  %s10161_s4 = inlined_call_operand.hbm [shape: bf16[512,512], index: 4, kind: input, shape index: {}]   ;;  %s10162_s5 = inlined_call_operand.vmem [shape: f32[512,1], index: 5, kind: input, shape index: {}]   ;;  %s10163_s6 = inlined_call_operand.vmem [shape: bf16[1,512], index: 6, kind: input, shape index: {}]   ;;  %s10164_s7 = inlined_call_operand.<no memory space> [shape: f32[1,1], index: 7, kind: input, shape index: {}]   ;;  %s10165_s8 = inlined_call_operand.hbm [shape: f32[1,512], index: 8, kind: output, shape index: {}]  }
   0x1   :  { %13 = sst [smem:[#allocation2]] %s10164_s7 }
   0x2   :  { %14 = vsyncpa [#allocation4], 0 }
   0x3   :  { %15 = vsyncpa [#allocation5], 0 }
   0x4   :  { %17 = vsyncpa [#allocation5 + $0x1], 0  ;;  %s7805_s29 = smov 0   ;;  %s7807_s30 = smov 0  }
   0x5   :  { %s7809_s9 = smov 0   ;;  %s7811_s10 = smov 0  }
   0x6 LB: > { %s7826_s7 = sadd.s32 4294967295, %s7747_s10   ;;  %s6296_s11 = sadd.s32 4294967294, %s7747_s10   ;;  %s7747_s10 = sphi %s7811_s10, %s10219_s10   ;;  %s7743_s9 = sphi %s7809_s9, %s10218_s9   ;;  %s7739_s30 = sphi %s7807_s30, %s10217_s30   ;;  %s7735_s29 = sphi %s7805_s29, %s10216_s29  }
   0x7   : > { %s7830_s12 = sadd.s32 1, %s7747_s10   ;;  %s203_s13 = sadd.s32 1, %s7743_s9 }
   0x8   : > { %s200_s14 = ssub.s32 %s7747_s10, %s7830_s12  ;;  %p213_p0 = scmp.ne.s32.totalorder %s7743_s9, %s7739_s30 }
   0x9   : > { %p201_p1 = scmp.eq.s32.totalorder %s200_s14, 0  ;;  %p214_p2 = scmp.eq.s32.totalorder %s7826_s7, 1 }
   0xa   : > { %p219_p3 = scmp.ne.s32.totalorder %s7739_s30, %s7735_s29  ;;  %p220_p4 = scmp.eq.s32.totalorder %s6296_s11, 1 }
   0xb   : > { %s7841_s15 = scalar_select %p201_p1, %s7743_s9, %s203_s13  }
   0xc   : > { %p7843_p5 = por %p214_p2, %p213_p0  ;;  %p7847_p6 = por %p220_p4, %p219_p3 }
   0xd   : > { %p6297_p7 = scmp.ge.s32.totalorder %s7747_s10, 1  ;;  %p227_p8 = scmp.lt.s32.totalorder %s7747_s10, 3 }
   0xe   : > { %s10185_s16 = scalar_select %p7843_p5, 1, 0 }
   0xf   : > { %s10186_s17 = scalar_select %p7847_p6, 1, 0 }
  0x10   : > { %p10166_p9 = scmp.eq.s32.totalorder %s7826_s7, 0  ;;  %p7854_p10 = pnand %p6297_p7, %p227_p8 }
  0x11   : > { %s7749_s19 = smov [#allocation3]   ;;  %s7653_s24 = scalar_lea.hbm %s10161_s4, 16384 }
  0x12   : > { %s10187_s18 = scalar_select %p7854_p10, 1, 0 }
  0x13   : > { %s248_s20 = sshll.u32 %s7749_s19, 4  ;;  %p7092_p11 = pneg %p7854_p10  ;;  %s249_s20 = int_to_ptr.vmem [resolvable:$true] %s248_s20 }
  0x14   : > { %p7654_p13 = scmp.ne.s32.totalorder %s10161_s4, %s7653_s24  ;;  %p7660_p3 = scmp.lt.u32.totalorder %s7653_s24, %s10161_s4 }
  0x15   : > { %p7862_p12 = pnand %p10166_p9, %p7092_p11 }
  0x17   : > { %p7655_p0 = pneg %p7862_p12 }
  0x19   : > { %p7656_p1 = pnand %p7655_p0, %p7654_p13 }
  0x1b   : > { %p7657_p2 = pneg %p7656_p1 }
  0x1d   : > { %p7662_p4 = pnand %p7660_p3, %p7657_p2 }
  0x1f   : > { %7665 = shalt.err (!%p7662_p4)
}
  0x20   : > { %s7666_s11 = scalar_lea.vmem %s249_s20, 16384  ;;  %p7674_p9 = scmp.lt.s32.totalorder %s249_s20, %s249_s20 }
  0x21   : > { %p7667_p7 = scmp.ne.s32.totalorder %s249_s20, %s7666_s11  ;;  %p7675_p6 = scmp.lt.s32.totalorder %s7666_s11, %s7666_s11 }
  0x23   : > { %p7669_p8 = pnand %p7667_p7, %p7655_p0  ;;  %p7676_p5 = por %p7675_p6, %p7674_p9 }
  0x25   : > { %p7670_p11 = pneg %p7669_p8 }
  0x27   : > { %p7677_p10 = pnand %p7676_p5, %p7670_p11 }
  0x29   : > { %7680 = shalt.err (!%p7677_p10)
}
  0x2a   : > { %s7750_s13 = smov 256   ;;  %s7751_s14 = smov 16  }
  0x2b   : > { %7095 = dma.hbm_to_vmem [thread:$0]  (!%p7862_p12), %s10161_s4, 16384, %s249_s20, [#allocation4], %s7750_s13, %s7750_s13, %s7751_s14  }
  0x2c   : > { %p10189_p13 = scmp.ne.s32.totalorder %s10187_s18, 0 }
  0x2e   : > { %282 = sbr.rel (%p10189_p13) target bundleno = 2123 (0x84b), region = 52 }
  0x35   : > { %p10190_p1 = scmp.eq.s32.totalorder %s7826_s7, 0 }
  0x37   : > { %7726 = dma.done.wait (%p10190_p1), [#allocation4], 16384   ;;  %p10191_p0 = pmov %p10190_p1 }
  0x38   : > { %v10172_v0 = vmov 1   ;;  %v10176_v1 = vmov 0   ;;  %v324_v2 = vld [vmem:[%s10158_s1] sm:$0xff]  ;;  %v7896_v3 = vld [vmem:[%s10158_s1 + $0x8] sm:$0xff]  ;;  %v326_v4 = vld [vmem:[%s10158_s1 + $0x10] sm:$0xff]  ;;  %v10170_v8 = vmov 2  }
  0x39   : > { %7728 = vsyncadd (%p10191_p0), [#allocation4], 4294950912  ;;  %7143 = vset.pattern.permute.xlu1 %v10172_v0  ;;  %7142 = vset.pattern.permute.xlu0 %v10176_v1  ;;  %v7906_v5 = vld [vmem:[%s10158_s1 + $0x18] sm:$0xff]  ;;  %v328_v6 = vld [vmem:[%s10158_s1 + $0x20] sm:$0xff]  ;;  %s6303_s28 = sshll.u32 %s7826_s7, 1  ;;  %s6062_s14 = sld [smem:[#allocation2]] }
  0x3a   : > { %856 = vperm.xlu1 %7143, %v324_v2   ;;  %390 = vperm.xlu0 %7142, %v324_v2   ;;  %v330_v7 = vld [vmem:[%s10158_s1 + $0x30] sm:$0xff]  ;;  %v332_v9 = vld [vmem:[%s10158_s1 + $0x40] sm:$0xff]  ;;  %v329_v10 = vld [vmem:[%s10158_s1 + $0x28] sm:$0xff]  ;;  %p317_p5 = scmp.lt.s32.totalorder %s6303_s28, 3  ;;  %s313_s19 = sand.u32 1, %s7739_s30  }
  0x3b   : > { %v7930_v11 = vld [vmem:[%s10158_s1 + $0x50] sm:$0xff]  ;;  %v7935_v12 = vld [vmem:[%s10158_s1 + $0x60] sm:$0xff]  ;;  %v331_v16 = vld [vmem:[%s10158_s1 + $0x38] sm:$0xff]  ;;  %s6302_s22 = sshll.u32 %s313_s19, 1  ;;  %s6569_s21 = sshll.u32 %s7826_s7, 5 }
  0x3c   : > { %v7942_v13 = vld [vmem:[%s10158_s1 + $0x70] sm:$0xff]  ;;  %v7948_v14 = vld [vmem:[%s10158_s1 + $0x80] sm:$0xff]  ;;  %v333_v22 = vld [vmem:[%s10158_s1 + $0x48] sm:$0xff]  ;;  %s10221_s28 = smov (!%p317_p5, %s6303_s28), 3  ;;  %s10115_s25 = scalar_lea.hbm %s10165_s8, %s6569_s21 }
  0x3d   : > { %v7955_v15 = vld [vmem:[%s10158_s1 + $0x90] sm:$0xff]  ;;  %v7965_v17 = vld [vmem:[%s10158_s1 + $0xa0] sm:$0xff]  ;;  %v335_v24 = vld [vmem:[%s10158_s1 + $0x58] sm:$0xff]  ;;  %s6304_s23 = sshll.u32 %s10221_s28, 1  ;;  %s6211_s7 = scalar_lea.sflag [#allocation5], %s313_s19 }
  0x3e   : > { %860 = vperm.xlu1 %7143, %v7896_v3   ;;  %395 = vperm.xlu0 %7142, %v7896_v3   ;;  %v7971_v18 = vld [vmem:[%s10158_s1 + $0xb0] sm:$0xff]  ;;  %v7978_v19 = vld [vmem:[%s10158_s1 + $0xc0] sm:$0xff]  ;;  %v337_v25 = vld [vmem:[%s10158_s1 + $0x68] sm:$0xff]  ;;  %s320_s26 = scalar_lea.vmem %s10157_s0, %s6304_s23  ;;  %s315_s23 = scalar_lea.vmem [#allocation6], %s6302_s22 }
  0x3f   : > { %v7985_v20 = vld [vmem:[%s10158_s1 + $0xd0] sm:$0xff]  ;;  %v7991_v21 = vld [vmem:[%s10158_s1 + $0xe0] sm:$0xff]  ;;  %v339_v26 = vld [vmem:[%s10158_s1 + $0x78] sm:$0xff]  ;;  %s6225_s18 = sshll.u32 %s315_s23, 4  ;;  %p10214_p9 = scmp.ne.s32.totalorder %s10185_s16, 0  ;;  %s10117_s18 = int_to_ptr.vmem [resolvable:$true] %s6225_s18 }
  0x40   : > { %v8001_v23 = vld [vmem:[%s10158_s1 + $0xf0] sm:$0xff]  ;;  %v341_v27 = vld [vmem:[%s10158_s1 + $0x88] sm:$0xff]  ;;  %v8032_v28 = vld [vmem:[%s10158_s1 + $0x98] sm:$0xff]  ;;  %s7756_s27 = smov [#allocation6]  }
  0x41   : > { %v8039_v29 = vld [vmem:[%s10158_s1 + $0xa8] sm:$0xff]  ;;  %v8046_v30 = vld [vmem:[%s10158_s1 + $0xb8] sm:$0xff]  ;;  %v8094_v41 = vld [vmem:[%s10158_s1 + $0x110] sm:$0xff]  ;;  %s7685_s28 = sshll.u32 %s7756_s27, 4  ;;  %s7686_s28 = int_to_ptr.vmem [resolvable:$false] %s7685_s28 }
  0x42   : > { %7144 = vset.pattern.permute.xlu1 %v10176_v1  ;;  %400 = vperm.xlu0 %7142, %v326_v4   ;;  %v8054_v31 = vld [vmem:[%s10158_s1 + $0xc8] sm:$0xff]  ;;  %v8060_v32 = vld [vmem:[%s10158_s1 + $0xd8] sm:$0xff]  ;;  %v8106_v44 = vld [vmem:[%s10158_s1 + $0x100] sm:$0xff]  ;;  %s7687_s11 = scalar_lea.vmem %s7686_s28, 64  ;;  %p7688_p2 = scmp.lt.s32.totalorder %s10117_s18, %s7686_s28 }
  0x43   : > { %405 = vperm.xlu1 %7144, %v7906_v5   ;;  %v8071_v35 = vld [vmem:[%s10158_s1 + $0xe8] sm:$0xff]  ;;  %v8126_v49 = vld [vmem:[%s10158_s1 + $0x138] sm:$0xff] }
  0x44   : > { %v8082_v38 = vld [vmem:[%s10158_s1 + $0x108] sm:$0xff]  ;;  %10193 = vst [vmem:[#allocation10_spill] sm:$0xff] %v8126_v49  ;;  %v367_v55 = vld [vmem:[%s10158_s1 + $0x158] sm:$0xff] }
  0x45   : > { %v8115_v46 = vld [vmem:[%s10158_s1 + $0x128] sm:$0xff]  ;;  %v371_v61 = vld [vmem:[%s10158_s1 + $0x178] sm:$0xff] }
  0x46   : > { %7145 = vset.pattern.permute.xlu0 %v10172_v0  ;;  %10192 = vst [vmem:[#allocation9_spill] sm:$0xff] %v8115_v46  ;;  %v365_v52 = vld [vmem:[%s10158_s1 + $0x148] sm:$0xff] }
  0x47   : > { %7146 = vset.pattern.permute.xlu1 %v10172_v0  ;;  %864 = vperm.xlu0 %7145, %v326_v4   ;;  %v369_v58 = vld [vmem:[%s10158_s1 + $0x168] sm:$0xff] }
  0x48   : > { %868 = vperm.xlu1 %7146, %v7906_v5   ;;  %v373_v63 = vld [vmem:[%s10158_s1 + $0x188] sm:$0xff] }
  0x4b   : > { %872 = vperm.xlu0 %7145, %v328_v6  }
  0x4c   : > { %7147 = vset.pattern.permute.xlu1 %v10170_v8 }
  0x4d   : > { %1386 = vperm.xlu1 %7147, %v324_v2  }
  0x4f   : > { %880 = vperm.xlu0 %7145, %v330_v7  }
  0x51   : > { %7148 = vset.pattern.permute.xlu1 %v10176_v1 }
  0x52   : > { %410 = vperm.xlu1 %7148, %v328_v6  }
  0x53   : > { %888 = vperm.xlu0 %7145, %v332_v9  }
  0x56   : > { %415 = vperm.xlu1 %7148, %v329_v10  }
  0x57   : > { %896 = vperm.xlu0 %7145, %v7930_v11  }
  0x5a   : > { %7149 = vset.pattern.permute.xlu1 %v10172_v0 }
  0x5b   : > { %876 = vperm.xlu1 %7149, %v329_v10   ;;  %904 = vperm.xlu0 %7145, %v7935_v12  }
  0x5f   : > { %7150 = vset.pattern.permute.xlu1 %v10170_v8  ;;  %912 = vperm.xlu0 %7145, %v7942_v13  }
  0x60   : > { %1394 = vperm.xlu1 %7150, %v326_v4  }
  0x63   : > { %920 = vperm.xlu0 %7145, %v7948_v14  }
  0x64   : > { %7151 = vset.pattern.permute.xlu1 %v10176_v1 }
  0x65   : > { %420 = vperm.xlu1 %7151, %v330_v7  }
  0x67   : > { %928 = vperm.xlu0 %7145, %v7955_v15  }
  0x69   : > { %425 = vperm.xlu1 %7151, %v331_v16  }
  0x6b   : > { %936 = vperm.xlu0 %7145, %v7965_v17  }
  0x6d   : > { %7152 = vset.pattern.permute.xlu1 %v10172_v0 }
  0x6e   : > { %884 = vperm.xlu1 %7152, %v331_v16  }
  0x6f   : > { %944 = vperm.xlu0 %7145, %v7971_v18  }
  0x72   : > { %7153 = vset.pattern.permute.xlu1 %v10170_v8 }
  0x73   : > { %1402 = vperm.xlu1 %7153, %v328_v6   ;;  %952 = vperm.xlu0 %7145, %v7978_v19  }
  0x77   : > { %7154 = vset.pattern.permute.xlu1 %v10176_v1  ;;  %960 = vperm.xlu0 %7145, %v7985_v20  }
  0x78   : > { %430 = vperm.xlu1 %7154, %v332_v9  }
  0x7b   : > { %968 = vperm.xlu0 %7145, %v7991_v21  }
  0x7c   : > { %435 = vperm.xlu1 %7154, %v333_v22  }
  0x7f   : > { %976 = vperm.xlu0 %7145, %v8001_v23  }
  0x80   : > { %7155 = vset.pattern.permute.xlu1 %v10172_v0 }
  0x81   : > { %892 = vperm.xlu1 %7155, %v333_v22  }
  0x83   : > { %7188 = vset.pattern.permute.xlu0 %v10170_v8 }
  0x84   : > { %1390 = vperm.xlu0 %7188, %v7896_v3   ;;  %v10169_v3 = vlaneseq }
  0x85   : > { %7156 = vset.pattern.permute.xlu1 %v10170_v8 }
  0x86   : > { %1410 = vperm.xlu1 %7156, %v330_v7   ;;  %v8183_v7 = vshrl.u32 %v10169_v3, 7 }
  0x88   : > { %1398 = vperm.xlu0 %7188, %v7906_v5   ;;  %v375_v5 = vld [vmem:[%s10158_s1 + $0x198] sm:$0xff]  ;;  %10194 = vst [vmem:[#allocation11_spill] sm:$0xff] %v8183_v7 }
  0x8a   : > { %7157 = vset.pattern.permute.xlu1 %v10176_v1 }
  0x8b   : > { %440 = vperm.xlu1 %7157, %v7930_v11  }
  0x8c   : > { %1406 = vperm.xlu0 %7188, %v329_v10   ;;  %v377_v10 = vld [vmem:[%s10158_s1 + $0x1a8] sm:$0xff] }
  0x8f   : > { %445 = vperm.xlu1 %7157, %v335_v24  }
  0x90   : > { %1414 = vperm.xlu0 %7188, %v331_v16   ;;  %v323_v16 = vld [vmem:[%s320_s26] sm:$0xf]  ;;  %s7681_s26 = scalar_lea.vmem %s10117_s18, 32 }
  0x91   : > { %p7682_p6 = scmp.ne.s32.totalorder %s10117_s18, %s7681_s26  ;;  %p7689_p3 = scmp.lt.s32.totalorder %s7687_s11, %s7681_s26 }
  0x93   : > { %7158 = vset.pattern.permute.xlu1 %v10172_v0  ;;  %p7683_p10 = pnand %p7682_p6, %p10214_p9  ;;  %p7690_p4 = por %p7689_p3, %p7688_p2 }
  0x94   : > { %900 = vperm.xlu1 %7158, %v335_v24   ;;  %1422 = vperm.xlu0 %7188, %v333_v22   ;;  %v711_v22 = vsub.s32 0, %v8183_v7 }
  0x95   : > { %p7684_p12 = pneg %p7683_p10 }
  0x97   : > { %p7691_p7 = pnand %p7690_p4, %p7684_p12 }
  0x98   : > { %7159 = vset.pattern.permute.xlu1 %v10170_v8  ;;  %1430 = vperm.xlu0 %7188, %v335_v24   ;;  %v715_v24 = vsub.s32 2, %v8183_v7 }
  0x99   : > { %1418 = vperm.xlu1 %7159, %v332_v9  }
  0x9c   : > { %1438 = vperm.xlu0 %7188, %v337_v25  }
  0x9d   : > { %7160 = vset.pattern.permute.xlu1 %v10176_v1 }
  0x9e   : > { %450 = vperm.xlu1 %7160, %v7935_v12  }
  0xa0   : > { %1446 = vperm.xlu0 %7188, %v339_v26  }
  0xa2   : > { %455 = vperm.xlu1 %7160, %v337_v25  }
  0xa4   : > { %1454 = vperm.xlu0 %7188, %v341_v27  }
  0xa6   : > { %7161 = vset.pattern.permute.xlu1 %v10172_v0 }
  0xa7   : > { %908 = vperm.xlu1 %7161, %v337_v25   ;;  %v379_v25 = vld [vmem:[%s10158_s1 + $0x1b8] sm:$0xff] }
  0xa8   : > { %1462 = vperm.xlu0 %7188, %v8032_v28  }
  0xab   : > { %7162 = vset.pattern.permute.xlu1 %v10170_v8 }
  0xac   : > { %1426 = vperm.xlu1 %7162, %v7930_v11   ;;  %1470 = vperm.xlu0 %7188, %v8039_v29  }
  0xb0   : > { %7163 = vset.pattern.permute.xlu1 %v10176_v1  ;;  %1478 = vperm.xlu0 %7188, %v8046_v30  }
  0xb1   : > { %460 = vperm.xlu1 %7163, %v7942_v13  }
  0xb4   : > { %1486 = vperm.xlu0 %7188, %v8054_v31  }
  0xb5   : > { %465 = vperm.xlu1 %7163, %v339_v26  }
  0xb8   : > { %1494 = vperm.xlu0 %7188, %v8060_v32  }
  0xb9   : > { %7164 = vset.pattern.permute.xlu1 %v10172_v0  ;;  %v8064_v33 = vpop.permute.xlu1 %856  ;;  %v8066_v34 = vpop.permute.xlu0 %390 }
  0xba   : > { %916 = vperm.xlu1 %7164, %v339_v26  }
  0xbc   : > { %1502 = vperm.xlu0 %7188, %v8071_v35  }
  0xbd   : > { %v8074_v36 = vpop.permute.xlu1 %860  ;;  %v8076_v37 = vpop.permute.xlu0 %395 }
  0xbe   : > { %7165 = vset.pattern.permute.xlu1 %v10170_v8 }
  0xbf   : > { %1434 = vperm.xlu1 %7165, %v7935_v12   ;;  %v1113_v12 = vsub.s32 1, %v8183_v7 }
  0xc0   : > { %7193 = vset.pattern.permute.xlu0 %v10172_v0 }
  0xc1   : > { %v8086_v39 = vpop.permute.xlu0 %400  ;;  %988 = vperm.xlu0 %7193, %v8082_v38   ;;  %v1114_v26 = vrot.slane %v323_v16, %v1113_v12 }
  0xc2   : > { %v8089_v40 = vpop.permute.xlu1 %405 }
  0xc3   : > { %7166 = vset.pattern.permute.xlu1 %v10176_v1 }
  0xc4   : > { %470 = vperm.xlu1 %7166, %v7948_v14  }
  0xc5   : > { %992 = vperm.xlu0 %7193, %v8094_v41  }
  0xc6   : > { %v8099_v42 = vpop.permute.xlu0 %864 }
  0xc7   : > { %v8101_v43 = vpop.permute.xlu1 %868 }
  0xc8   : > { %475 = vperm.xlu1 %7166, %v341_v27  }
  0xc9   : > { %7195 = vset.pattern.permute.xlu0 %v10176_v1 }
  0xca   : > { %v8109_v45 = vpop.permute.xlu0 %872  ;;  %550 = vperm.xlu0 %7195, %v8106_v44  }
  0xcc   : > { %7167 = vset.pattern.permute.xlu1 %v10172_v0  ;;  %v8118_v47 = vpop.permute.xlu1 %1386 }
  0xcd   : > { %924 = vperm.xlu1 %7167, %v341_v27  }
  0xce   : > { %v8120_v48 = vpop.permute.xlu0 %880  ;;  %575 = vperm.xlu0 %7195, %v8115_v46  }
  0xd1   : > { %7168 = vset.pattern.permute.xlu1 %v10170_v8  ;;  %v8129_v50 = vpop.permute.xlu1 %410 }
  0xd2   : > { %1442 = vperm.xlu1 %7168, %v7942_v13   ;;  %v8132_v51 = vpop.permute.xlu0 %888  ;;  %585 = vperm.xlu0 %7195, %v8126_v49   ;;  %v1117_v13 = vsub.s32 3, %v8183_v7 }
  0xd4   : > { %v1118_v27 = vrot.slane %v323_v16, %v1117_v13 }
  0xd5   : > { %v8138_v53 = vpop.permute.xlu1 %415 }
  0xd6   : > { %7169 = vset.pattern.permute.xlu1 %v10176_v1  ;;  %v8141_v54 = vpop.permute.xlu0 %896  ;;  %595 = vperm.xlu0 %7195, %v365_v52  }
  0xd7   : > { %480 = vperm.xlu1 %7169, %v7955_v15  }
  0xda   : > { %v8147_v56 = vpop.permute.xlu1 %876  ;;  %v8149_v57 = vpop.permute.xlu0 %904  ;;  %605 = vperm.xlu0 %7195, %v367_v55   ;;  %v712_v55 = vrot.slane %v323_v16, %v711_v22 }
  0xdb   : > { %485 = vperm.xlu1 %7169, %v8032_v28  }
  0xdc   : > { %v8221_v13 = vrot.slane %v712_v55, %v711_v22 }
  0xde   : > { %v8156_v59 = vpop.permute.xlu0 %912  ;;  %615 = vperm.xlu0 %7195, %v369_v58   ;;  %v716_v58 = vrot.slane %v323_v16, %v715_v24 }
  0xdf   : > { %7170 = vset.pattern.permute.xlu1 %v10172_v0  ;;  %v8159_v60 = vpop.permute.xlu1 %1394 }
  0xe0   : > { %932 = vperm.xlu1 %7170, %v8032_v28   ;;  %v8223_v3 = vrot.slane %v716_v58, %v711_v22  ;;  %v727_v22 = vmul.f32 %v8221_v13, %v8066_v34 }
  0xe2   : > { %v8165_v62 = vpop.permute.xlu0 %920  ;;  %625 = vperm.xlu0 %7195, %v371_v61   ;;  %v381_v61 = vld [vmem:[%s10158_s1 + $0x1c8] sm:$0xff] }
  0xe4   : > { %7171 = vset.pattern.permute.xlu1 %v10170_v8  ;;  %v8171_v2 = vpop.permute.xlu1 %420 }
  0xe5   : > { %1450 = vperm.xlu1 %7171, %v7948_v14  }
  0xe6   : > { %v8174_v4 = vpop.permute.xlu0 %928  ;;  %635 = vperm.xlu0 %7195, %v373_v63   ;;  %v8215_v63 = vrot.slane %v1114_v26, %v1113_v12  ;;  %v728_v26 = vmul.f32 %v8223_v3, %v8066_v34  ;;  %v732_v34 = vmul.f32 %v8223_v3, %v8086_v39 }
  0xe8   : > { %v8179_v6 = vpop.permute.xlu1 %425  ;;  %v1131_v58 = vmul.f32 %v8215_v63, %v8074_v36  ;;  %v1135_v7 = vmul.f32 %v8215_v63, %v8101_v43 }
  0xe9   : > { %7172 = vset.pattern.permute.xlu1 %v10176_v1 }
  0xea   : > { %490 = vperm.xlu1 %7172, %v7965_v17   ;;  %v8186_v9 = vpop.permute.xlu0 %936  ;;  %645 = vperm.xlu0 %7195, %v375_v5   ;;  %v8217_v5 = vrot.slane %v1118_v27, %v1113_v12  ;;  %v1129_v12 = vmul.f32 %v8215_v63, %v8064_v33  ;;  %v731_v27 = vmul.f32 %v8221_v13, %v8086_v39 }
  0xeb   : > { %10195 = vst [vmem:[#allocation12_spill] sm:$0xff] %v8186_v9 }
  0xec   : > { %v1130_v24 = vmul.f32 %v8217_v5, %v8064_v33  ;;  %v385_v33 = vld [vmem:[%s10158_s1 + $0x1e8] sm:$0xff] }
  0xed   : > { %v8194_v11 = vpop.permute.xlu1 %884 }
  0xee   : > { %495 = vperm.xlu1 %7172, %v8039_v29   ;;  %v8199_v14 = vpop.permute.xlu0 %944  ;;  %655 = vperm.xlu0 %7195, %v377_v10  }
  0xef   : > { %10196 = vst [vmem:[#allocation13_spill] sm:$0xff] %v8199_v14 }
  0xf2   : > { %7173 = vset.pattern.permute.xlu1 %v10172_v0  ;;  %v8207_v28 = vpop.permute.xlu1 %1402  ;;  %v8209_v52 = vpop.permute.xlu0 %952  ;;  %665 = vperm.xlu0 %7195, %v379_v25   ;;  %v730_v0 = vmul.f32 %v8223_v3, %v8076_v37 }
  0xf3   : > { %10197 = vst [vmem:[#allocation14_spill] sm:$0xff] %v8209_v52  ;;  %940 = vperm.xlu1 %7173, %v8039_v29   ;;  %v383_v29 = vld [vmem:[%s10158_s1 + $0x1d8] sm:$0xff]  ;;  %v1257_v52 = vadd.f32 %v1129_v12, %v727_v22  ;;  %v735_v12 = vmul.f32 %v8221_v13, %v8129_v50 }
  0xf6   : > { %v8219_v10 = vpop.permute.xlu0 %960  ;;  %675 = vperm.xlu0 %7195, %v381_v61   ;;  %v729_v61 = vmul.f32 %v8221_v13, %v8076_v37  ;;  %v8278_v37 = vld [vmem:[%s10158_s1 + $0x1f8] sm:$0xff] }
  0xf7   : > { %10198 = vst [vmem:[#allocation15_spill] sm:$0xff] %v8219_v10  ;;  %7174 = vset.pattern.permute.xlu1 %v10170_v8  ;;  %v8226_v16 = vpop.permute.xlu1 %430  ;;  %v1132_v8 = vmul.f32 %v8217_v5, %v8074_v36  ;;  %v734_v36 = vmul.f32 %v8223_v3, %v8089_v40  ;;  %v1258_v10 = vadd.f32 %v1130_v24, %v728_v26 }
  0xf8   : > { %1458 = vperm.xlu1 %7174, %v7955_v15   ;;  %v1133_v15 = vmul.f32 %v8215_v63, %v8099_v42  ;;  %v1259_v14 = vadd.f32 %v1131_v58, %v729_v61  ;;  %v1138_v24 = vmul.f32 %v8217_v5, %v8109_v45  ;;  %v1641_v26 = vadd.f32 %v8118_v47, %v1257_v52 }
  0xf9   : > { %v1260_v46 = vadd.f32 %v1132_v8, %v730_v0  ;;  %v1642_v9 = vadd.f32 %v8118_v47, %v1258_v10  ;;  %v1139_v0 = vmul.f32 %v8215_v63, %v8147_v56  ;;  %v1140_v8 = vmul.f32 %v8217_v5, %v8147_v56 }
  0xfa   : > { %v8236_v25 = vpop.permute.xlu0 %968  ;;  %685 = vperm.xlu0 %7195, %v383_v29   ;;  %v1134_v29 = vmul.f32 %v8217_v5, %v8099_v42  ;;  %v733_v42 = vmul.f32 %v8221_v13, %v8089_v40  ;;  %v1137_v40 = vmul.f32 %v8215_v63, %v8109_v45  ;;  %v1141_v45 = vmul.f32 %v8215_v63, %v8120_v48 }
  0xfb   : > { %10199 = vst [vmem:[#allocation16_spill] sm:$0xff] %v8236_v25  ;;  %v8246_v55 = vpop.permute.xlu1 %435  ;;  %v1136_v25 = vmul.f32 %v8217_v5, %v8101_v43  ;;  %v10201_v56 = vmov 1   ;;  %v1770_v58 = vmax.f32 %v1642_v9, 0.0 }
  0xfc   : > { %7175 = vset.pattern.permute.xlu1 %v10176_v1  ;;  %v1261_v1 = vadd.f32 %v1133_v15, %v731_v27  ;;  %v1262_v43 = vadd.f32 %v1134_v29, %v732_v34  ;;  %v1142_v27 = vmul.f32 %v8217_v5, %v8120_v48  ;;  %v738_v15 = vmul.f32 %v8223_v3, %v8138_v53 }
  0xfd   : > { %500 = vperm.xlu1 %7175, %v7971_v18   ;;  %v1265_v61 = vadd.f32 %v1137_v40, %v735_v12 }
  0xfe   : > { %v8269_v39 = vpop.permute.xlu0 %976  ;;  %695 = vperm.xlu0 %7195, %v385_v33   ;;  %v1263_v33 = vadd.f32 %v1135_v7, %v733_v42  ;;  %v736_v7 = vmul.f32 %v8223_v3, %v8129_v50  ;;  %v1645_v10 = vadd.f32 %v8159_v60, %v1261_v1  ;;  %v1646_v47 = vadd.f32 %v8159_v60, %v1262_v43 }
  0xff   : > { %10200 = vst [vmem:[#allocation17_spill] sm:$0xff] %v8269_v39  ;;  %v1264_v39 = vadd.f32 %v1136_v25, %v734_v36  ;;  %v737_v50 = vmul.f32 %v8221_v13, %v8138_v53  ;;  %v1769_v60 = vmax.f32 %v1641_v26, 0.0  ;;  %v1268_v43 = vadd.f32 %v1140_v8, %v738_v15 }
 0x100   : > { %v8280_v49 = vpop.permute.xlu1 %892  ;;  %v1773_v29 = vmax.f32 %v1645_v10, 0.0  ;;  %v1266_v48 = vadd.f32 %v1138_v24, %v736_v7  ;;  %v1774_v53 = vmax.f32 %v1646_v47, 0.0  ;;  %v1143_v26 = vmul.f32 %v8215_v63, %v8194_v11 }
 0x101   : > { %505 = vperm.xlu1 %7175, %v8046_v30   ;;  %v1267_v36 = vadd.f32 %v1139_v0, %v737_v50  ;;  %v1144_v24 = vmul.f32 %v8217_v5, %v8194_v11 }
 0x102   : > { %705 = vperm.xlu0 %7195, %v8278_v37   ;;  %v1650_v7 = vadd.f32 %v8207_v28, %v1266_v48 }
 0x103   : > { %v1391_v25 = vpop.permute.xlu0 %1390 }
 0x104   : > { %v1643_v52 = vadd.f32 %v1391_v25, %v1259_v14  ;;  %v1644_v22 = vadd.f32 %v1391_v25, %v1260_v46  ;;  %v10202_v46 = vmov 2   ;;  %v739_v25 = vmul.f32 %v8221_v13, %v8171_v2 }
 0x105   : > { %7176 = vset.pattern.permute.xlu1 %v10201_v56  ;;  %v1411_v1 = vpop.permute.xlu1 %1410 }
 0x106   : > { %948 = vperm.xlu1 %7176, %v8046_v30   ;;  %v1772_v34 = vmax.f32 %v1644_v22, 0.0  ;;  %v1771_v14 = vmax.f32 %v1643_v52, 0.0  ;;  %7238 = vset.pattern.permute.xlu0 %v10202_v46  ;;  %v740_v30 = vmul.f32 %v8223_v3, %v8171_v2  ;;  %v742_v2 = vmul.f32 %v8223_v3, %v8179_v6 }
 0x107   : > { %v1399_v42 = vpop.permute.xlu0 %1398  ;;  %1514 = vperm.xlu0 %7238, %v8106_v44  }
 0x108   : > { %v1647_v9 = vadd.f32 %v1399_v42, %v1263_v33  ;;  %v1648_v40 = vadd.f32 %v1399_v42, %v1264_v39  ;;  %v2026_v12 = vpack.c.bf16 %v1772_v34, %v1770_v58  ;;  %v2025_v10 = vpack.c.bf16 %v1771_v14, %v1769_v60 }
 0x109   : > { %v741_v39 = vmul.f32 %v8221_v13, %v8179_v6  ;;  %v1649_v33 = vadd.f32 %v8207_v28, %v1265_v61  ;;  %v1269_v58 = vadd.f32 %v1141_v45, %v739_v25  ;;  %v1270_v34 = vadd.f32 %v1142_v27, %v740_v30 }
 0x10a   : > { %v1775_v0 = vmax.f32 %v1647_v9, 0.0  ;;  %v1776_v8 = vmax.f32 %v1648_v40, 0.0  ;;  %7177 = vset.pattern.permute.xlu1 %v10202_v46  ;;  %v8322_v47 = vpop.permute.xlu1 %440  ;;  %3113 = vmatprep.subr.bf16.mxu0 %v2026_v12  ;;  %v1778_v14 = vmax.f32 %v1650_v7, 0.0  ;;  %v1272_v28 = vadd.f32 %v1144_v24, %v742_v2  ;;  %v8340_v9 = vld [vmem:[%s10158_s1 + $0x120] sm:$0xff] }
 0x10b   : > { %1466 = vperm.xlu1 %7177, %v7965_v17   ;;  %v1407_v11 = vpop.permute.xlu0 %1406  ;;  %3114 = vmatpush1.bf16.msra.mxu0 %v2025_v10  ;;  %v1271_v60 = vadd.f32 %v1143_v26, %v741_v39  ;;  %v1777_v61 = vmax.f32 %v1649_v33, 0.0  ;;  %v1147_v17 = vmul.f32 %v8215_v63, %v8280_v49  ;;  %v1145_v40 = vmul.f32 %v8215_v63, %v8132_v51 }
 0x10c   : > { %v1651_v52 = vadd.f32 %v1407_v11, %v1267_v36  ;;  %v1652_v22 = vadd.f32 %v1407_v11, %v1268_v43  ;;  %v2028_v50 = vpack.c.bf16 %v1776_v8, %v1774_v53  ;;  %v2027_v15 = vpack.c.bf16 %v1775_v0, %v1773_v29  ;;  %1522 = vperm.xlu0 %7238, %v8094_v41   ;;  %v8360_v11 = vld [vmem:[%s10158_s1 + $0x130] sm:$0xff] }
 0x10d   : > { %v1653_v36 = vadd.f32 %v1411_v1, %v1269_v58  ;;  %v1654_v43 = vadd.f32 %v1411_v1, %v1270_v34  ;;  %v10203_v53 = vmov 0   ;;  %v1146_v1 = vmul.f32 %v8217_v5, %v8132_v51 }
 0x10e   : > { %v1779_v48 = vmax.f32 %v1651_v52, 0.0  ;;  %v1780_v42 = vmax.f32 %v1652_v22, 0.0  ;;  %v8331_v6 = vpop.permute.xlu1 %445  ;;  %3115 = vmatprep.subr.bf16.mxu0 %v2028_v50  ;;  %v1148_v30 = vmul.f32 %v8217_v5, %v8280_v49  ;;  %v743_v12 = vmul.f32 %v8221_v13, %v8226_v16 }
 0x10f   : > { %7178 = vset.pattern.permute.xlu1 %v10203_v53  ;;  %v1415_v45 = vpop.permute.xlu0 %1414  ;;  %3116 = vmatpush1.bf16.msra.mxu0 %v2027_v15  ;;  %v745_v10 = vmul.f32 %v8221_v13, %v8246_v55  ;;  %v744_v0 = vmul.f32 %v8223_v3, %v8226_v16  ;;  %v746_v51 = vmul.f32 %v8223_v3, %v8246_v55  ;;  %v1781_v8 = vmax.f32 %v1653_v36, 0.0 }
 0x110   : > { %v1655_v27 = vadd.f32 %v1415_v45, %v1271_v60  ;;  %v1656_v29 = vadd.f32 %v1415_v45, %v1272_v28  ;;  %510 = vperm.xlu1 %7178, %v7978_v19   ;;  %v2030_v25 = vpack.c.bf16 %v1780_v42, %v1778_v14  ;;  %v2029_v26 = vpack.c.bf16 %v1779_v48, %v1777_v61 }
 0x111   : > { %1530 = vperm.xlu0 %7238, %v8340_v9   ;;  %v1782_v49 = vmax.f32 %v1654_v43, 0.0  ;;  %v1275_v33 = vadd.f32 %v1147_v17, %v745_v10  ;;  %v1276_v52 = vadd.f32 %v1148_v30, %v746_v51  ;;  %v1273_v15 = vadd.f32 %v1145_v40, %v743_v12 }
 0x112   : > { %v1783_v24 = vmax.f32 %v1655_v27, 0.0  ;;  %v1784_v7 = vmax.f32 %v1656_v29, 0.0  ;;  %3117 = vmatprep.subr.bf16.mxu0 %v2030_v25  ;;  %v1274_v58 = vadd.f32 %v1146_v1, %v744_v0  ;;  %v750_v25 = vmul.f32 %v8223_v3, %v8331_v6 }
 0x113   : > { %v901_v39 = vpop.permute.xlu1 %900  ;;  %v1423_v2 = vpop.permute.xlu0 %1422  ;;  %3118 = vmatpush1.bf16.msra.mxu0 %v2029_v26  ;;  %v1150_v40 = vmul.f32 %v8217_v5, %v8141_v54  ;;  %v747_v1 = vmul.f32 %v8221_v13, %v8322_v47  ;;  %v748_v30 = vmul.f32 %v8223_v3, %v8322_v47 }
 0x114   : > { %515 = vperm.xlu1 %7178, %v8054_v31   ;;  %v2032_v22 = vpack.c.bf16 %v1784_v7, %v1782_v49  ;;  %v2031_v50 = vpack.c.bf16 %v1783_v24, %v1781_v8  ;;  %v1659_v16 = vadd.f32 %v1423_v2, %v1275_v33  ;;  %v1660_v55 = vadd.f32 %v1423_v2, %v1276_v52 }
 0x115   : > { %1538 = vperm.xlu0 %7238, %v8360_v11   ;;  %v1151_v27 = vmul.f32 %v8215_v63, %v901_v39  ;;  %v1152_v29 = vmul.f32 %v8217_v5, %v901_v39  ;;  %v1278_v0 = vadd.f32 %v1150_v40, %v748_v30 }
 0x116   : > { %3119 = vmatprep.subr.bf16.mxu0 %v2032_v22  ;;  %v1787_v48 = vmax.f32 %v1659_v16, 0.0  ;;  %v1788_v42 = vmax.f32 %v1660_v55, 0.0 }
 0x117   : > { %3120 = vmatpush1.bf16.msra.mxu0 %v2031_v50  ;;  %v1280_v12 = vadd.f32 %v1152_v29, %v750_v25  ;;  %v1431_v24 = vpop.permute.xlu0 %1430 }
 0x118   : > { %v1419_v34 = vpop.permute.xlu1 %1418  ;;  %7179 = vset.pattern.permute.xlu1 %v10201_v56 }
 0x119   : > { %v1657_v60 = vadd.f32 %v1419_v34, %v1273_v15  ;;  %v1658_v14 = vadd.f32 %v1419_v34, %v1274_v58  ;;  %956 = vperm.xlu1 %7179, %v8054_v31   ;;  %v749_v31 = vmul.f32 %v8221_v13, %v8331_v6  ;;  %v1664_v6 = vadd.f32 %v1431_v24, %v1280_v12  ;;  %v7635_v12 = vld [vmem:[%s10158_s1 + $0xd0] sm:$0xff] }
 0x11a   : > { %v1153_v34 = vmul.f32 %v8215_v63, %v8149_v57 }
 0x11b   : > { %v1785_v28 = vmax.f32 %v1657_v60, 0.0  ;;  %v1786_v61 = vmax.f32 %v1658_v14, 0.0  ;;  %v1279_v26 = vadd.f32 %v1151_v27, %v749_v31  ;;  %v1792_v39 = vmax.f32 %v1664_v6, 0.0 }
 0x11d   : > { %v451_v17 = vpop.permute.xlu1 %450  ;;  %v2034_v36 = vpack.c.bf16 %v1788_v42, %v1786_v61  ;;  %v2033_v43 = vpack.c.bf16 %v1787_v48, %v1785_v28  ;;  %7180 = vset.pattern.permute.xlu1 %v10202_v46  ;;  %v1439_v61 = vpop.permute.xlu0 %1438 }
 0x11e   : > { %1474 = vperm.xlu1 %7180, %v7971_v18   ;;  %v1149_v18 = vmul.f32 %v8215_v63, %v8141_v54  ;;  %v1663_v54 = vadd.f32 %v1431_v24, %v1279_v26  ;;  %v751_v60 = vmul.f32 %v8221_v13, %v451_v17  ;;  %v752_v14 = vmul.f32 %v8223_v3, %v451_v17 }
 0x11f   : > { %3121 = vmatprep.subr.bf16.mxu0 %v2034_v36  ;;  %v8410_v36 = vld [vmem:[%s10158_s1 + $0x150] sm:$0xff] }
 0x120   : > { %3122 = vmatpush1.bf16.msra.mxu0 %v2033_v43  ;;  %v1277_v7 = vadd.f32 %v1149_v18, %v747_v1  ;;  %v1791_v49 = vmax.f32 %v1663_v54, 0.0 }
 0x121   : > { %v456_v45 = vpop.permute.xlu1 %455 }
 0x122   : > { %7181 = vset.pattern.permute.xlu1 %v10203_v53  ;;  %v754_v58 = vmul.f32 %v8223_v3, %v456_v45 }
 0x123   : > { %520 = vperm.xlu1 %7181, %v7985_v20   ;;  %v8387_v20 = vld [vmem:[%s10158_s1 + $0x140] sm:$0xff] }
 0x124   : > { %1546 = vperm.xlu0 %7238, %v8387_v20  }
 0x126   : > { %v909_v10 = vpop.permute.xlu1 %908 }
 0x127   : > { %525 = vperm.xlu1 %7181, %v8060_v32   ;;  %v1155_v55 = vmul.f32 %v8215_v63, %v909_v10  ;;  %v1156_v15 = vmul.f32 %v8217_v5, %v909_v10 }
 0x128   : > { %1554 = vperm.xlu0 %7238, %v8410_v36  }
 0x129   : > { %v1284_v42 = vadd.f32 %v1156_v15, %v754_v58 }
 0x12b   : > { %v1427_v51 = vpop.permute.xlu1 %1426  ;;  %7182 = vset.pattern.permute.xlu1 %v10201_v56  ;;  %v1668_v43 = vadd.f32 %v1439_v61, %v1284_v42  ;;  %v7636_v42 = vld [vmem:[%s10158_s1 + $0xe0] sm:$0xff] }
 0x12c   : > { %v1661_v47 = vadd.f32 %v1427_v51, %v1277_v7  ;;  %v1662_v8 = vadd.f32 %v1427_v51, %v1278_v0  ;;  %964 = vperm.xlu1 %7182, %v8060_v32   ;;  %v753_v32 = vmul.f32 %v8221_v13, %v456_v45  ;;  %v1157_v7 = vmul.f32 %v8215_v63, %v8156_v59  ;;  %v355_v51 = vld [vmem:[%s10158_s1 + $0xf8] sm:$0xff] }
 0x12d   : > { %v1796_v25 = vmax.f32 %v1668_v43, 0.0  ;;  %v1158_v0 = vmul.f32 %v8217_v5, %v8156_v59  ;;  %v7637_v43 = vld [vmem:[%s10158_s1 + $0xf0] sm:$0xff] }
 0x12e   : > { %v1789_v2 = vmax.f32 %v1661_v47, 0.0  ;;  %v1790_v33 = vmax.f32 %v1662_v8, 0.0  ;;  %v1283_v48 = vadd.f32 %v1155_v55, %v753_v32 }
 0x130   : > { %v461_v52 = vpop.permute.xlu1 %460  ;;  %v2036_v22 = vpack.c.bf16 %v1792_v39, %v1790_v33  ;;  %v2035_v50 = vpack.c.bf16 %v1791_v49, %v1789_v2  ;;  %7183 = vset.pattern.permute.xlu1 %v10202_v46  ;;  %v1447_v33 = vpop.permute.xlu0 %1446 }
 0x131   : > { %1482 = vperm.xlu1 %7183, %v7978_v19   ;;  %v1154_v19 = vmul.f32 %v8217_v5, %v8149_v57  ;;  %v1281_v57 = vadd.f32 %v1153_v34, %v751_v60  ;;  %v755_v47 = vmul.f32 %v8221_v13, %v461_v52  ;;  %v756_v8 = vmul.f32 %v8223_v3, %v461_v52 }
 0x132   : > { %3123 = vmatprep.subr.bf16.mxu0 %v2036_v22 }
 0x133   : > { %3124 = vmatpush1.bf16.msra.mxu0 %v2035_v50  ;;  %v1282_v45 = vadd.f32 %v1154_v19, %v752_v14  ;;  %v1285_v50 = vadd.f32 %v1157_v7, %v755_v47 }
 0x134   : > { %v466_v16 = vpop.permute.xlu1 %465 }
 0x135   : > { %7184 = vset.pattern.permute.xlu1 %v10203_v53  ;;  %v757_v54 = vmul.f32 %v8221_v13, %v466_v16  ;;  %v758_v6 = vmul.f32 %v8223_v3, %v466_v16  ;;  %v1286_v16 = vadd.f32 %v1158_v0, %v756_v8 }
 0x136   : > { %530 = vperm.xlu1 %7184, %v7991_v21   ;;  %v1667_v21 = vadd.f32 %v1439_v61, %v1283_v48 }
 0x138   : > { %v1795_v31 = vmax.f32 %v1667_v21, 0.0 }
 0x139   : > { %v917_v28 = vpop.permute.xlu1 %916 }
 0x13a   : > { %535 = vperm.xlu1 %7184, %v8071_v35   ;;  %v1159_v24 = vmul.f32 %v8215_v63, %v917_v28 }
 0x13c   : > { %v1287_v49 = vadd.f32 %v1159_v24, %v757_v54 }
 0x13e   : > { %v1435_v27 = vpop.permute.xlu1 %1434  ;;  %7185 = vset.pattern.permute.xlu1 %v10201_v56  ;;  %v1671_v59 = vadd.f32 %v1447_v33, %v1287_v49 }
 0x13f   : > { %v1665_v17 = vadd.f32 %v1435_v27, %v1281_v57  ;;  %v1666_v29 = vadd.f32 %v1435_v27, %v1282_v45  ;;  %972 = vperm.xlu1 %7185, %v8071_v35   ;;  %v1160_v35 = vmul.f32 %v8217_v5, %v917_v28  ;;  %v1161_v27 = vmul.f32 %v8215_v63, %v8165_v62 }
 0x140   : > { %v1799_v32 = vmax.f32 %v1671_v59, 0.0 }
 0x141   : > { %v1793_v18 = vmax.f32 %v1665_v17, 0.0  ;;  %v1794_v40 = vmax.f32 %v1666_v29, 0.0  ;;  %v1288_v39 = vadd.f32 %v1160_v35, %v758_v6  ;;  %v1162_v17 = vmul.f32 %v8217_v5, %v8165_v62 }
 0x143   : > { %v471_v1 = vpop.permute.xlu1 %470  ;;  %v2038_v30 = vpack.c.bf16 %v1796_v25, %v1794_v40  ;;  %v2037_v26 = vpack.c.bf16 %v1795_v31, %v1793_v18  ;;  %7186 = vset.pattern.permute.xlu1 %v10202_v46  ;;  %v1672_v22 = vadd.f32 %v1447_v33, %v1288_v39 }
 0x144   : > { %1490 = vperm.xlu1 %7186, %v7635_v12   ;;  %v759_v29 = vmul.f32 %v8221_v13, %v471_v1  ;;  %v760_v31 = vmul.f32 %v8223_v3, %v471_v1 }
 0x145   : > { %3125 = vmatprep.subr.bf16.mxu0 %v2038_v30  ;;  %v1800_v58 = vmax.f32 %v1672_v22, 0.0  ;;  %v1455_v30 = vpop.permute.xlu0 %1454 }
 0x146   : > { %3126 = vmatpush1.bf16.msra.mxu0 %v2037_v26  ;;  %v8462_v26 = vld [vmem:[%s10158_s1 + $0x170] sm:$0xff]  ;;  %v1289_v24 = vadd.f32 %v1161_v27, %v759_v29  ;;  %v1290_v62 = vadd.f32 %v1162_v17, %v760_v31 }
 0x147   : > { %v476_v10 = vpop.permute.xlu1 %475 }
 0x148   : > { %7187 = vset.pattern.permute.xlu1 %v10203_v53  ;;  %v761_v57 = vmul.f32 %v8221_v13, %v476_v10  ;;  %v762_v45 = vmul.f32 %v8223_v3, %v476_v10 }
 0x149   : > { %540 = vperm.xlu1 %7187, %v8001_v23   ;;  %v8438_v23 = vld [vmem:[%s10158_s1 + $0x160] sm:$0xff] }
 0x14a   : > { %1562 = vperm.xlu0 %7238, %v8438_v23  }
 0x14c   : > { %v925_v2 = vpop.permute.xlu1 %924 }
 0x14d   : > { %545 = vperm.xlu1 %7187, %v355_v51   ;;  %v1163_v61 = vmul.f32 %v8215_v63, %v925_v2  ;;  %v1164_v21 = vmul.f32 %v8217_v5, %v925_v2 }
 0x14e   : > { %1570 = vperm.xlu0 %7238, %v8462_v26  }
 0x14f   : > { %v1291_v25 = vadd.f32 %v1163_v61, %v761_v57  ;;  %v1292_v18 = vadd.f32 %v1164_v21, %v762_v45  ;;  %v8500_v21 = vld [vmem:[%s10158_s1 + $0x190] sm:$0xff] }
 0x151   : > { %v1443_v55 = vpop.permute.xlu1 %1442  ;;  %7189 = vset.pattern.permute.xlu1 %v10201_v56  ;;  %v1675_v12 = vadd.f32 %v1455_v30, %v1291_v25  ;;  %v1676_v10 = vadd.f32 %v1455_v30, %v1292_v18 }
 0x152   : > { %v1669_v52 = vadd.f32 %v1443_v55, %v1285_v50  ;;  %v1670_v15 = vadd.f32 %v1443_v55, %v1286_v16  ;;  %980 = vperm.xlu1 %7189, %v355_v51   ;;  %v8480_v50 = vld [vmem:[%s10158_s1 + $0x118] sm:$0xff]  ;;  %v1166_v16 = vmul.f32 %v8217_v5, %v8174_v4 }
 0x153   : > { %v1803_v6 = vmax.f32 %v1675_v12, 0.0  ;;  %v1804_v7 = vmax.f32 %v1676_v10, 0.0  ;;  %v8517_v10 = vld [vmem:[%s10158_s1 + $0x1a0] sm:$0xff] }
 0x154   : > { %v1797_v34 = vmax.f32 %v1669_v52, 0.0  ;;  %v1798_v19 = vmax.f32 %v1670_v15, 0.0 }
 0x156   : > { %v481_v60 = vpop.permute.xlu1 %480  ;;  %v2040_v14 = vpack.c.bf16 %v1800_v58, %v1798_v19  ;;  %v2039_v48 = vpack.c.bf16 %v1799_v32, %v1797_v34  ;;  %7190 = vset.pattern.permute.xlu1 %v10202_v46  ;;  %v1463_v58 = vpop.permute.xlu0 %1462  ;;  %v8492_v34 = vld [vmem:[%s10158_s1 + $0x180] sm:$0xff] }
 0x157   : > { %1498 = vperm.xlu1 %7190, %v7636_v42   ;;  %v763_v55 = vmul.f32 %v8221_v13, %v481_v60  ;;  %v764_v52 = vmul.f32 %v8223_v3, %v481_v60  ;;  %1578 = vperm.xlu0 %7238, %v8492_v34  }
 0x158   : > { %3127 = vmatprep.subr.bf16.mxu0 %v2040_v14 }
 0x159   : > { %3128 = vmatpush1.bf16.msra.mxu0 %v2039_v48  ;;  %v1294_v48 = vadd.f32 %v1166_v16, %v764_v52  ;;  %v10205_v16 = vld [vmem:[#allocation9_spill] sm:$0xff] }
 0x15a   : > { %v486_v28 = vpop.permute.xlu1 %485  ;;  %v1471_v42 = vpop.permute.xlu0 %1470 }
 0x15b   : > { %1506 = vperm.xlu1 %7190, %v7637_v43   ;;  %v765_v59 = vmul.f32 %v8221_v13, %v486_v28  ;;  %v766_v22 = vmul.f32 %v8223_v3, %v486_v28  ;;  %1586 = vperm.xlu0 %7238, %v8500_v21  }
 0x15e   : > { %v8506_v25 = vpop.permute.xlu0 %1478 }
 0x15f   : > { %v933_v40 = vpop.permute.xlu1 %932  ;;  %1510 = vperm.xlu1 %7190, %v355_v51   ;;  %1594 = vperm.xlu0 %7238, %v8517_v10  }
 0x160   : > { %v1167_v2 = vmul.f32 %v8215_v63, %v933_v40  ;;  %v1168_v33 = vmul.f32 %v8217_v5, %v933_v40 }
 0x162   : > { %v1296_v15 = vadd.f32 %v1168_v33, %v766_v22  ;;  %v8509_v40 = vpop.permute.xlu0 %1486  ;;  %v8547_v22 = vld [vmem:[%s10158_s1 + $0x1c0] sm:$0xff] }
 0x163   : > { %7191 = vset.pattern.permute.xlu1 %v10203_v53 }
 0x164   : > { %v1451_v35 = vpop.permute.xlu1 %1450  ;;  %555 = vperm.xlu1 %7191, %v8082_v38   ;;  %v1680_v14 = vadd.f32 %v1463_v58, %v1296_v15 }
 0x165   : > { %v1673_v1 = vadd.f32 %v1451_v35, %v1289_v24  ;;  %v1674_v54 = vadd.f32 %v1451_v35, %v1290_v62  ;;  %v10204_v35 = vld [vmem:[#allocation12_spill] sm:$0xff] }
 0x166   : > { %v1808_v57 = vmax.f32 %v1680_v14, 0.0 }
 0x167   : > { %v1801_v0 = vmax.f32 %v1673_v1, 0.0  ;;  %v1802_v51 = vmax.f32 %v1674_v54, 0.0  ;;  %v1169_v1 = vmul.f32 %v8215_v63, %v10204_v35  ;;  %v1170_v54 = vmul.f32 %v8217_v5, %v10204_v35 }
 0x168   : > { %7192 = vset.pattern.permute.xlu1 %v10201_v56 }
 0x169   : > { %v8468_v47 = vpop.permute.xlu1 %490  ;;  %v2042_v8 = vpack.c.bf16 %v1804_v7, %v1802_v51  ;;  %v2041_v49 = vpack.c.bf16 %v1803_v6, %v1801_v0  ;;  %984 = vperm.xlu1 %7192, %v8106_v44   ;;  %v1165_v44 = vmul.f32 %v8215_v63, %v8174_v4 }
 0x16a   : > { %v767_v6 = vmul.f32 %v8221_v13, %v8468_v47  ;;  %v768_v7 = vmul.f32 %v8223_v3, %v8468_v47 }
 0x16b   : > { %3129 = vmatprep.subr.bf16.mxu0 %v2042_v8  ;;  %v1293_v4 = vadd.f32 %v1165_v44, %v763_v55 }
 0x16c   : > { %3130 = vmatpush1.bf16.msra.mxu0 %v2041_v49  ;;  %v8537_v49 = vld [vmem:[%s10158_s1 + $0x1b0] sm:$0xff]  ;;  %v1298_v47 = vadd.f32 %v1170_v54, %v768_v7 }
 0x16d   : > { %v496_v39 = vpop.permute.xlu1 %495  ;;  %7194 = vset.pattern.permute.xlu1 %v10203_v53  ;;  %1602 = vperm.xlu0 %7238, %v8537_v49  }
 0x16e   : > { %560 = vperm.xlu1 %7194, %v8094_v41   ;;  %v1295_v41 = vadd.f32 %v1167_v2, %v765_v59  ;;  %v769_v24 = vmul.f32 %v8221_v13, %v496_v39  ;;  %v770_v62 = vmul.f32 %v8223_v3, %v496_v39  ;;  %v8540_v39 = vpop.permute.xlu0 %1494  ;;  %v1297_v59 = vadd.f32 %v1169_v1, %v767_v6  ;;  %v10207_v6 = vld [vmem:[#allocation10_spill] sm:$0xff] }
 0x170   : > { %v1679_v19 = vadd.f32 %v1463_v58, %v1295_v41 }
 0x171   : > { %1610 = vperm.xlu0 %7238, %v8547_v22  }
 0x172   : > { %v941_v32 = vpop.permute.xlu1 %940  ;;  %565 = vperm.xlu1 %7194, %v8480_v50   ;;  %v1807_v43 = vmax.f32 %v1679_v19, 0.0  ;;  %v8551_v41 = vpop.permute.xlu0 %1502  ;;  %v8556_v19 = vld [vmem:[%s10158_s1 + $0x1d0] sm:$0xff] }
 0x173   : > { %v1171_v30 = vmul.f32 %v8215_v63, %v941_v32  ;;  %v1172_v12 = vmul.f32 %v8217_v5, %v941_v32 }
 0x175   : > { %v1299_v0 = vadd.f32 %v1171_v30, %v769_v24  ;;  %v1300_v51 = vadd.f32 %v1172_v12, %v770_v62  ;;  %1618 = vperm.xlu0 %7238, %v8556_v19  }
 0x176   : > { %7196 = vset.pattern.permute.xlu1 %v10201_v56 }
 0x177   : > { %v1459_v60 = vpop.permute.xlu1 %1458  ;;  %996 = vperm.xlu1 %7196, %v8480_v50   ;;  %v1683_v2 = vadd.f32 %v1471_v42, %v1299_v0  ;;  %v1684_v33 = vadd.f32 %v1471_v42, %v1300_v51 }
 0x178   : > { %v1677_v28 = vadd.f32 %v1459_v60, %v1293_v4  ;;  %v1678_v61 = vadd.f32 %v1459_v60, %v1294_v48  ;;  %v8561_v60 = vpop.permute.xlu0 %988 }
 0x179   : > { %v1811_v15 = vmax.f32 %v1683_v2, 0.0 }
 0x17a   : > { %v1805_v45 = vmax.f32 %v1677_v28, 0.0  ;;  %v1806_v27 = vmax.f32 %v1678_v61, 0.0  ;;  %v8567_v28 = vld [vmem:[%s10158_s1 + $0x1e0] sm:$0xff] }
 0x17b   : > { %7197 = vset.pattern.permute.xlu1 %v10202_v46  ;;  %1626 = vperm.xlu0 %7238, %v8567_v28  }
 0x17c   : > { %v8504_v17 = vpop.permute.xlu1 %500  ;;  %v2044_v29 = vpack.c.bf16 %v1808_v57, %v1806_v27  ;;  %v2043_v31 = vpack.c.bf16 %v1807_v43, %v1805_v45  ;;  %1518 = vperm.xlu1 %7197, %v8082_v38   ;;  %v7245_v38 = vld [vmem:[%s10159_s2 + $0x4] ss:$16 sps:$4 sm:$0xff]   ;;  %v8581_v30 = vpop.permute.xlu0 %992 }
 0x17d   : > { %3145 = vmatprep.mubr.bf16.mxu0 %v7245_v38  ;;  %v10206_v45 = vld [vmem:[#allocation13_spill] sm:$0xff]  ;;  %v772_v12 = vmul.f32 %v8223_v3, %v8504_v17 }
 0x17e   : > { %3131 = vmatprep.subr.bf16.mxu0 %v2044_v29  ;;  %v1173_v27 = vmul.f32 %v8215_v63, %v10206_v45  ;;  %v1174_v29 = vmul.f32 %v8217_v5, %v10206_v45 }
 0x17f   : > { %3132 = vmatpush1.bf16.msra.mxu0 %v2043_v31  ;;  %v771_v31 = vmul.f32 %v8221_v13, %v8504_v17  ;;  %1638 = vperm.xlu0 %7238, %v8278_v37  }
 0x180   : > { %v506_v18 = vpop.permute.xlu1 %505  ;;  %7198 = vset.pattern.permute.xlu1 %v10203_v53  ;;  %v1302_v54 = vadd.f32 %v1174_v29, %v772_v12  ;;  %v8592_v7 = vpop.permute.xlu0 %550 }
 0x181   : > { %570 = vperm.xlu1 %7198, %v8340_v9   ;;  %v774_v57 = vmul.f32 %v8223_v3, %v506_v18  ;;  %v1301_v1 = vadd.f32 %v1173_v27, %v771_v31 }
 0x183   : > { %7242 = vset.pattern.permute.xlu0 %v10203_v53 }
 0x185   : > { %v949_v8 = vpop.permute.xlu1 %948  ;;  %7199 = vset.pattern.permute.xlu1 %v10201_v56 }
 0x186   : > { %1000 = vperm.xlu1 %7199, %v8340_v9   ;;  %v1812_v9 = vmax.f32 %v1684_v33, 0.0  ;;  %v1175_v61 = vmul.f32 %v8215_v63, %v949_v8  ;;  %v1176_v43 = vmul.f32 %v8217_v5, %v949_v8 }
 0x188   : > { %v1304_v24 = vadd.f32 %v1176_v43, %v774_v57 }
 0x18a   : > { %v1467_v44 = vpop.permute.xlu1 %1466  ;;  %1004 = vperm.xlu1 %7199, %v10205_v16   ;;  %v1688_v35 = vadd.f32 %v8506_v25, %v1304_v24 }
 0x18b   : > { %v1681_v55 = vadd.f32 %v1467_v44, %v1297_v59  ;;  %v1682_v52 = vadd.f32 %v1467_v44, %v1298_v47  ;;  %v8598_v44 = vpop.permute.xlu0 %575 }
 0x18c   : > { %v1816_v2 = vmax.f32 %v1688_v35, 0.0 }
 0x18d   : > { %v1809_v32 = vmax.f32 %v1681_v55, 0.0  ;;  %v1810_v58 = vmax.f32 %v1682_v52, 0.0 }
 0x18e   : > { %7200 = vset.pattern.permute.xlu1 %v10202_v46 }
 0x18f   : > { %v511_v14 = vpop.permute.xlu1 %510  ;;  %v2046_v4 = vpack.c.bf16 %v1812_v9, %v1810_v58  ;;  %v2045_v48 = vpack.c.bf16 %v1811_v15, %v1809_v32  ;;  %1526 = vperm.xlu1 %7200, %v8480_v50   ;;  %v773_v50 = vmul.f32 %v8221_v13, %v506_v18  ;;  %v8606_v32 = vpop.permute.xlu0 %585  ;;  %v10208_v58 = vld [vmem:[#allocation14_spill] sm:$0xff] }
 0x190   : > { %v776_v43 = vmul.f32 %v8223_v3, %v511_v14 }
 0x191   : > { %3133 = vmatprep.subr.bf16.mxu0 %v2046_v4  ;;  %v1303_v38 = vadd.f32 %v1175_v61, %v773_v50  ;;  %v1177_v4 = vmul.f32 %v8215_v63, %v10208_v58  ;;  %v775_v61 = vmul.f32 %v8221_v13, %v511_v14 }
 0x192   : > { %3134 = vmatpush1.bf16.msra.mxu0 %v2045_v48  ;;  %v1178_v48 = vmul.f32 %v8217_v5, %v10208_v58 }
 0x193   : > { %7201 = vset.pattern.permute.xlu1 %v10203_v53  ;;  %v516_v42 = vpop.permute.xlu1 %515  ;;  %v1687_v18 = vadd.f32 %v8506_v25, %v1303_v38  ;;  %v1305_v29 = vadd.f32 %v1177_v4, %v775_v61  ;;  %v8618_v12 = vpop.permute.xlu0 %595  ;;  %v7639_v38 = vld [vmem:[%s10158_s1 + $0x148] sm:$0xff] }
 0x194   : > { %580 = vperm.xlu1 %7201, %v8360_v11   ;;  %v777_v15 = vmul.f32 %v8221_v13, %v516_v42  ;;  %v778_v9 = vmul.f32 %v8223_v3, %v516_v42  ;;  %v1306_v31 = vadd.f32 %v1178_v48, %v776_v43 }
 0x195   : > { %v1815_v8 = vmax.f32 %v1687_v18, 0.0 }
 0x198   : > { %7202 = vset.pattern.permute.xlu1 %v10201_v56  ;;  %v957_v62 = vpop.permute.xlu1 %956 }
 0x199   : > { %1008 = vperm.xlu1 %7202, %v8360_v11   ;;  %v7638_v11 = vld [vmem:[%s10158_s1 + $0x128] sm:$0xff]  ;;  %v1179_v55 = vmul.f32 %v8215_v63, %v957_v62  ;;  %v1180_v52 = vmul.f32 %v8217_v5, %v957_v62 }
 0x19b   : > { %v1307_v50 = vadd.f32 %v1179_v55, %v777_v15  ;;  %v1308_v57 = vadd.f32 %v1180_v52, %v778_v9  ;;  %v10209_v9 = vld [vmem:[#allocation15_spill] sm:$0xff] }
 0x19c   : > { %v1181_v58 = vmul.f32 %v8215_v63, %v10209_v9  ;;  %v1182_v4 = vmul.f32 %v8217_v5, %v10209_v9 }
 0x19d   : > { %1012 = vperm.xlu1 %7202, %v10207_v6   ;;  %v1475_v17 = vpop.permute.xlu1 %1474  ;;  %v1691_v42 = vadd.f32 %v8509_v40, %v1307_v50  ;;  %v1692_v27 = vadd.f32 %v8509_v40, %v1308_v57  ;;  %v7640_v40 = vld [vmem:[%s10158_s1 + $0x138] sm:$0xff] }
 0x19e   : > { %v1685_v0 = vadd.f32 %v1475_v17, %v1301_v1  ;;  %v1686_v51 = vadd.f32 %v1475_v17, %v1302_v54  ;;  %v7641_v50 = vld [vmem:[%s10158_s1 + $0x158] sm:$0xff] }
 0x19f   : > { %v1819_v18 = vmax.f32 %v1691_v42, 0.0  ;;  %v1820_v35 = vmax.f32 %v1692_v27, 0.0 }
 0x1a0   : > { %v1813_v37 = vmax.f32 %v1685_v0, 0.0  ;;  %v1814_v33 = vmax.f32 %v1686_v51, 0.0  ;;  %v8627_v0 = vpop.permute.xlu0 %605 }
 0x1a1   : > { %7203 = vset.pattern.permute.xlu1 %v10202_v46 }
 0x1a2   : > { %1534 = vperm.xlu1 %7203, %v7638_v11   ;;  %v521_v25 = vpop.permute.xlu1 %520  ;;  %v2048_v59 = vpack.c.bf16 %v1816_v2, %v1814_v33  ;;  %v2047_v47 = vpack.c.bf16 %v1815_v8, %v1813_v37 }
 0x1a4   : > { %3135 = vmatprep.subr.bf16.mxu0 %v2048_v59  ;;  %v8633_v37 = vpop.permute.xlu0 %615  ;;  %v779_v59 = vmul.f32 %v8221_v13, %v521_v25 }
 0x1a5   : > { %3136 = vmatpush1.bf16.msra.mxu0 %v2047_v47  ;;  %v780_v47 = vmul.f32 %v8223_v3, %v521_v25 }
 0x1a6   : > { %7204 = vset.pattern.permute.xlu1 %v10203_v53  ;;  %v526_v16 = vpop.permute.xlu1 %525 }
 0x1a7   : > { %590 = vperm.xlu1 %7204, %v8387_v20   ;;  %v781_v33 = vmul.f32 %v8221_v13, %v526_v16  ;;  %v782_v11 = vmul.f32 %v8223_v3, %v526_v16  ;;  %v1309_v16 = vadd.f32 %v1181_v58, %v779_v59  ;;  %v1310_v61 = vadd.f32 %v1182_v4, %v780_v47 }
 0x1a8   : > { %v8645_v48 = vpop.permute.xlu0 %625 }
 0x1ab   : > { %7205 = vset.pattern.permute.xlu1 %v10201_v56  ;;  %v965_v45 = vpop.permute.xlu1 %964 }
 0x1ac   : > { %1016 = vperm.xlu1 %7205, %v8387_v20   ;;  %v1183_v8 = vmul.f32 %v8215_v63, %v965_v45  ;;  %v1184_v2 = vmul.f32 %v8217_v5, %v965_v45 }
 0x1ae   : > { %v1311_v55 = vadd.f32 %v1183_v8, %v781_v33  ;;  %v1312_v52 = vadd.f32 %v1184_v2, %v782_v11  ;;  %v10210_v11 = vld [vmem:[#allocation16_spill] sm:$0xff] }
 0x1af   : > { %v1185_v59 = vmul.f32 %v8215_v63, %v10210_v11  ;;  %v1186_v47 = vmul.f32 %v8217_v5, %v10210_v11 }
 0x1b0   : > { %1020 = vperm.xlu1 %7205, %v7639_v38   ;;  %v1483_v14 = vpop.permute.xlu1 %1482  ;;  %v1696_v43 = vadd.f32 %v8540_v39, %v1312_v52  ;;  %v1695_v25 = vadd.f32 %v8540_v39, %v1311_v55 }
 0x1b1   : > { %v1689_v24 = vadd.f32 %v1483_v14, %v1305_v29  ;;  %v1690_v62 = vadd.f32 %v1483_v14, %v1306_v31  ;;  %v8653_v14 = vpop.permute.xlu0 %635 }
 0x1b2   : > { %v1824_v29 = vmax.f32 %v1696_v43, 0.0  ;;  %v1823_v31 = vmax.f32 %v1695_v25, 0.0  ;;  %v10211_v43 = vld [vmem:[#allocation17_spill] sm:$0xff] }
 0x1b3   : > { %v1817_v1 = vmax.f32 %v1689_v24, 0.0  ;;  %v1818_v20 = vmax.f32 %v1690_v62, 0.0  ;;  %v1189_v25 = vmul.f32 %v8215_v63, %v10211_v43 }
 0x1b4   : > { %7206 = vset.pattern.permute.xlu1 %v10202_v46 }
 0x1b5   : > { %1542 = vperm.xlu1 %7206, %v7640_v40   ;;  %v531_v54 = vpop.permute.xlu1 %530  ;;  %v2050_v6 = vpack.c.bf16 %v1820_v35, %v1818_v20  ;;  %v2049_v17 = vpack.c.bf16 %v1819_v18, %v1817_v1  ;;  %v8659_v20 = vpop.permute.xlu0 %645 }
 0x1b6   : > { %v783_v8 = vmul.f32 %v8221_v13, %v531_v54  ;;  %v784_v2 = vmul.f32 %v8223_v3, %v531_v54 }
 0x1b7   : > { %3137 = vmatprep.subr.bf16.mxu0 %v2050_v6 }
 0x1b8   : > { %3138 = vmatpush1.bf16.msra.mxu0 %v2049_v17  ;;  %v1314_v9 = vadd.f32 %v1186_v47, %v784_v2 }
 0x1b9   : > { %7207 = vset.pattern.permute.xlu1 %v10203_v53  ;;  %v536_v51 = vpop.permute.xlu1 %535  ;;  %v8671_v55 = vpop.permute.xlu0 %655 }
 0x1ba   : > { %600 = vperm.xlu1 %7207, %v8410_v36   ;;  %v785_v40 = vmul.f32 %v8221_v13, %v536_v51 }
 0x1be   : > { %7208 = vset.pattern.permute.xlu1 %v10201_v56  ;;  %v973_v15 = vpop.permute.xlu1 %972 }
 0x1bf   : > { %1024 = vperm.xlu1 %7208, %v8410_v36   ;;  %v1187_v18 = vmul.f32 %v8215_v63, %v973_v15  ;;  %v1188_v35 = vmul.f32 %v8217_v5, %v973_v15  ;;  %v1313_v15 = vadd.f32 %v1185_v59, %v783_v8 }
 0x1c1   : > { %v1315_v6 = vadd.f32 %v1187_v18, %v785_v40 }
 0x1c3   : > { %1028 = vperm.xlu1 %7208, %v7641_v50   ;;  %v1491_v36 = vpop.permute.xlu1 %1490  ;;  %v1699_v52 = vadd.f32 %v8551_v41, %v1315_v6 }
 0x1c4   : > { %v1693_v57 = vadd.f32 %v1491_v36, %v1309_v16  ;;  %v1694_v45 = vadd.f32 %v1491_v36, %v1310_v61 }
 0x1c6   : > { %v1821_v42 = vmax.f32 %v1693_v57, 0.0  ;;  %v1822_v27 = vmax.f32 %v1694_v45, 0.0  ;;  %v1827_v57 = vmax.f32 %v1699_v52, 0.0 }
 0x1c7   : > { %7209 = vset.pattern.permute.xlu1 %v10202_v46 }
 0x1c8   : > { %1550 = vperm.xlu1 %7209, %v7639_v38   ;;  %v541_v24 = vpop.permute.xlu1 %540  ;;  %v2052_v62 = vpack.c.bf16 %v1824_v29, %v1822_v27  ;;  %v2051_v39 = vpack.c.bf16 %v1823_v31, %v1821_v42  ;;  %v786_v38 = vmul.f32 %v8223_v3, %v536_v51  ;;  %v8686_v31 = vpop.permute.xlu0 %665 }
 0x1c9   : > { %v787_v54 = vmul.f32 %v8221_v13, %v541_v24  ;;  %v788_v58 = vmul.f32 %v8223_v3, %v541_v24 }
 0x1ca   : > { %3139 = vmatprep.subr.bf16.mxu0 %v2052_v62  ;;  %v1316_v17 = vadd.f32 %v1188_v35, %v786_v38 }
 0x1cb   : > { %3140 = vmatpush1.bf16.msra.mxu0 %v2051_v39  ;;  %v1317_v62 = vadd.f32 %v1189_v25, %v787_v54 }
 0x1cc   : > { %7210 = vset.pattern.permute.xlu1 %v10203_v53  ;;  %v546_v1 = vpop.permute.xlu1 %545  ;;  %v1700_v51 = vadd.f32 %v8551_v41, %v1316_v17  ;;  %v1190_v41 = vmul.f32 %v8217_v5, %v10211_v43  ;;  %v8691_v11 = vpop.permute.xlu0 %675  ;;  %v7643_v43 = vld [vmem:[%s10158_s1 + $0x178] sm:$0xff] }
 0x1cd   : > { %610 = vperm.xlu1 %7210, %v8438_v23   ;;  %v789_v18 = vmul.f32 %v8221_v13, %v546_v1  ;;  %v790_v35 = vmul.f32 %v8223_v3, %v546_v1 }
 0x1ce   : > { %v1828_v36 = vmax.f32 %v1700_v51, 0.0  ;;  %v1318_v39 = vadd.f32 %v1190_v41, %v788_v58  ;;  %v7248_v41 = vld [vmem:[%s10159_s2 + $0x20] ss:$16 sps:$4 sm:$0xff]  }
 0x1d0   : > { %v8696_v58 = vpop.permute.xlu0 %685 }
 0x1d1   : > { %7211 = vset.pattern.permute.xlu1 %v10201_v56  ;;  %v981_v33 = vpop.permute.xlu1 %980 }
 0x1d2   : > { %1032 = vperm.xlu1 %7211, %v8438_v23   ;;  %v7642_v23 = vld [vmem:[%s10158_s1 + $0x168] sm:$0xff]  ;;  %v1191_v45 = vmul.f32 %v8215_v63, %v981_v33  ;;  %v1192_v42 = vmul.f32 %v8217_v5, %v981_v33 }
 0x1d4   : > { %v1319_v8 = vadd.f32 %v1191_v45, %v789_v18  ;;  %v1320_v2 = vadd.f32 %v1192_v42, %v790_v35  ;;  %v8708_v25 = vpop.permute.xlu0 %695  ;;  %v791_v42 = vmul.f32 %v8221_v13, %v8592_v7 }
 0x1d6   : > { %1036 = vperm.xlu1 %7211, %v7642_v23   ;;  %v1499_v4 = vpop.permute.xlu1 %1498 }
 0x1d7   : > { %v1697_v16 = vadd.f32 %v1499_v4, %v1313_v15  ;;  %v1698_v61 = vadd.f32 %v1499_v4, %v1314_v9  ;;  %v7243_v4 = vld [vmem:[%s10159_s2] ss:$16 sps:$4 sm:$0xff]  }
 0x1d9   : > { %v1825_v27 = vmax.f32 %v1697_v16, 0.0  ;;  %v1826_v29 = vmax.f32 %v1698_v61, 0.0  ;;  %v7246_v16 = vld [vmem:[%s10159_s2 + $0x24] ss:$16 sps:$4 sm:$0xff]  }
 0x1da   : > { %7212 = vset.pattern.permute.xlu1 %v10202_v46  ;;  %v1507_v24 = vpop.permute.xlu1 %1506 }
 0x1db   : > { %1558 = vperm.xlu1 %7212, %v7641_v50   ;;  %v2054_v40 = vpack.c.bf16 %v1828_v36, %v1826_v29  ;;  %v2053_v38 = vpack.c.bf16 %v1827_v57, %v1825_v27  ;;  %v1701_v6 = vadd.f32 %v1507_v24, %v1317_v62  ;;  %v1702_v17 = vadd.f32 %v1507_v24, %v1318_v39  ;;  %v7249_v36 = vld [vmem:[%s10159_s2 + $0x44] ss:$16 sps:$4 sm:$0xff]   ;;  %v8717_v57 = vpop.permute.xlu0 %705  ;;  %v7251_v39 = vld [vmem:[%s10159_s2 + $0x40] ss:$16 sps:$4 sm:$0xff]  }
 0x1dc   : > { %v792_v27 = vmul.f32 %v8223_v3, %v8592_v7  ;;  %v1196_v62 = vmul.f32 %v8217_v5, %v8561_v60 }
 0x1dd   : > { %3141 = vmatprep.subr.bf16.mxu0 %v2054_v40  ;;  %v1829_v51 = vmax.f32 %v1701_v6, 0.0  ;;  %v1830_v1 = vmax.f32 %v1702_v17, 0.0  ;;  %v7252_v6 = vld [vmem:[%s10159_s2 + $0x64] ss:$16 sps:$4 sm:$0xff]  }
 0x1de   : > { %v1511_v33 = vpop.permute.xlu1 %1510  ;;  %3142 = vmatpush1.bf16.msra.mxu0 %v2053_v38 }
 0x1df   : > { %v1703_v59 = vadd.f32 %v1511_v33, %v1319_v8  ;;  %v1704_v47 = vadd.f32 %v1511_v33, %v1320_v2  ;;  %7213 = vset.pattern.permute.xlu1 %v10203_v53  ;;  %v1515_v17 = vpop.permute.xlu0 %1514 }
 0x1e0   : > { %620 = vperm.xlu1 %7213, %v8462_v26  }
 0x1e1   : > { %v1831_v50 = vmax.f32 %v1703_v59, 0.0  ;;  %v1832_v52 = vmax.f32 %v1704_v47, 0.0 }
 0x1e3   : > { %v556_v15 = vpop.permute.xlu1 %555  ;;  %v2056_v9 = vpack.c.bf16 %v1832_v52, %v1830_v1  ;;  %v2055_v54 = vpack.c.bf16 %v1831_v50, %v1829_v51  ;;  %v7644_v1 = vld [vmem:[%s10158_s1 + $0x188] sm:$0xff]  ;;  %v7254_v50 = vld [vmem:[%s10159_s2 + $0x60] ss:$16 sps:$4 sm:$0xff]  }
 0x1e4   : > { %7214 = vset.pattern.permute.xlu1 %v10201_v56  ;;  %v793_v7 = vmul.f32 %v8221_v13, %v556_v15  ;;  %v794_v18 = vmul.f32 %v8223_v3, %v556_v15 }
 0x1e5   : > { %1040 = vperm.xlu1 %7214, %v8462_v26   ;;  %3143 = vmatprep.subr.bf16.mxu0 %v2056_v9 }
 0x1e6   : > { %3144 = vmatpush1.bf16.msra.mxu0 %v2055_v54  ;;  %v1324_v33 = vadd.f32 %v1196_v62, %v794_v18  ;;  %v7255_v54 = vld [vmem:[%s10159_s2 + $0x84] ss:$16 sps:$4 sm:$0xff]  }
 0x1e8   : > { %v985_v61 = vpop.permute.xlu1 %984 }
 0x1e9   : > { %1044 = vperm.xlu1 %7214, %v7643_v43   ;;  %3146 = vmatmul.mubr.bf16.vlgmr.msra.gmra.mrb[0].mxu0 %v7243_v4  ;;  %v1193_v29 = vmul.f32 %v8215_v63, %v985_v61  ;;  %v1194_v24 = vmul.f32 %v8217_v5, %v985_v61 }
 0x1ea   : > { %3155 = vmatprep.mubr.bf16.mxu0 %v7246_v16 }
 0x1eb   : > { %v1321_v35 = vadd.f32 %v1193_v29, %v791_v42  ;;  %v1322_v40 = vadd.f32 %v1194_v24, %v792_v27  ;;  %v7258_v24 = vld [vmem:[%s10159_s2 + $0xa4] ss:$16 sps:$4 sm:$0xff]  }
 0x1ed   : > { %7215 = vset.pattern.permute.xlu1 %v10202_v46  ;;  %v561_v26 = vpop.permute.xlu1 %560  ;;  %v1706_v8 = vadd.f32 %v1515_v17, %v1322_v40 }
 0x1ee   : > { %1566 = vperm.xlu1 %7215, %v7642_v23   ;;  %v1195_v23 = vmul.f32 %v8215_v63, %v8561_v60  ;;  %v1705_v60 = vadd.f32 %v1515_v17, %v1321_v35  ;;  %v795_v42 = vmul.f32 %v8221_v13, %v561_v26  ;;  %v796_v27 = vmul.f32 %v8223_v3, %v561_v26 }
 0x1f0   : > { %v1323_v2 = vadd.f32 %v1195_v23, %v793_v7  ;;  %v1833_v52 = vmax.f32 %v1705_v60, 0.0  ;;  %v1523_v7 = vpop.permute.xlu0 %1522 }
 0x1f1   : > { %v8719_v45 = vpop.permute.xlu1 %565  ;;  %3156 = vmatmul.mubr.bf16.gmra.mrb[4].mxu0 %v7248_v41  ;;  %v1197_v41 = vmul.f32 %v8215_v63, %v8581_v30 }
 0x1f2   : > { %7216 = vset.pattern.permute.xlu1 %v10203_v53  ;;  %3165 = vmatprep.mubr.bf16.mxu0 %v7249_v36  ;;  %v1198_v36 = vmul.f32 %v8217_v5, %v8581_v30  ;;  %v797_v18 = vmul.f32 %v8221_v13, %v8719_v45  ;;  %v798_v35 = vmul.f32 %v8223_v3, %v8719_v45 }
 0x1f3   : > { %630 = vperm.xlu1 %7216, %v8492_v34   ;;  %v1325_v23 = vadd.f32 %v1197_v41, %v795_v42  ;;  %v801_v42 = vmul.f32 %v8221_v13, %v8598_v44 }
 0x1f4   : > { %v1326_v62 = vadd.f32 %v1198_v36, %v796_v27  ;;  %v802_v27 = vmul.f32 %v8223_v3, %v8598_v44  ;;  %v7267_v44 = vld [vmem:[%s10159_s2 + $0x104] ss:$16 sps:$4 sm:$0xff]  }
 0x1f5   : > { %v1709_v40 = vadd.f32 %v1523_v7, %v1325_v23 }
 0x1f6   : > { %v997_v38 = vpop.permute.xlu1 %996 }
 0x1f7   : > { %7217 = vset.pattern.permute.xlu1 %v10201_v56  ;;  %v1199_v30 = vmul.f32 %v8215_v63, %v997_v38  ;;  %v1837_v45 = vmax.f32 %v1709_v40, 0.0 }
 0x1f8   : > { %1048 = vperm.xlu1 %7217, %v8492_v34   ;;  %v1834_v34 = vmax.f32 %v1706_v8, 0.0 }
 0x1f9   : > { %3166 = vmatmul.mubr.bf16.gmra.mrb[8].mxu0 %v7251_v39  ;;  %v1200_v39 = vmul.f32 %v8217_v5, %v997_v38  ;;  %v1327_v17 = vadd.f32 %v1199_v30, %v797_v18  ;;  %v7260_v38 = vld [vmem:[%s10159_s2 + $0xa0] ss:$16 sps:$4 sm:$0xff]   ;;  %v1531_v30 = vpop.permute.xlu0 %1530 }
 0x1fa   : > { %3175 = vmatprep.mubr.bf16.mxu0 %v7252_v6  ;;  %v1710_v6 = vadd.f32 %v1523_v7, %v1326_v62 }
 0x1fb   : > { %v1519_v59 = vpop.permute.xlu1 %1518  ;;  %v1328_v60 = vadd.f32 %v1200_v39, %v798_v35 }
 0x1fc   : > { %v1707_v47 = vadd.f32 %v1519_v59, %v1323_v2  ;;  %v1708_v51 = vadd.f32 %v1519_v59, %v1324_v33  ;;  %1052 = vperm.xlu1 %7217, %v7644_v1   ;;  %v7261_v2 = vld [vmem:[%s10159_s2 + $0xc4] ss:$16 sps:$4 sm:$0xff]  }
 0x1fe   : > { %v1835_v15 = vmax.f32 %v1707_v47, 0.0  ;;  %v1836_v9 = vmax.f32 %v1708_v51, 0.0  ;;  %v1838_v47 = vmax.f32 %v1710_v6, 0.0 }
 0x200   : > { %v2057_v4 = vpack.c.bf16 %v1835_v15, %v1833_v52  ;;  %7218 = vset.pattern.permute.xlu1 %v10202_v46  ;;  %v571_v16 = vpop.permute.xlu1 %570  ;;  %v2058_v61 = vpack.c.bf16 %v1836_v9, %v1834_v34  ;;  %v7263_v9 = vld [vmem:[%s10159_s2 + $0xc0] ss:$16 sps:$4 sm:$0xff]  }
 0x201   : > { %1574 = vperm.xlu1 %7218, %v7643_v43   ;;  %3176 = vmatmul.mubr.bf16.gmra.mrb[12].mxu0 %v7254_v50  ;;  %v7257_v43 = vld [vmem:[%s10159_s2 + $0x80] ss:$16 sps:$4 sm:$0xff]   ;;  %v800_v36 = vmul.f32 %v8223_v3, %v571_v16 }
 0x202   : > { %3466 = vmatprep.subr.bf16.mxu0 %v2058_v61  ;;  %3185 = vmatprep.mubr.bf16.mxu0 %v7255_v54  ;;  %v7264_v54 = vld [vmem:[%s10159_s2 + $0xe4] ss:$16 sps:$4 sm:$0xff]  }
 0x203   : > { %3467 = vmatpush1.bf16.msra.mxu0 %v2057_v4 }
 0x205   : > { %7219 = vset.pattern.permute.xlu1 %v10203_v53  ;;  %v1001_v29 = vpop.permute.xlu1 %1000 }
 0x206   : > { %640 = vperm.xlu1 %7219, %v8500_v21   ;;  %v1201_v4 = vmul.f32 %v8215_v63, %v1001_v29  ;;  %v1202_v61 = vmul.f32 %v8217_v5, %v1001_v29 }
 0x208   : > { %v1330_v23 = vadd.f32 %v1202_v61, %v800_v36  ;;  %v2090_v61 = vld [vmem:[%s10160_s3 + $0x8] sm:$0xff] }
 0x209   : > { %v1005_v26 = vpop.permute.xlu1 %1004  ;;  %3186 = vmatmul.mubr.bf16.gmra.mrb[16].mxu0 %v7257_v43  ;;  %2160 = vperm.xlu0 %7242, %v2090_v61  }
 0x20a   : > { %7220 = vset.pattern.permute.xlu1 %v10201_v56  ;;  %3195 = vmatprep.mubr.bf16.mxu0 %v7258_v24  ;;  %v1203_v43 = vmul.f32 %v8215_v63, %v1005_v26  ;;  %v1204_v29 = vmul.f32 %v8217_v5, %v1005_v26  ;;  %v1714_v7 = vadd.f32 %v1531_v30, %v1330_v23 }
 0x20b   : > { %1056 = vperm.xlu1 %7220, %v8500_v21   ;;  %v7645_v21 = vld [vmem:[%s10158_s1 + $0x198] sm:$0xff] }
 0x20c   : > { %v1331_v18 = vadd.f32 %v1203_v43, %v801_v42  ;;  %v1332_v26 = vadd.f32 %v1204_v29, %v802_v27  ;;  %v7273_v43 = vld [vmem:[%s10159_s2 + $0x144] ss:$16 sps:$4 sm:$0xff]  }
 0x20e   : > { %v1527_v8 = vpop.permute.xlu1 %1526 }
 0x20f   : > { %v1711_v33 = vadd.f32 %v1527_v8, %v1327_v17  ;;  %v1712_v59 = vadd.f32 %v1527_v8, %v1328_v60  ;;  %1060 = vperm.xlu1 %7220, %v7645_v21   ;;  %v8814_v17 = vld [vmem:[%s10158_s1 + $0x1a8] sm:$0xff]  ;;  %v1842_v60 = vmax.f32 %v1714_v7, 0.0  ;;  %v7275_v7 = vld [vmem:[%s10159_s2 + $0x140] ss:$16 sps:$4 sm:$0xff]  }
 0x211   : > { %v1839_v51 = vmax.f32 %v1711_v33, 0.0  ;;  %v1840_v50 = vmax.f32 %v1712_v59, 0.0  ;;  %3196 = vmatmul.mubr.bf16.gmra.mrb[20].mxu0 %v7260_v38 }
 0x212   : > { %3205 = vmatprep.mubr.bf16.mxu0 %v7261_v2 }
 0x213   : > { %v2059_v52 = vpack.c.bf16 %v1839_v51, %v1837_v45  ;;  %7221 = vset.pattern.permute.xlu1 %v10202_v46  ;;  %v581_v34 = vpop.permute.xlu1 %580  ;;  %v2060_v15 = vpack.c.bf16 %v1840_v50, %v1838_v47  ;;  %v7269_v45 = vld [vmem:[%s10159_s2 + $0x100] ss:$16 sps:$4 sm:$0xff]   ;;  %v7270_v47 = vld [vmem:[%s10159_s2 + $0x124] ss:$16 sps:$4 sm:$0xff]  }
 0x214   : > { %1582 = vperm.xlu1 %7221, %v7644_v1   ;;  %v799_v1 = vmul.f32 %v8221_v13, %v571_v16  ;;  %v7266_v16 = vld [vmem:[%s10159_s2 + $0xe0] ss:$16 sps:$4 sm:$0xff]  }
 0x215   : > { %3468 = vmatprep.subr.bf16.mxu0 %v2060_v15  ;;  %v803_v15 = vmul.f32 %v8221_v13, %v581_v34 }
 0x216   : > { %3469 = vmatpush1.bf16.msra.mxu0 %v2059_v52  ;;  %v1329_v24 = vadd.f32 %v1201_v4, %v799_v1  ;;  %v7272_v4 = vld [vmem:[%s10159_s2 + $0x120] ss:$16 sps:$4 sm:$0xff]  }
 0x218   : > { %7222 = vset.pattern.permute.xlu1 %v10203_v53  ;;  %v1009_v41 = vpop.permute.xlu1 %1008  ;;  %v1713_v39 = vadd.f32 %v1531_v30, %v1329_v24 }
 0x219   : > { %650 = vperm.xlu1 %7222, %v8517_v10   ;;  %3206 = vmatmul.mubr.bf16.gmra.mrb[24].mxu0 %v7263_v9  ;;  %v1205_v51 = vmul.f32 %v8215_v63, %v1009_v41  ;;  %v1206_v50 = vmul.f32 %v8217_v5, %v1009_v41  ;;  %v805_v9 = vmul.f32 %v8221_v13, %v8606_v32 }
 0x21a   : > { %3215 = vmatprep.mubr.bf16.mxu0 %v7264_v54  ;;  %v806_v41 = vmul.f32 %v8223_v3, %v8606_v32  ;;  %v2093_v32 = vld [vmem:[%s10160_s3 + $0x20] sm:$0xff] }
 0x21b   : > { %v1333_v54 = vadd.f32 %v1205_v51, %v803_v15  ;;  %2175 = vperm.xlu0 %7242, %v2093_v32   ;;  %v809_v15 = vmul.f32 %v8221_v13, %v8618_v12  ;;  %v7282_v32 = vld [vmem:[%s10159_s2 + $0x1a4] ss:$16 sps:$4 sm:$0xff]  }
 0x21c   : > { %v1013_v62 = vpop.permute.xlu1 %1012 }
 0x21d   : > { %7223 = vset.pattern.permute.xlu1 %v10201_v56  ;;  %v1207_v1 = vmul.f32 %v8215_v63, %v1013_v62  ;;  %v1208_v36 = vmul.f32 %v8217_v5, %v1013_v62 }
 0x21e   : > { %1064 = vperm.xlu1 %7223, %v8517_v10   ;;  %v1841_v10 = vmax.f32 %v1713_v39, 0.0  ;;  %v8855_v39 = vld [vmem:[%s10158_s1 + $0x1b8] sm:$0xff] }
 0x21f   : > { %v1335_v23 = vadd.f32 %v1207_v1, %v805_v9  ;;  %v1336_v62 = vadd.f32 %v1208_v36, %v806_v41 }
 0x221   : > { %v1535_v35 = vpop.permute.xlu1 %1534  ;;  %3216 = vmatmul.mubr.bf16.gmra.mrb[28].mxu0 %v7266_v16 }
 0x222   : > { %v1715_v40 = vadd.f32 %v1535_v35, %v1331_v18  ;;  %v1716_v6 = vadd.f32 %v1535_v35, %v1332_v26  ;;  %1068 = vperm.xlu1 %7223, %v8814_v17   ;;  %3225 = vmatprep.mubr.bf16.mxu0 %v7267_v44 }
 0x224   : > { %v1843_v38 = vmax.f32 %v1715_v40, 0.0  ;;  %v1844_v8 = vmax.f32 %v1716_v6, 0.0  ;;  %v7276_v6 = vld [vmem:[%s10159_s2 + $0x164] ss:$16 sps:$4 sm:$0xff]  }
 0x226   : > { %v2061_v2 = vpack.c.bf16 %v1843_v38, %v1841_v10  ;;  %7224 = vset.pattern.permute.xlu1 %v10202_v46  ;;  %v8818_v33 = vpop.permute.xlu1 %590  ;;  %v2062_v59 = vpack.c.bf16 %v1844_v8, %v1842_v60  ;;  %v2097_v8 = vld [vmem:[%s10160_s3 + $0x40] sm:$0xff] }
 0x227   : > { %1590 = vperm.xlu1 %7224, %v7645_v21   ;;  %v804_v21 = vmul.f32 %v8223_v3, %v581_v34  ;;  %v1539_v34 = vpop.permute.xlu0 %1538  ;;  %v807_v51 = vmul.f32 %v8221_v13, %v8818_v33 }
 0x228   : > { %3470 = vmatprep.subr.bf16.mxu0 %v2062_v59  ;;  %v1717_v29 = vadd.f32 %v1539_v34, %v1333_v54 }
 0x229   : > { %3471 = vmatpush1.bf16.msra.mxu0 %v2061_v2  ;;  %v1334_v42 = vadd.f32 %v1206_v50, %v804_v21  ;;  %v808_v50 = vmul.f32 %v8223_v3, %v8818_v33  ;;  %v810_v21 = vmul.f32 %v8223_v3, %v8618_v12  ;;  %v2101_v33 = vld [vmem:[%s10160_s3 + $0x60] sm:$0xff] }
 0x22a   : > { %3226 = vmatmul.mubr.bf16.gmra.mrb[32].mxu0 %v7269_v45  ;;  %v1845_v18 = vmax.f32 %v1717_v29, 0.0 }
 0x22b   : > { %7225 = vset.pattern.permute.xlu1 %v10203_v53  ;;  %v1017_v52 = vpop.permute.xlu1 %1016  ;;  %3235 = vmatprep.mubr.bf16.mxu0 %v7270_v47  ;;  %v1718_v24 = vadd.f32 %v1539_v34, %v1334_v42  ;;  %v2099_v47 = vld [vmem:[%s10160_s3 + $0x50] sm:$0xff]  ;;  %v1547_v1 = vpop.permute.xlu0 %1546 }
 0x22c   : > { %660 = vperm.xlu1 %7225, %v8537_v49   ;;  %v1209_v2 = vmul.f32 %v8215_v63, %v1017_v52  ;;  %v1210_v59 = vmul.f32 %v8217_v5, %v1017_v52  ;;  %v7279_v52 = vld [vmem:[%s10159_s2 + $0x184] ss:$16 sps:$4 sm:$0xff]  }
 0x22d   : > { %v1846_v26 = vmax.f32 %v1718_v24, 0.0 }
 0x22e   : > { %v1338_v61 = vadd.f32 %v1210_v59, %v808_v50 }
 0x22f   : > { %v1021_v27 = vpop.permute.xlu1 %1020 }
 0x230   : > { %7226 = vset.pattern.permute.xlu1 %v10201_v56  ;;  %v1211_v9 = vmul.f32 %v8215_v63, %v1021_v27  ;;  %v1212_v54 = vmul.f32 %v8217_v5, %v1021_v27  ;;  %v1722_v36 = vadd.f32 %v1547_v1, %v1338_v61  ;;  %v7281_v27 = vld [vmem:[%s10159_s2 + $0x180] ss:$16 sps:$4 sm:$0xff]  }
 0x231   : > { %1072 = vperm.xlu1 %7226, %v8537_v49   ;;  %v2095_v49 = vld [vmem:[%s10160_s3 + $0x30] sm:$0xff] }
 0x232   : > { %3236 = vmatmul.mubr.bf16.gmra.mrb[36].mxu0 %v7272_v4  ;;  %2185 = vperm.xlu0 %7242, %v2095_v49   ;;  %v1337_v4 = vadd.f32 %v1209_v2, %v807_v51  ;;  %v1339_v34 = vadd.f32 %v1211_v9, %v809_v15  ;;  %v1340_v42 = vadd.f32 %v1212_v54, %v810_v21  ;;  %v2105_v49 = vld [vmem:[%s10160_s3 + $0x80] sm:$0xff]  ;;  %v1555_v21 = vpop.permute.xlu0 %1554  ;;  %v2111_v9 = vld [vmem:[%s10160_s3 + $0xb0] sm:$0xff] }
 0x233   : > { %3245 = vmatprep.mubr.bf16.mxu0 %v7273_v43  ;;  %v2103_v43 = vld [vmem:[%s10160_s3 + $0x70] sm:$0xff] }
 0x234   : > { %v1543_v30 = vpop.permute.xlu1 %1542  ;;  %v1721_v12 = vadd.f32 %v1547_v1, %v1337_v4  ;;  %v2113_v1 = vld [vmem:[%s10160_s3 + $0xc0] sm:$0xff] }
 0x235   : > { %v1719_v16 = vadd.f32 %v1543_v30, %v1335_v23  ;;  %v1720_v44 = vadd.f32 %v1543_v30, %v1336_v62  ;;  %1076 = vperm.xlu1 %7226, %v8855_v39   ;;  %v8914_v23 = vld [vmem:[%s10158_s1 + $0x1c8] sm:$0xff]  ;;  %v1850_v30 = vmax.f32 %v1722_v36, 0.0 }
 0x236   : > { %2195 = vperm.xlu0 %7242, %v2097_v8   ;;  %v1849_v62 = vmax.f32 %v1721_v12, 0.0  ;;  %v2109_v8 = vld [vmem:[%s10160_s3 + $0xa0] sm:$0xff] }
 0x237   : > { %v1847_v35 = vmax.f32 %v1719_v16, 0.0  ;;  %v1848_v40 = vmax.f32 %v1720_v44, 0.0 }
 0x239   : > { %v2063_v10 = vpack.c.bf16 %v1847_v35, %v1845_v18  ;;  %7227 = vset.pattern.permute.xlu1 %v10202_v46  ;;  %v8868_v60 = vpop.permute.xlu1 %600  ;;  %v2064_v38 = vpack.c.bf16 %v1848_v40, %v1846_v26  ;;  %v7284_v35 = vld [vmem:[%s10159_s2 + $0x1a0] ss:$16 sps:$4 sm:$0xff]  }
 0x23a   : > { %1598 = vperm.xlu1 %7227, %v8814_v17   ;;  %3246 = vmatmul.mubr.bf16.gmra.mrb[40].mxu0 %v7275_v7  ;;  %v7278_v17 = vld [vmem:[%s10159_s2 + $0x160] ss:$16 sps:$4 sm:$0xff]   ;;  %v811_v2 = vmul.f32 %v8221_v13, %v8868_v60  ;;  %v812_v59 = vmul.f32 %v8223_v3, %v8868_v60 }
 0x23b   : > { %3472 = vmatprep.subr.bf16.mxu0 %v2064_v38  ;;  %3255 = vmatprep.mubr.bf16.mxu0 %v7276_v6  ;;  %v2107_v40 = vld [vmem:[%s10160_s3 + $0x90] sm:$0xff] }
 0x23c   : > { %3473 = vmatpush1.bf16.msra.mxu0 %v2063_v10  ;;  %2205 = vperm.xlu0 %7242, %v2099_v47   ;;  %v7285_v6 = vld [vmem:[%s10159_s2 + $0x1c4] ss:$16 sps:$4 sm:$0xff]   ;;  %v7287_v60 = vld [vmem:[%s10159_s2 + $0x1c0] ss:$16 sps:$4 sm:$0xff]  }
 0x23e   : > { %7228 = vset.pattern.permute.xlu1 %v10203_v53  ;;  %v1025_v45 = vpop.permute.xlu1 %1024 }
 0x23f   : > { %670 = vperm.xlu1 %7228, %v8547_v22   ;;  %v1213_v10 = vmul.f32 %v8215_v63, %v1025_v45  ;;  %v1214_v38 = vmul.f32 %v8217_v5, %v1025_v45  ;;  %v813_v45 = vmul.f32 %v8221_v13, %v8627_v0 }
 0x240   : > { %2215 = vperm.xlu0 %7242, %v2101_v33  }
 0x241   : > { %v1341_v50 = vadd.f32 %v1213_v10, %v811_v2  ;;  %v7294_v2 = vld [vmem:[%s10159_s2 + $0x224] ss:$16 sps:$4 sm:$0xff]  }
 0x242   : > { %v1029_v41 = vpop.permute.xlu1 %1028  ;;  %3256 = vmatmul.mubr.bf16.gmra.mrb[44].mxu0 %v7278_v17  ;;  %v814_v17 = vmul.f32 %v8223_v3, %v8627_v0  ;;  %v7288_v0 = vld [vmem:[%s10159_s2 + $0x1e4] ss:$16 sps:$4 sm:$0xff]  }
 0x243   : > { %7229 = vset.pattern.permute.xlu1 %v10201_v56  ;;  %3265 = vmatprep.mubr.bf16.mxu0 %v7279_v52  ;;  %v1215_v47 = vmul.f32 %v8215_v63, %v1029_v41  ;;  %v1216_v51 = vmul.f32 %v8217_v5, %v1029_v41  ;;  %v1342_v52 = vadd.f32 %v1214_v38, %v812_v59  ;;  %v7650_v59 = vld [vmem:[%s10158_s1 + $0x1e0] sm:$0xff] }
 0x244   : > { %1080 = vperm.xlu1 %7229, %v8547_v22   ;;  %2225 = vperm.xlu0 %7242, %v2103_v43   ;;  %v1725_v54 = vadd.f32 %v1555_v21, %v1341_v50 }
 0x245   : > { %v1726_v4 = vadd.f32 %v1555_v21, %v1342_v52  ;;  %v1343_v61 = vadd.f32 %v1215_v47, %v813_v45  ;;  %v1344_v41 = vadd.f32 %v1216_v51, %v814_v17  ;;  %v2121_v45 = vld [vmem:[%s10160_s3 + $0x100] sm:$0xff] }
 0x247   : > { %v1551_v29 = vpop.permute.xlu1 %1550 }
 0x248   : > { %v1723_v22 = vadd.f32 %v1551_v29, %v1339_v34  ;;  %v1724_v24 = vadd.f32 %v1551_v29, %v1340_v42  ;;  %1084 = vperm.xlu1 %7229, %v8914_v23   ;;  %2235 = vperm.xlu0 %7242, %v2105_v49   ;;  %v1853_v34 = vmax.f32 %v1725_v54, 0.0  ;;  %v1854_v42 = vmax.f32 %v1726_v4, 0.0  ;;  %v2115_v29 = vld [vmem:[%s10160_s3 + $0xd0] sm:$0xff] }
 0x24a   : > { %v1851_v16 = vmax.f32 %v1723_v22, 0.0  ;;  %v1852_v44 = vmax.f32 %v1724_v24, 0.0  ;;  %3266 = vmatmul.mubr.bf16.gmra.mrb[48].mxu0 %v7281_v27 }
 0x24b   : > { %3275 = vmatprep.mubr.bf16.mxu0 %v7282_v32 }
 0x24c   : > { %v2065_v7 = vpack.c.bf16 %v1851_v16, %v1849_v62  ;;  %7230 = vset.pattern.permute.xlu1 %v10202_v46  ;;  %v8921_v18 = vpop.permute.xlu1 %610  ;;  %v2066_v26 = vpack.c.bf16 %v1852_v44, %v1850_v30  ;;  %2245 = vperm.xlu0 %7242, %v2107_v40   ;;  %v7290_v62 = vld [vmem:[%s10159_s2 + $0x1e0] ss:$16 sps:$4 sm:$0xff]   ;;  %v7291_v30 = vld [vmem:[%s10159_s2 + $0x204] ss:$16 sps:$4 sm:$0xff]   ;;  %v818_v40 = vmul.f32 %v8223_v3, %v8633_v37 }
 0x24d   : > { %1606 = vperm.xlu1 %7230, %v8855_v39   ;;  %v2117_v16 = vld [vmem:[%s10160_s3 + $0xe0] sm:$0xff] }
 0x24e   : > { %3474 = vmatprep.subr.bf16.mxu0 %v2066_v26  ;;  %v816_v26 = vmul.f32 %v8223_v3, %v8921_v18 }
 0x24f   : > { %3475 = vmatpush1.bf16.msra.mxu0 %v2065_v7 }
 0x250   : > { %2255 = vperm.xlu0 %7242, %v2109_v8  }
 0x251   : > { %7231 = vset.pattern.permute.xlu1 %v10203_v53  ;;  %v1033_v39 = vpop.permute.xlu1 %1032 }
 0x252   : > { %680 = vperm.xlu1 %7231, %v8556_v19   ;;  %3276 = vmatmul.mubr.bf16.gmra.mrb[52].mxu0 %v7284_v35  ;;  %v1217_v44 = vmul.f32 %v8215_v63, %v1033_v39  ;;  %v1218_v49 = vmul.f32 %v8217_v5, %v1033_v39  ;;  %v817_v35 = vmul.f32 %v8221_v13, %v8633_v37  ;;  %v1563_v37 = vpop.permute.xlu0 %1562 }
 0x253   : > { %3285 = vmatprep.mubr.bf16.mxu0 %v7285_v6  ;;  %v7293_v6 = vld [vmem:[%s10159_s2 + $0x200] ss:$16 sps:$4 sm:$0xff]  }
 0x254   : > { %2265 = vperm.xlu0 %7242, %v2111_v9   ;;  %v7296_v9 = vld [vmem:[%s10159_s2 + $0x220] ss:$16 sps:$4 sm:$0xff]  }
 0x255   : > { %v1037_v15 = vpop.permute.xlu1 %1036 }
 0x256   : > { %7232 = vset.pattern.permute.xlu1 %v10201_v56  ;;  %v1219_v10 = vmul.f32 %v8215_v63, %v1037_v15  ;;  %v1220_v38 = vmul.f32 %v8217_v5, %v1037_v15 }
 0x257   : > { %1088 = vperm.xlu1 %7232, %v8556_v19   ;;  %v8967_v19 = vld [vmem:[%s10158_s1 + $0x1d8] sm:$0xff] }
 0x258   : > { %2275 = vperm.xlu0 %7242, %v2113_v1   ;;  %v1347_v51 = vadd.f32 %v1219_v10, %v817_v35  ;;  %v1348_v50 = vadd.f32 %v1220_v38, %v818_v40  ;;  %v1571_v40 = vpop.permute.xlu0 %1570  ;;  %v7302_v38 = vld [vmem:[%s10159_s2 + $0x260] ss:$16 sps:$4 sm:$0xff]  }
 0x25a   : > { %v1559_v33 = vpop.permute.xlu1 %1558  ;;  %3286 = vmatmul.mubr.bf16.gmra.mrb[56].mxu0 %v7287_v60  ;;  %v9019_v60 = vld [vmem:[%s10158_s1 + $0x1e8] sm:$0xff] }
 0x25b   : > { %v1727_v12 = vadd.f32 %v1559_v33, %v1343_v61  ;;  %v1728_v36 = vadd.f32 %v1559_v33, %v1344_v41  ;;  %1092 = vperm.xlu1 %7232, %v8967_v19   ;;  %3295 = vmatprep.mubr.bf16.mxu0 %v7288_v0  ;;  %v2123_v0 = vld [vmem:[%s10160_s3 + $0x110] sm:$0xff] }
 0x25c   : > { %2285 = vperm.xlu0 %7242, %v2115_v29   ;;  %v7297_v33 = vld [vmem:[%s10159_s2 + $0x244] ss:$16 sps:$4 sm:$0xff]   ;;  %v7299_v29 = vld [vmem:[%s10159_s2 + $0x240] ss:$16 sps:$4 sm:$0xff]  }
 0x25d   : > { %v1855_v27 = vmax.f32 %v1727_v12, 0.0  ;;  %v1856_v43 = vmax.f32 %v1728_v36, 0.0 }
 0x25f   : > { %v2067_v32 = vpack.c.bf16 %v1855_v27, %v1853_v34  ;;  %7233 = vset.pattern.permute.xlu1 %v10202_v46  ;;  %v8974_v22 = vpop.permute.xlu1 %620  ;;  %v2068_v24 = vpack.c.bf16 %v1856_v43, %v1854_v42  ;;  %v2125_v34 = vld [vmem:[%s10160_s3 + $0x120] sm:$0xff]  ;;  %v386_v42 = vld [vmem:[%s10158_s1 + $0x1f0] sm:$0xff] }
 0x260   : > { %1614 = vperm.xlu1 %7233, %v8914_v23   ;;  %2295 = vperm.xlu0 %7242, %v2117_v16   ;;  %v815_v23 = vmul.f32 %v8221_v13, %v8921_v18  ;;  %v1346_v18 = vadd.f32 %v1218_v49, %v816_v26  ;;  %v821_v16 = vmul.f32 %v8221_v13, %v8645_v48 }
 0x261   : > { %3476 = vmatprep.subr.bf16.mxu0 %v2068_v24  ;;  %v819_v24 = vmul.f32 %v8221_v13, %v8974_v22 }
 0x262   : > { %3477 = vmatpush1.bf16.msra.mxu0 %v2067_v32  ;;  %v1345_v39 = vadd.f32 %v1217_v44, %v815_v23  ;;  %v1730_v47 = vadd.f32 %v1563_v37, %v1346_v18  ;;  %v2127_v32 = vld [vmem:[%s10160_s3 + $0x130] sm:$0xff]  ;;  %v822_v44 = vmul.f32 %v8223_v3, %v8645_v48 }
 0x263   : > { %3296 = vmatmul.mubr.bf16.gmra.mrb[60].mxu0 %v7290_v62  ;;  %v820_v62 = vmul.f32 %v8223_v3, %v8974_v22  ;;  %v2129_v22 = vld [vmem:[%s10160_s3 + $0x140] sm:$0xff] }
 0x264   : > { %7234 = vset.pattern.permute.xlu1 %v10203_v53  ;;  %v1041_v7 = vpop.permute.xlu1 %1040  ;;  %3305 = vmatprep.mubr.bf16.mxu0 %v7291_v30  ;;  %v1729_v17 = vadd.f32 %v1563_v37, %v1345_v39  ;;  %v1858_v4 = vmax.f32 %v1730_v47, 0.0  ;;  %v7300_v30 = vld [vmem:[%s10159_s2 + $0x264] ss:$16 sps:$4 sm:$0xff]   ;;  %v7652_v37 = vld [vmem:[%s10158_s1 + $0x1f8] sm:$0xff] }
 0x265   : > { %690 = vperm.xlu1 %7234, %v8567_v28   ;;  %v2119_v28 = vld [vmem:[%s10160_s3 + $0xf0] sm:$0xff]  ;;  %v1221_v27 = vmul.f32 %v8215_v63, %v1041_v7  ;;  %v1222_v43 = vmul.f32 %v8217_v5, %v1041_v7 }
 0x266   : > { %2305 = vperm.xlu0 %7242, %v2119_v28   ;;  %v1857_v54 = vmax.f32 %v1729_v17, 0.0  ;;  %v2131_v39 = vld [vmem:[%s10160_s3 + $0x150] sm:$0xff] }
 0x267   : > { %v1349_v23 = vadd.f32 %v1221_v27, %v819_v24  ;;  %v1350_v26 = vadd.f32 %v1222_v43, %v820_v62  ;;  %v7309_v24 = vld [vmem:[%s10159_s2 + $0x2c4] ss:$16 sps:$4 sm:$0xff]  }
 0x268   : > { %v1045_v8 = vpop.permute.xlu1 %1044 }
 0x269   : > { %7235 = vset.pattern.permute.xlu1 %v10201_v56  ;;  %v1223_v49 = vmul.f32 %v8215_v63, %v1045_v8  ;;  %v1224_v7 = vmul.f32 %v8217_v5, %v1045_v8  ;;  %v1733_v48 = vadd.f32 %v1571_v40, %v1349_v23 }
 0x26a   : > { %1096 = vperm.xlu1 %7235, %v7650_v59   ;;  %2315 = vperm.xlu0 %7242, %v2121_v45  }
 0x26b   : > { %3306 = vmatmul.mubr.bf16.gmra.mrb[64].mxu0 %v7293_v6  ;;  %v1734_v6 = vadd.f32 %v1571_v40, %v1350_v26  ;;  %v1351_v28 = vadd.f32 %v1223_v49, %v821_v16  ;;  %v1352_v10 = vadd.f32 %v1224_v7, %v822_v44  ;;  %v1861_v59 = vmax.f32 %v1733_v48, 0.0  ;;  %v2141_v49 = vld [vmem:[%s10160_s3 + $0x1a0] sm:$0xff]  ;;  %v2092_v26 = vld [vmem:[%s10160_s3 + $0x18] sm:$0xff] }
 0x26c   : > { %3315 = vmatprep.mubr.bf16.mxu0 %v7294_v2 }
 0x26d   : > { %v1567_v52 = vpop.permute.xlu1 %1566  ;;  %v1862_v45 = vmax.f32 %v1734_v6, 0.0  ;;  %v2143_v6 = vld [vmem:[%s10160_s3 + $0x1b0] sm:$0xff] }
 0x26e   : > { %v1731_v15 = vadd.f32 %v1567_v52, %v1347_v51  ;;  %v1732_v21 = vadd.f32 %v1567_v52, %v1348_v50  ;;  %1100 = vperm.xlu1 %7235, %v9019_v60   ;;  %2325 = vperm.xlu0 %7242, %v2123_v0   ;;  %v2133_v51 = vld [vmem:[%s10160_s3 + $0x160] sm:$0xff] }
 0x270   : > { %v1859_v61 = vmax.f32 %v1731_v15, 0.0  ;;  %v1860_v41 = vmax.f32 %v1732_v21, 0.0  ;;  %v7305_v21 = vld [vmem:[%s10159_s2 + $0x280] ss:$16 sps:$4 sm:$0xff]  }
 0x272   : > { %v2069_v1 = vpack.c.bf16 %v1859_v61, %v1857_v54  ;;  %7236 = vset.pattern.permute.xlu1 %v10202_v46  ;;  %v9032_v12 = vpop.permute.xlu1 %630  ;;  %v2070_v36 = vpack.c.bf16 %v1860_v41, %v1858_v4  ;;  %2335 = vperm.xlu0 %7242, %v2125_v34   ;;  %v2137_v61 = vld [vmem:[%s10160_s3 + $0x180] sm:$0xff] }
 0x273   : > { %1622 = vperm.xlu1 %7236, %v8967_v19   ;;  %3316 = vmatmul.mubr.bf16.gmra.mrb[68].mxu0 %v7296_v9  ;;  %v2135_v9 = vld [vmem:[%s10160_s3 + $0x170] sm:$0xff]  ;;  %v823_v4 = vmul.f32 %v8221_v13, %v9032_v12  ;;  %v824_v41 = vmul.f32 %v8223_v3, %v9032_v12  ;;  %v1579_v12 = vpop.permute.xlu0 %1578 }
 0x274   : > { %3478 = vmatprep.subr.bf16.mxu0 %v2070_v36  ;;  %3325 = vmatprep.mubr.bf16.mxu0 %v7297_v33  ;;  %v2089_v33 = vld [vmem:[%s10160_s3] sm:$0xff]  ;;  %v826_v36 = vmul.f32 %v8223_v3, %v8653_v14 }
 0x275   : > { %3479 = vmatpush1.bf16.msra.mxu0 %v2069_v1  ;;  %v825_v1 = vmul.f32 %v8221_v13, %v8653_v14  ;;  %v2139_v14 = vld [vmem:[%s10160_s3 + $0x190] sm:$0xff] }
 0x276   : > { %2345 = vperm.xlu0 %7242, %v2127_v32   ;;  %v2091_v32 = vld [vmem:[%s10160_s3 + $0x10] sm:$0xff] }
 0x277   : > { %7237 = vset.pattern.permute.xlu1 %v10203_v53  ;;  %v1049_v19 = vpop.permute.xlu1 %1048 }
 0x278   : > { %700 = vperm.xlu1 %7237, %v386_v42   ;;  %v1225_v0 = vmul.f32 %v8215_v63, %v1049_v19  ;;  %v1226_v54 = vmul.f32 %v8217_v5, %v1049_v19 }
 0x27a   : > { %2355 = vperm.xlu0 %7242, %v2129_v22   ;;  %v1353_v34 = vadd.f32 %v1225_v0, %v823_v4  ;;  %v7315_v4 = vld [vmem:[%s10159_s2 + $0x304] ss:$16 sps:$4 sm:$0xff]  }
 0x27b   : > { %v1053_v35 = vpop.permute.xlu1 %1052  ;;  %3326 = vmatmul.mubr.bf16.gmra.mrb[72].mxu0 %v7299_v29  ;;  %v7308_v29 = vld [vmem:[%s10159_s2 + $0x2a0] ss:$16 sps:$4 sm:$0xff]  }
 0x27c   : > { %7239 = vset.pattern.permute.xlu1 %v10201_v56  ;;  %3335 = vmatprep.mubr.bf16.mxu0 %v7300_v30  ;;  %v7303_v56 = vld [vmem:[%s10159_s2 + $0x284] ss:$16 sps:$4 sm:$0xff]   ;;  %v1227_v27 = vmul.f32 %v8215_v63, %v1053_v35  ;;  %v1228_v43 = vmul.f32 %v8217_v5, %v1053_v35 }
 0x27d   : > { %1104 = vperm.xlu1 %7239, %v386_v42  }
 0x27e   : > { %2365 = vperm.xlu0 %7242, %v2131_v39   ;;  %v1355_v62 = vadd.f32 %v1227_v27, %v825_v1  ;;  %v1356_v30 = vadd.f32 %v1228_v43, %v826_v36  ;;  %v2094_v39 = vld [vmem:[%s10160_s3 + $0x28] sm:$0xff] }
 0x280   : > { %v1575_v18 = vpop.permute.xlu1 %1574 }
 0x281   : > { %v1735_v8 = vadd.f32 %v1575_v18, %v1351_v28  ;;  %v1736_v2 = vadd.f32 %v1575_v18, %v1352_v10  ;;  %1108 = vperm.xlu1 %7239, %v7652_v37   ;;  %v7311_v18 = vld [vmem:[%s10159_s2 + $0x2c0] ss:$16 sps:$4 sm:$0xff]  }
 0x282   : > { %2375 = vperm.xlu0 %7242, %v2133_v51   ;;  %v2147_v51 = vld [vmem:[%s10160_s3 + $0x1d0] sm:$0xff] }
 0x283   : > { %v1863_v17 = vmax.f32 %v1735_v8, 0.0  ;;  %v1864_v47 = vmax.f32 %v1736_v2, 0.0  ;;  %3336 = vmatmul.mubr.bf16.gmra.mrb[76].mxu0 %v7302_v38  ;;  %v2145_v8 = vld [vmem:[%s10160_s3 + $0x1c0] sm:$0xff]  ;;  %v2096_v2 = vld [vmem:[%s10160_s3 + $0x38] sm:$0xff] }
 0x284   : > { %3345 = vmatprep.mubr.bf16.mxu0 %v7303_v56  ;;  %v7312_v56 = vld [vmem:[%s10159_s2 + $0x2e4] ss:$16 sps:$4 sm:$0xff]  }
 0x285   : > { %v2071_v50 = vpack.c.bf16 %v1863_v17, %v1861_v59  ;;  %7240 = vset.pattern.permute.xlu1 %v10202_v46  ;;  %v9083_v52 = vpop.permute.xlu1 %640  ;;  %v2072_v15 = vpack.c.bf16 %v1864_v47, %v1862_v45  ;;  %v7306_v46 = vld [vmem:[%s10159_s2 + $0x2a4] ss:$16 sps:$4 sm:$0xff]  }
 0x286   : > { %1630 = vperm.xlu1 %7240, %v9019_v60   ;;  %2385 = vperm.xlu0 %7242, %v2135_v9   ;;  %v827_v17 = vmul.f32 %v8221_v13, %v9083_v52  ;;  %v828_v47 = vmul.f32 %v8223_v3, %v9083_v52  ;;  %v7314_v9 = vld [vmem:[%s10159_s2 + $0x2e0] ss:$16 sps:$4 sm:$0xff]  }
 0x287   : > { %3480 = vmatprep.subr.bf16.mxu0 %v2072_v15  ;;  %v830_v15 = vmul.f32 %v8223_v3, %v8659_v20 }
 0x288   : > { %3481 = vmatpush1.bf16.msra.mxu0 %v2071_v50  ;;  %v829_v50 = vmul.f32 %v8221_v13, %v8659_v20  ;;  %v1587_v20 = vpop.permute.xlu0 %1586 }
 0x28a   : > { %1634 = vperm.xlu1 %7240, %v386_v42   ;;  %v1057_v60 = vpop.permute.xlu1 %1056  ;;  %v1354_v42 = vadd.f32 %v1226_v54, %v824_v41  ;;  %2395 = vperm.xlu0 %7242, %v2137_v61   ;;  %v2149_v61 = vld [vmem:[%s10160_s3 + $0x1e0] sm:$0xff]  ;;  %v2100_v41 = vld [vmem:[%s10160_s3 + $0x58] sm:$0xff] }
 0x28b   : > { %3346 = vmatmul.mubr.bf16.gmra.mrb[80].mxu0 %v7305_v21  ;;  %v1229_v37 = vmul.f32 %v8215_v63, %v1057_v60  ;;  %v1230_v59 = vmul.f32 %v8217_v5, %v1057_v60  ;;  %v2098_v21 = vld [vmem:[%s10160_s3 + $0x48] sm:$0xff] }
 0x28c   : > { %3355 = vmatprep.mubr.bf16.mxu0 %v7306_v46  ;;  %v1738_v16 = vadd.f32 %v1579_v12, %v1354_v42 }
 0x28d   : > { %v1357_v52 = vadd.f32 %v1229_v37, %v827_v17  ;;  %v1358_v46 = vadd.f32 %v1230_v59, %v828_v47  ;;  %v2108_v59 = vld [vmem:[%s10160_s3 + $0x98] sm:$0xff]  ;;  %v834_v17 = vmul.f32 %v8223_v3, %v8671_v55  ;;  %v4173_v47 = vld [vmem:[%s10162_s5 + $0x110] sm:$0xff] }
 0x28e   : > { %v1061_v19 = vpop.permute.xlu1 %1060  ;;  %7241 = vset.pattern.permute.xlu1 %v10203_v53  ;;  %v1737_v53 = vadd.f32 %v1579_v12, %v1353_v34  ;;  %2405 = vperm.xlu0 %7242, %v2139_v14   ;;  %v1866_v48 = vmax.f32 %v1738_v16, 0.0  ;;  %v2102_v12 = vld [vmem:[%s10160_s3 + $0x68] sm:$0xff] }
 0x28f   : > { %2155 = vperm.xlu1 %7241, %v2089_v33   ;;  %v1231_v0 = vmul.f32 %v8215_v63, %v1061_v19  ;;  %v1232_v54 = vmul.f32 %v8217_v5, %v1061_v19  ;;  %v1741_v33 = vadd.f32 %v1587_v20, %v1357_v52  ;;  %v1742_v34 = vadd.f32 %v1587_v20, %v1358_v46  ;;  %v2151_v19 = vld [vmem:[%s10160_s3 + $0x1f0] sm:$0xff] }
 0x290   : > { %v1865_v35 = vmax.f32 %v1737_v53, 0.0  ;;  %v7323_v52 = vld [vmem:[%s10159_s2 + $0x340] ss:$16 sps:$4 sm:$0xff]  }
 0x291   : > { %v1359_v1 = vadd.f32 %v1231_v0, %v829_v50  ;;  %v1360_v36 = vadd.f32 %v1232_v54, %v830_v15  ;;  %v1869_v14 = vmax.f32 %v1741_v33, 0.0  ;;  %v1870_v53 = vmax.f32 %v1742_v34, 0.0  ;;  %v2112_v33 = vld [vmem:[%s10160_s3 + $0xb8] sm:$0xff] }
 0x292   : > { %2415 = vperm.xlu0 %7242, %v2141_v49   ;;  %v4139_v49 = vld [vmem:[%s10162_s5] sm:$0xff] }
 0x293   : > { %v1583_v44 = vpop.permute.xlu1 %1582  ;;  %2165 = vperm.xlu1 %7241, %v2091_v32   ;;  %3356 = vmatmul.mubr.bf16.gmra.mrb[84].mxu0 %v7308_v29  ;;  %v7317_v29 = vld [vmem:[%s10159_s2 + $0x300] ss:$16 sps:$4 sm:$0xff]  }
 0x294   : > { %v1739_v7 = vadd.f32 %v1583_v44, %v1355_v62  ;;  %v1740_v23 = vadd.f32 %v1583_v44, %v1356_v30  ;;  %3365 = vmatprep.mubr.bf16.mxu0 %v7309_v24  ;;  %v7318_v62 = vld [vmem:[%s10159_s2 + $0x324] ss:$16 sps:$4 sm:$0xff]  }
 0x296   : > { %v1867_v22 = vmax.f32 %v1739_v7, 0.0  ;;  %v1868_v40 = vmax.f32 %v1740_v23, 0.0  ;;  %2425 = vperm.xlu0 %7242, %v2143_v6   ;;  %v2104_v7 = vld [vmem:[%s10160_s3 + $0x78] sm:$0xff]  ;;  %v4171_v23 = vld [vmem:[%s10162_s5 + $0x100] sm:$0xff] }
 0x297   : > { %2170 = vperm.xlu1 %7241, %v2092_v26   ;;  %v7321_v6 = vld [vmem:[%s10159_s2 + $0x344] ss:$16 sps:$4 sm:$0xff]  }
 0x298   : > { %v2073_v28 = vpack.c.bf16 %v1867_v22, %v1865_v35  ;;  %v9135_v10 = vpop.permute.xlu1 %650  ;;  %v2074_v38 = vpack.c.bf16 %v1868_v40, %v1866_v48  ;;  %v2106_v40 = vld [vmem:[%s10160_s3 + $0x88] sm:$0xff]  ;;  %v7320_v48 = vld [vmem:[%s10159_s2 + $0x320] ss:$16 sps:$4 sm:$0xff]  }
 0x29a   : > { %3482 = vmatprep.subr.bf16.mxu0 %v2074_v38  ;;  %2435 = vperm.xlu0 %7242, %v2145_v8   ;;  %v832_v38 = vmul.f32 %v8223_v3, %v9135_v10 }
 0x29b   : > { %3483 = vmatpush1.bf16.msra.mxu0 %v2073_v28  ;;  %2180 = vperm.xlu1 %7241, %v2094_v39   ;;  %v831_v28 = vmul.f32 %v8221_v13, %v9135_v10  ;;  %v4141_v39 = vld [vmem:[%s10162_s5 + $0x10] sm:$0xff]  ;;  %v833_v10 = vmul.f32 %v8221_v13, %v8671_v55 }
 0x29c   : > { %3366 = vmatmul.mubr.bf16.gmra.mrb[88].mxu0 %v7311_v18  ;;  %v7324_v55 = vld [vmem:[%s10159_s2 + $0x364] ss:$16 sps:$4 sm:$0xff]  }
 0x29d   : > { %v1065_v45 = vpop.permute.xlu1 %1064  ;;  %3375 = vmatprep.mubr.bf16.mxu0 %v7312_v56 }
 0x29e   : > { %2445 = vperm.xlu0 %7242, %v2147_v51   ;;  %v1233_v26 = vmul.f32 %v8215_v63, %v1065_v45  ;;  %v1234_v35 = vmul.f32 %v8217_v5, %v1065_v45  ;;  %v1595_v45 = vpop.permute.xlu0 %1594 }
 0x29f   : > { %2190 = vperm.xlu1 %7241, %v2096_v2  }
 0x2a0   : > { %v1361_v18 = vadd.f32 %v1233_v26, %v831_v28  ;;  %v1362_v56 = vadd.f32 %v1234_v35, %v832_v38  ;;  %v4177_v35 = vld [vmem:[%s10162_s5 + $0x130] sm:$0xff] }
 0x2a1   : > { %v1069_v60 = vpop.permute.xlu1 %1068  ;;  %v7330_v28 = vld [vmem:[%s10159_s2 + $0x3a4] ss:$16 sps:$4 sm:$0xff]  }
 0x2a2   : > { %2455 = vperm.xlu0 %7242, %v2149_v61   ;;  %v1235_v8 = vmul.f32 %v8215_v63, %v1069_v60  ;;  %v1236_v2 = vmul.f32 %v8217_v5, %v1069_v60  ;;  %v1745_v51 = vadd.f32 %v1595_v45, %v1361_v18  ;;  %v4143_v60 = vld [vmem:[%s10162_s5 + $0x20] sm:$0xff] }
 0x2a3   : > { %2200 = vperm.xlu1 %7241, %v2098_v21   ;;  %v1746_v21 = vadd.f32 %v1595_v45, %v1362_v56 }
 0x2a4   : > { %3376 = vmatmul.mubr.bf16.gmra.mrb[92].mxu0 %v7314_v9  ;;  %v1363_v50 = vadd.f32 %v1235_v8, %v833_v10  ;;  %v1364_v15 = vadd.f32 %v1236_v2, %v834_v17  ;;  %v2110_v9 = vld [vmem:[%s10160_s3 + $0xa8] sm:$0xff]  ;;  %v4147_v8 = vld [vmem:[%s10162_s5 + $0x40] sm:$0xff] }
 0x2a5   : > { %3385 = vmatprep.mubr.bf16.mxu0 %v7315_v4  ;;  %v1873_v4 = vmax.f32 %v1745_v51, 0.0 }
 0x2a6   : > { %v1591_v42 = vpop.permute.xlu1 %1590  ;;  %2465 = vperm.xlu0 %7242, %v2151_v19   ;;  %v7327_v19 = vld [vmem:[%s10159_s2 + $0x384] ss:$16 sps:$4 sm:$0xff]  }
 0x2a7   : > { %v1743_v27 = vadd.f32 %v1591_v42, %v1359_v1  ;;  %v1744_v43 = vadd.f32 %v1591_v42, %v1360_v36  ;;  %2210 = vperm.xlu1 %7241, %v2100_v41   ;;  %v1874_v41 = vmax.f32 %v1746_v21, 0.0  ;;  %v4175_v42 = vld [vmem:[%s10162_s5 + $0x120] sm:$0xff] }
 0x2a9   : > { %v1871_v32 = vmax.f32 %v1743_v27, 0.0  ;;  %v1872_v24 = vmax.f32 %v1744_v43, 0.0  ;;  %v2114_v27 = vld [vmem:[%s10160_s3 + $0xc8] sm:$0xff]  ;;  %v7326_v43 = vld [vmem:[%s10159_s2 + $0x360] ss:$16 sps:$4 sm:$0xff]  }
 0x2aa   : > { %4205 = vperm.xlu0 %7242, %v4139_v49  }
 0x2ab   : > { %v2075_v30 = vpack.c.bf16 %v1871_v32, %v1869_v14  ;;  %v9194_v16 = vpop.permute.xlu1 %660  ;;  %v2076_v44 = vpack.c.bf16 %v1872_v24, %v1870_v53  ;;  %2220 = vperm.xlu1 %7241, %v2102_v12   ;;  %v4145_v32 = vld [vmem:[%s10162_s5 + $0x30] sm:$0xff]  ;;  %v1603_v24 = vpop.permute.xlu0 %1602  ;;  %v2116_v53 = vld [vmem:[%s10160_s3 + $0xd8] sm:$0xff] }
 0x2ac   : > { %3386 = vmatmul.mubr.bf16.gmra.mrb[96].mxu0 %v7317_v29 }
 0x2ad   : > { %3484 = vmatprep.subr.bf16.mxu0 %v2076_v44  ;;  %3395 = vmatprep.mubr.bf16.mxu0 %v7318_v62  ;;  %v835_v62 = vmul.f32 %v8221_v13, %v9194_v16 }
 0x2ae   : > { %3485 = vmatpush1.bf16.msra.mxu0 %v2075_v30  ;;  %4365 = vperm.xlu0 %7242, %v4171_v23   ;;  %v836_v30 = vmul.f32 %v8223_v3, %v9194_v16  ;;  %v2118_v16 = vld [vmem:[%s10160_s3 + $0xe8] sm:$0xff] }
 0x2af   : > { %2230 = vperm.xlu1 %7241, %v2104_v7  }
 0x2b0   : > { %v1073_v22 = vpop.permute.xlu1 %1072 }
 0x2b1   : > { %v1237_v12 = vmul.f32 %v8215_v63, %v1073_v22  ;;  %v1238_v29 = vmul.f32 %v8217_v5, %v1073_v22  ;;  %v9281_v22 = vpop.permute.xlu0 %1610 }
 0x2b2   : > { %4215 = vperm.xlu0 %7242, %v4141_v39  }
 0x2b3   : > { %2240 = vperm.xlu1 %7241, %v2106_v40   ;;  %v1365_v44 = vadd.f32 %v1237_v12, %v835_v62  ;;  %v1366_v49 = vadd.f32 %v1238_v29, %v836_v30  ;;  %v7329_v40 = vld [vmem:[%s10159_s2 + $0x380] ss:$16 sps:$4 sm:$0xff]   ;;  %v2128_v62 = vld [vmem:[%s10160_s3 + $0x138] sm:$0xff] }
 0x2b4   : > { %v1077_v37 = vpop.permute.xlu1 %1076  ;;  %3396 = vmatmul.mubr.bf16.gmra.mrb[100].mxu0 %v7320_v48  ;;  %v837_v48 = vmul.f32 %v8221_v13, %v8686_v31 }
 0x2b5   : > { %3405 = vmatprep.mubr.bf16.mxu0 %v7321_v6  ;;  %v1239_v7 = vmul.f32 %v8215_v63, %v1077_v37  ;;  %v1240_v23 = vmul.f32 %v8217_v5, %v1077_v37  ;;  %v838_v6 = vmul.f32 %v8223_v3, %v8686_v31  ;;  %v1749_v38 = vadd.f32 %v1603_v24, %v1365_v44  ;;  %v2120_v37 = vld [vmem:[%s10160_s3 + $0xf8] sm:$0xff]  ;;  %v9302_v45 = vpop.permute.xlu0 %1618 }
 0x2b6   : > { %4375 = vperm.xlu0 %7242, %v4173_v47   ;;  %v1750_v56 = vadd.f32 %v1603_v24, %v1366_v49  ;;  %v841_v24 = vmul.f32 %v8221_v13, %v8691_v11 }
 0x2b7   : > { %2250 = vperm.xlu1 %7241, %v2108_v59   ;;  %v1367_v39 = vadd.f32 %v1239_v7, %v837_v48  ;;  %v1368_v18 = vadd.f32 %v1240_v23, %v838_v6  ;;  %v1877_v10 = vmax.f32 %v1749_v38, 0.0 }
 0x2b8   : > { %v1878_v51 = vmax.f32 %v1750_v56, 0.0 }
 0x2b9   : > { %v1599_v46 = vpop.permute.xlu1 %1598 }
 0x2ba   : > { %v1747_v0 = vadd.f32 %v1599_v46, %v1363_v50  ;;  %v1748_v54 = vadd.f32 %v1599_v46, %v1364_v15  ;;  %4225 = vperm.xlu0 %7242, %v4143_v60   ;;  %v4179_v50 = vld [vmem:[%s10162_s5 + $0x140] sm:$0xff]  ;;  %v2122_v15 = vld [vmem:[%s10160_s3 + $0x108] sm:$0xff]  ;;  %v2124_v60 = vld [vmem:[%s10160_s3 + $0x118] sm:$0xff] }
 0x2bb   : > { %2260 = vperm.xlu1 %7241, %v2110_v9   ;;  %v7332_v46 = vld [vmem:[%s10159_s2 + $0x3a0] ss:$16 sps:$4 sm:$0xff]  }
 0x2bc   : > { %v1875_v20 = vmax.f32 %v1747_v0, 0.0  ;;  %v1876_v61 = vmax.f32 %v1748_v54, 0.0  ;;  %3406 = vmatmul.mubr.bf16.gmra.mrb[104].mxu0 %v7323_v52  ;;  %v4149_v0 = vld [vmem:[%s10162_s5 + $0x50] sm:$0xff]  ;;  %v9321_v54 = vpop.permute.xlu0 %1626 }
 0x2bd   : > { %3415 = vmatprep.mubr.bf16.mxu0 %v7324_v55  ;;  %v7333_v55 = vld [vmem:[%s10159_s2 + $0x3c4] ss:$16 sps:$4 sm:$0xff]  }
 0x2be   : > { %v2077_v1 = vpack.c.bf16 %v1875_v20, %v1873_v4  ;;  %v9250_v36 = vpop.permute.xlu1 %670  ;;  %v2078_v34 = vpack.c.bf16 %v1876_v61, %v1874_v41  ;;  %4385 = vperm.xlu0 %7242, %v4175_v42  }
 0x2bf   : > { %2270 = vperm.xlu1 %7241, %v2112_v33   ;;  %v839_v41 = vmul.f32 %v8221_v13, %v9250_v36  ;;  %v4181_v33 = vld [vmem:[%s10162_s5 + $0x150] sm:$0xff] }
 0x2c0   : > { %3486 = vmatprep.subr.bf16.mxu0 %v2078_v34  ;;  %v2126_v34 = vld [vmem:[%s10160_s3 + $0x128] sm:$0xff] }
 0x2c1   : > { %3487 = vmatpush1.bf16.msra.mxu0 %v2077_v1  ;;  %v840_v1 = vmul.f32 %v8223_v3, %v9250_v36  ;;  %v7336_v36 = vld [vmem:[%s10159_s2 + $0x3e4] ss:$16 sps:$4 sm:$0xff]  }
 0x2c2   : > { %4235 = vperm.xlu0 %7242, %v4145_v32   ;;  %v4151_v32 = vld [vmem:[%s10162_s5 + $0x60] sm:$0xff] }
 0x2c3   : > { %v1081_v14 = vpop.permute.xlu1 %1080  ;;  %2280 = vperm.xlu1 %7241, %v2114_v27   ;;  %v7335_v27 = vld [vmem:[%s10159_s2 + $0x3c0] ss:$16 sps:$4 sm:$0xff]  }
 0x2c4   : > { %3416 = vmatmul.mubr.bf16.gmra.mrb[108].mxu0 %v7326_v43  ;;  %v1241_v4 = vmul.f32 %v8215_v63, %v1081_v14  ;;  %v1242_v20 = vmul.f32 %v8217_v5, %v1081_v14  ;;  %v9341_v43 = vpop.permute.xlu0 %1638 }
 0x2c5   : > { %3425 = vmatprep.mubr.bf16.mxu0 %v7327_v19 }
 0x2c6   : > { %4395 = vperm.xlu0 %7242, %v4177_v35   ;;  %v1369_v42 = vadd.f32 %v1241_v4, %v839_v41  ;;  %v1370_v19 = vadd.f32 %v1242_v20, %v840_v1  ;;  %v4155_v20 = vld [vmem:[%s10162_s5 + $0x80] sm:$0xff]  ;;  %v2138_v41 = vld [vmem:[%s10160_s3 + $0x188] sm:$0xff] }
 0x2c7   : > { %v1085_v26 = vpop.permute.xlu1 %1084  ;;  %2290 = vperm.xlu1 %7241, %v2116_v53   ;;  %v842_v53 = vmul.f32 %v8223_v3, %v8691_v11  ;;  %v4183_v11 = vld [vmem:[%s10162_s5 + $0x160] sm:$0xff] }
 0x2c8   : > { %v1243_v12 = vmul.f32 %v8215_v63, %v1085_v26  ;;  %v1244_v29 = vmul.f32 %v8217_v5, %v1085_v26  ;;  %v1753_v30 = vadd.f32 %v9281_v22, %v1369_v42  ;;  %v1754_v7 = vadd.f32 %v9281_v22, %v1370_v19  ;;  %v9360_v23 = vpop.permute.xlu0 %2160  ;;  %v7338_v22 = vld [vmem:[%s10159_s2 + $0x3e0] ss:$16 sps:$4 sm:$0xff]  }
 0x2c9   : > { %v4187_v19 = vld [vmem:[%s10162_s5 + $0x180] sm:$0xff] }
 0x2ca   : > { %4245 = vperm.xlu0 %7242, %v4147_v8   ;;  %v1371_v44 = vadd.f32 %v1243_v12, %v841_v24  ;;  %v1372_v49 = vadd.f32 %v1244_v29, %v842_v53  ;;  %v1881_v48 = vmax.f32 %v1753_v30, 0.0  ;;  %v1882_v38 = vmax.f32 %v1754_v7, 0.0  ;;  %v2142_v7 = vld [vmem:[%s10160_s3 + $0x1a8] sm:$0xff] }
 0x2cb   : > { %2300 = vperm.xlu1 %7241, %v2118_v16  }
 0x2cc   : > { %v1607_v2 = vpop.permute.xlu1 %1606  ;;  %3426 = vmatmul.mubr.bf16.gmra.mrb[112].mxu0 %v7329_v40  ;;  %v2130_v40 = vld [vmem:[%s10160_s3 + $0x148] sm:$0xff] }
 0x2cd   : > { %v1751_v31 = vadd.f32 %v1607_v2, %v1367_v39  ;;  %v1752_v59 = vadd.f32 %v1607_v2, %v1368_v18  ;;  %3435 = vmatprep.mubr.bf16.mxu0 %v7330_v28  ;;  %v7341_v39 = vld [vmem:[%s10159_s2 + $0xc] ss:$16 sps:$4 sm:$0xff]  }
 0x2ce   : > { %4405 = vperm.xlu0 %7242, %v4179_v50   ;;  %v2132_v2 = vld [vmem:[%s10160_s3 + $0x158] sm:$0xff] }
 0x2cf   : > { %v1879_v17 = vmax.f32 %v1751_v31, 0.0  ;;  %v1880_v47 = vmax.f32 %v1752_v59, 0.0  ;;  %2310 = vperm.xlu1 %7241, %v2120_v37   ;;  %v9379_v37 = vpop.permute.xlu0 %2175  ;;  %v4153_v31 = vld [vmem:[%s10162_s5 + $0x70] sm:$0xff]  ;;  %v2134_v59 = vld [vmem:[%s10160_s3 + $0x168] sm:$0xff] }
 0x2d1   : > { %v2079_v21 = vpack.c.bf16 %v1879_v17, %v1877_v10  ;;  %v9310_v9 = vpop.permute.xlu1 %680  ;;  %v2080_v52 = vpack.c.bf16 %v1880_v47, %v1878_v51  ;;  %v4185_v51 = vld [vmem:[%s10162_s5 + $0x170] sm:$0xff] }
 0x2d2   : > { %4255 = vperm.xlu0 %7242, %v4149_v0  }
 0x2d3   : > { %3488 = vmatprep.subr.bf16.mxu0 %v2080_v52  ;;  %2320 = vperm.xlu1 %7241, %v2122_v15   ;;  %v9392_v50 = vpop.permute.xlu0 %2185  ;;  %v843_v15 = vmul.f32 %v8221_v13, %v9310_v9  ;;  %v2136_v52 = vld [vmem:[%s10160_s3 + $0x178] sm:$0xff] }
 0x2d4   : > { %3489 = vmatpush1.bf16.msra.mxu0 %v2079_v21  ;;  %v844_v21 = vmul.f32 %v8223_v3, %v9310_v9  ;;  %v845_v9 = vmul.f32 %v8221_v13, %v8696_v58 }
 0x2d5   : > { %3436 = vmatmul.mubr.bf16.gmra.mrb[116].mxu0 %v7332_v46 }
 0x2d6   : > { %v1089_v61 = vpop.permute.xlu1 %1088  ;;  %3445 = vmatprep.mubr.bf16.mxu0 %v7333_v55  ;;  %4415 = vperm.xlu0 %7242, %v4181_v33  }
 0x2d7   : > { %2330 = vperm.xlu1 %7241, %v2124_v60   ;;  %v1245_v10 = vmul.f32 %v8215_v63, %v1089_v61  ;;  %v1246_v17 = vmul.f32 %v8217_v5, %v1089_v61  ;;  %v846_v61 = vmul.f32 %v8223_v3, %v8696_v58  ;;  %v9413_v33 = vpop.permute.xlu0 %2195 }
 0x2d9   : > { %v1373_v46 = vadd.f32 %v1245_v10, %v843_v15  ;;  %v1374_v55 = vadd.f32 %v1246_v17, %v844_v21  ;;  %v4191_v10 = vld [vmem:[%s10162_s5 + $0x1a0] sm:$0xff]  ;;  %v849_v17 = vmul.f32 %v8221_v13, %v8708_v25  ;;  %v854_v15 = vmul.f32 %v8223_v3, %v8717_v57 }
 0x2da   : > { %v1093_v14 = vpop.permute.xlu1 %1092  ;;  %4265 = vperm.xlu0 %7242, %v4151_v32  }
 0x2db   : > { %2340 = vperm.xlu1 %7241, %v2126_v34   ;;  %v1247_v0 = vmul.f32 %v8215_v63, %v1093_v14  ;;  %v1248_v60 = vmul.f32 %v8217_v5, %v1093_v14  ;;  %v1757_v1 = vadd.f32 %v9302_v45, %v1373_v46  ;;  %v2140_v14 = vld [vmem:[%s10160_s3 + $0x198] sm:$0xff] }
 0x2dd   : > { %3446 = vmatmul.mubr.bf16.gmra.mrb[120].mxu0 %v7335_v27  ;;  %v1375_v34 = vadd.f32 %v1247_v0, %v845_v9  ;;  %v1376_v42 = vadd.f32 %v1248_v60, %v846_v61  ;;  %v1758_v27 = vadd.f32 %v9302_v45, %v1374_v55  ;;  %v4157_v45 = vld [vmem:[%s10162_s5 + $0x90] sm:$0xff]  ;;  %v2148_v9 = vld [vmem:[%s10160_s3 + $0x1d8] sm:$0xff] }
 0x2de   : > { %3455 = vmatprep.mubr.bf16.mxu0 %v7336_v36  ;;  %4425 = vperm.xlu0 %7242, %v4183_v11   ;;  %v1885_v36 = vmax.f32 %v1757_v1, 0.0 }
 0x2df   : > { %v1615_v26 = vpop.permute.xlu1 %1614  ;;  %2350 = vperm.xlu1 %7241, %v2128_v62   ;;  %v1886_v53 = vmax.f32 %v1758_v27, 0.0  ;;  %v9426_v62 = vpop.permute.xlu0 %2205 }
 0x2e0   : > { %v1755_v35 = vadd.f32 %v1615_v26, %v1371_v44  ;;  %v1756_v16 = vadd.f32 %v1615_v26, %v1372_v49  ;;  %v4189_v26 = vld [vmem:[%s10162_s5 + $0x190] sm:$0xff] }
 0x2e2   : > { %v1883_v6 = vmax.f32 %v1755_v35, 0.0  ;;  %v1884_v28 = vmax.f32 %v1756_v16, 0.0  ;;  %4275 = vperm.xlu0 %7242, %v4153_v31   ;;  %v2146_v31 = vld [vmem:[%s10160_s3 + $0x1c8] sm:$0xff] }
 0x2e3   : > { %2360 = vperm.xlu1 %7241, %v2130_v40   ;;  %v2144_v40 = vld [vmem:[%s10160_s3 + $0x1b8] sm:$0xff] }
 0x2e4   : > { %v2081_v18 = vpack.c.bf16 %v1883_v6, %v1881_v48  ;;  %v9374_v56 = vpop.permute.xlu1 %690  ;;  %v2082_v8 = vpack.c.bf16 %v1884_v28, %v1882_v38  ;;  %v4159_v28 = vld [vmem:[%s10162_s5 + $0xa0] sm:$0xff] }
 0x2e5   : > { %3456 = vmatmul.mubr.bf16.gmra.mrb[124].mxu0 %v7338_v22  ;;  %v9439_v22 = vpop.permute.xlu0 %2215  ;;  %v847_v48 = vmul.f32 %v8221_v13, %v9374_v56  ;;  %v848_v6 = vmul.f32 %v8223_v3, %v9374_v56 }
 0x2e6   : > { %3490 = vmatprep.subr.bf16.mxu0 %v2082_v8  ;;  %3498 = vmatprep.mubr.bf16.mxu0 %v7341_v39 }
 0x2e7   : > { %3491 = vmatpush1.bf16.msra.mxu0 %v2081_v18  ;;  %2370 = vperm.xlu1 %7241, %v2132_v2  }
 0x2e8   : > { %4435 = vperm.xlu0 %7242, %v4185_v51   ;;  %v853_v51 = vmul.f32 %v8221_v13, %v8717_v57 }
 0x2e9   : > { %v1097_v47 = vpop.permute.xlu1 %1096  ;;  %v9466_v21 = vpop.permute.xlu0 %2225 }
 0x2ea   : > { %v1249_v11 = vmul.f32 %v8215_v63, %v1097_v47  ;;  %v1250_v35 = vmul.f32 %v8217_v5, %v1097_v47  ;;  %v850_v47 = vmul.f32 %v8223_v3, %v8708_v25 }
 0x2eb   : > { %2380 = vperm.xlu1 %7241, %v2134_v59  }
 0x2ec   : > { %4285 = vperm.xlu0 %7242, %v4155_v20   ;;  %v1377_v38 = vadd.f32 %v1249_v11, %v847_v48  ;;  %v1378_v39 = vadd.f32 %v1250_v35, %v848_v6  ;;  %v4140_v48 = vld [vmem:[%s10162_s5 + $0x8] sm:$0xff] }
 0x2ed   : > { %v1101_v4 = vpop.permute.xlu1 %1100  ;;  %v7342_v6 = vld [vmem:[%s10159_s2 + $0x2c] ss:$16 sps:$4 sm:$0xff]  }
 0x2ee   : > { %v1251_v18 = vmul.f32 %v8215_v63, %v1101_v4  ;;  %v1252_v8 = vmul.f32 %v8217_v5, %v1101_v4  ;;  %v1762_v0 = vadd.f32 %v9321_v54, %v1378_v39 }
 0x2ef   : > { %2390 = vperm.xlu1 %7241, %v2136_v52   ;;  %v1761_v52 = vadd.f32 %v9321_v54, %v1377_v38  ;;  %v4172_v38 = vld [vmem:[%s10162_s5 + $0x108] sm:$0xff] }
 0x2f0   : > { %4445 = vperm.xlu0 %7242, %v4187_v19   ;;  %v1379_v25 = vadd.f32 %v1251_v18, %v849_v17  ;;  %v1380_v20 = vadd.f32 %v1252_v8, %v850_v47  ;;  %v1890_v27 = vmax.f32 %v1762_v0, 0.0  ;;  %v4165_v18 = vld [vmem:[%s10162_s5 + $0xd0] sm:$0xff]  ;;  %v7344_v8 = vld [vmem:[%s10159_s2 + $0x28] ss:$16 sps:$4 sm:$0xff]   ;;  %v4167_v17 = vld [vmem:[%s10162_s5 + $0xe0] sm:$0xff] }
 0x2f1   : > { %v1889_v1 = vmax.f32 %v1761_v52, 0.0  ;;  %v7347_v47 = vld [vmem:[%s10159_s2 + $0x48] ss:$16 sps:$4 sm:$0xff]   ;;  %v7348_v52 = vld [vmem:[%s10159_s2 + $0x6c] ss:$16 sps:$4 sm:$0xff]   ;;  %v4169_v0 = vld [vmem:[%s10162_s5 + $0xf0] sm:$0xff] }
 0x2f2   : > { %v1623_v12 = vpop.permute.xlu1 %1622 }
 0x2f3   : > { %v1759_v58 = vadd.f32 %v1623_v12, %v1375_v34  ;;  %v1760_v29 = vadd.f32 %v1623_v12, %v1376_v42  ;;  %2400 = vperm.xlu1 %7241, %v2138_v41  }
 0x2f4   : > { %4295 = vperm.xlu0 %7242, %v4157_v45  }
 0x2f5   : > { %v1887_v32 = vmax.f32 %v1759_v58, 0.0  ;;  %v1888_v24 = vmax.f32 %v1760_v29, 0.0  ;;  %v9485_v29 = vpop.permute.xlu0 %2235 }
 0x2f7   : > { %v2083_v30 = vpack.c.bf16 %v1887_v32, %v1885_v36  ;;  %v701_v44 = vpop.permute.xlu1 %700  ;;  %v2084_v49 = vpack.c.bf16 %v1888_v24, %v1886_v53  ;;  %2410 = vperm.xlu1 %7241, %v2140_v14   ;;  %v4193_v36 = vld [vmem:[%s10162_s5 + $0x1b0] sm:$0xff] }
 0x2f8   : > { %4455 = vperm.xlu0 %7242, %v4189_v26   ;;  %v851_v57 = vmul.f32 %v8221_v13, %v701_v44  ;;  %v852_v61 = vmul.f32 %v8223_v3, %v701_v44  ;;  %v2150_v3 = vld [vmem:[%s10160_s3 + $0x1e8] sm:$0xff]  ;;  %v4163_v26 = vld [vmem:[%s10162_s5 + $0xc0] sm:$0xff] }
 0x2f9   : > { %3492 = vmatprep.subr.bf16.mxu0 %v2084_v49 }
 0x2fa   : > { %3493 = vmatpush1.bf16.msra.mxu0 %v2083_v30 }
 0x2fb   : > { %2420 = vperm.xlu1 %7241, %v2142_v7   ;;  %v2152_v7 = vld [vmem:[%s10160_s3 + $0x1f8] sm:$0xff] }
 0x2fc   : > { %v1105_v16 = vpop.permute.xlu1 %1104  ;;  %4305 = vperm.xlu0 %7242, %v4159_v28   ;;  %v4195_v28 = vld [vmem:[%s10162_s5 + $0x1c0] sm:$0xff] }
 0x2fd   : > { %v1253_v46 = vmul.f32 %v8215_v63, %v1105_v16  ;;  %v1254_v55 = vmul.f32 %v8217_v5, %v1105_v16  ;;  %v9496_v16 = vpop.permute.xlu0 %2245 }
 0x2ff   : > { %2430 = vperm.xlu1 %7241, %v2144_v40   ;;  %v1381_v34 = vadd.f32 %v1253_v46, %v851_v57  ;;  %v1382_v42 = vadd.f32 %v1254_v55, %v852_v61  ;;  %v7339_v40 = vld [vmem:[%s10159_s2 + $0x8] ss:$16 sps:$4 sm:$0xff]   ;;  %v4199_v46 = vld [vmem:[%s10162_s5 + $0x1e0] sm:$0xff] }
 0x300   : > { %v1109_v2 = vpop.permute.xlu1 %1108  ;;  %4465 = vperm.xlu0 %7242, %v4191_v10   ;;  %v4174_v10 = vld [vmem:[%s10162_s5 + $0x118] sm:$0xff]  ;;  %v4176_v55 = vld [vmem:[%s10162_s5 + $0x128] sm:$0xff] }
 0x301   : > { %v1255_v59 = vmul.f32 %v8215_v63, %v1109_v2  ;;  %v1256_v56 = vmul.f32 %v8217_v5, %v1109_v2  ;;  %v4161_v63 = vld [vmem:[%s10162_s5 + $0xb0] sm:$0xff]  ;;  %v9513_v39 = vpop.permute.xlu0 %2255  ;;  %v4142_v2 = vld [vmem:[%s10162_s5 + $0x18] sm:$0xff] }
 0x302   : > { %v4178_v57 = vld [vmem:[%s10162_s5 + $0x138] sm:$0xff] }
 0x303   : > { %2440 = vperm.xlu1 %7241, %v2146_v31   ;;  %v1383_v60 = vadd.f32 %v1255_v59, %v853_v51  ;;  %v1384_v4 = vadd.f32 %v1256_v56, %v854_v15  ;;  %v7345_v31 = vld [vmem:[%s10159_s2 + $0x4c] ss:$16 sps:$4 sm:$0xff]   ;;  %v4197_v59 = vld [vmem:[%s10162_s5 + $0x1d0] sm:$0xff] }
 0x304   : > { %4315 = vperm.xlu0 %7242, %v4161_v63   ;;  %v4144_v51 = vld [vmem:[%s10162_s5 + $0x28] sm:$0xff] }
 0x305   : > { %v1631_v41 = vpop.permute.xlu1 %1630  ;;  %v1767_v19 = vadd.f32 %v9341_v43, %v1383_v60  ;;  %v1768_v13 = vadd.f32 %v9341_v43, %v1384_v4  ;;  %v9530_v56 = vpop.permute.xlu0 %2265  ;;  %v7350_v4 = vld [vmem:[%s10159_s2 + $0x68] ss:$16 sps:$4 sm:$0xff]  }
 0x306   : > { %v1763_v5 = vadd.f32 %v1631_v41, %v1379_v25  ;;  %v1764_v54 = vadd.f32 %v1631_v41, %v1380_v20  ;;  %v4146_v25 = vld [vmem:[%s10162_s5 + $0x38] sm:$0xff]  ;;  %v4148_v63 = vld [vmem:[%s10162_s5 + $0x48] sm:$0xff] }
 0x307   : > { %2450 = vperm.xlu1 %7241, %v2148_v9   ;;  %v1895_v43 = vmax.f32 %v1767_v19, 0.0  ;;  %v1896_v49 = vmax.f32 %v1768_v13, 0.0  ;;  %v7351_v20 = vld [vmem:[%s10159_s2 + $0x8c] ss:$16 sps:$4 sm:$0xff]   ;;  %v4201_v9 = vld [vmem:[%s10162_s5 + $0x1f0] sm:$0xff] }
 0x308   : > { %v1891_v12 = vmax.f32 %v1763_v5, 0.0  ;;  %v1892_v58 = vmax.f32 %v1764_v54, 0.0  ;;  %4475 = vperm.xlu0 %7242, %v4193_v36   ;;  %v7353_v41 = vld [vmem:[%s10159_s2 + $0x88] ss:$16 sps:$4 sm:$0xff]   ;;  %v7354_v5 = vld [vmem:[%s10159_s2 + $0xac] ss:$16 sps:$4 sm:$0xff]  }
 0x309   : > { %v1635_v14 = vpop.permute.xlu1 %1634  ;;  %v9544_v15 = vpop.permute.xlu0 %2275  ;;  %v4180_v54 = vld [vmem:[%s10162_s5 + $0x148] sm:$0xff] }
 0x30a   : > { %v2085_v32 = vpack.c.bf16 %v1891_v12, %v1889_v1  ;;  %v1765_v24 = vadd.f32 %v1635_v14, %v1381_v34  ;;  %v1766_v53 = vadd.f32 %v1635_v14, %v1382_v42  ;;  %v2086_v45 = vpack.c.bf16 %v1892_v58, %v1890_v27  ;;  %v7356_v34 = vld [vmem:[%s10159_s2 + $0xa8] ss:$16 sps:$4 sm:$0xff]   ;;  %v7357_v27 = vld [vmem:[%s10159_s2 + $0xcc] ss:$16 sps:$4 sm:$0xff]  }
 0x30b   : > { %2460 = vperm.xlu1 %7241, %v2150_v3   ;;  %v4150_v42 = vld [vmem:[%s10162_s5 + $0x58] sm:$0xff]  ;;  %v4152_v13 = vld [vmem:[%s10162_s5 + $0x68] sm:$0xff] }
 0x30c   : > { %v1893_v30 = vmax.f32 %v1765_v24, 0.0  ;;  %v1894_v44 = vmax.f32 %v1766_v53, 0.0  ;;  %3494 = vmatprep.subr.bf16.mxu0 %v2086_v45  ;;  %4325 = vperm.xlu0 %7242, %v4163_v26   ;;  %v4182_v12 = vld [vmem:[%s10162_s5 + $0x158] sm:$0xff]  ;;  %v4184_v36 = vld [vmem:[%s10162_s5 + $0x168] sm:$0xff] }
 0x30d   : > { %3495 = vmatpush1.bf16.msra.mxu0 %v2085_v32  ;;  %v9558_v60 = vpop.permute.xlu0 %2285  ;;  %v7359_v58 = vld [vmem:[%s10159_s2 + $0xc8] ss:$16 sps:$4 sm:$0xff]   ;;  %v7360_v14 = vld [vmem:[%s10159_s2 + $0xec] ss:$16 sps:$4 sm:$0xff]  }
 0x30e   : > { %v2087_v11 = vpack.c.bf16 %v1895_v43, %v1893_v30  ;;  %v2088_v35 = vpack.c.bf16 %v1896_v49, %v1894_v44  ;;  %v9589_v1 = vpop.permute.xlu1 %2155  ;;  %v7362_v24 = vld [vmem:[%s10159_s2 + $0xe8] ss:$16 sps:$4 sm:$0xff]   ;;  %v7363_v45 = vld [vmem:[%s10159_s2 + $0x10c] ss:$16 sps:$4 sm:$0xff]  }
 0x30f   : > { %2470 = vperm.xlu1 %7241, %v2152_v7   ;;  %v4154_v53 = vld [vmem:[%s10162_s5 + $0x78] sm:$0xff]  ;;  %v4156_v49 = vld [vmem:[%s10162_s5 + $0x88] sm:$0xff] }
 0x310   : > { %3496 = vmatprep.subr.bf16.mxu0 %v2088_v35  ;;  %4485 = vperm.xlu0 %7242, %v4195_v28   ;;  %v4186_v30 = vld [vmem:[%s10162_s5 + $0x178] sm:$0xff] }
 0x311   : > { %3497 = vmatpush1.bf16.msra.mxu0 %v2087_v11  ;;  %v9575_v61 = vpop.permute.xlu0 %2295  ;;  %v7365_v43 = vld [vmem:[%s10159_s2 + $0x108] ss:$16 sps:$4 sm:$0xff]   ;;  %v7366_v7 = vld [vmem:[%s10159_s2 + $0x12c] ss:$16 sps:$4 sm:$0xff]  }
 0x312   : > { %v9600_v19 = vpop.permute.xlu1 %2165  ;;  %v4188_v11 = vld [vmem:[%s10162_s5 + $0x188] sm:$0xff]  ;;  %v4190_v28 = vld [vmem:[%s10162_s5 + $0x198] sm:$0xff] }
 0x313   : > { %4210 = vperm.xlu1 %7241, %v4140_v48   ;;  %v7368_v35 = vld [vmem:[%s10159_s2 + $0x128] ss:$16 sps:$4 sm:$0xff]  }
 0x314   : > { %3499 = vmatmul.mubr.bf16.vlgmr.msra.gmra.mrb[0].mxu0 %v7339_v40  ;;  %4335 = vperm.xlu0 %7242, %v4165_v18   ;;  %v4158_v40 = vld [vmem:[%s10162_s5 + $0x98] sm:$0xff] }
 0x315   : > { %3508 = vmatprep.mubr.bf16.mxu0 %v7342_v6  ;;  %v7369_v6 = vld [vmem:[%s10159_s2 + $0x14c] ss:$16 sps:$4 sm:$0xff]   ;;  %v7371_v18 = vld [vmem:[%s10159_s2 + $0x148] ss:$16 sps:$4 sm:$0xff]  }
 0x316   : > { %v9611_v3 = vpop.permute.xlu1 %2170 }
 0x317   : > { %4370 = vperm.xlu1 %7241, %v4172_v38  }
 0x318   : > { %4495 = vperm.xlu0 %7242, %v4197_v59  }
 0x31a   : > { %v9619_v32 = vpop.permute.xlu1 %2180 }
 0x31b   : > { %4220 = vperm.xlu1 %7241, %v4142_v2   ;;  %v7372_v2 = vld [vmem:[%s10159_s2 + $0x16c] ss:$16 sps:$4 sm:$0xff]  }
 0x31c   : > { %3509 = vmatmul.mubr.bf16.gmra.mrb[4].mxu0 %v7344_v8  ;;  %4345 = vperm.xlu0 %7242, %v4167_v17   ;;  %v4160_v8 = vld [vmem:[%s10162_s5 + $0xa8] sm:$0xff]  ;;  %v4162_v17 = vld [vmem:[%s10162_s5 + $0xb8] sm:$0xff] }
 0x31d   : > { %3518 = vmatprep.mubr.bf16.mxu0 %v7345_v31  ;;  %v4192_v31 = vld [vmem:[%s10162_s5 + $0x1a8] sm:$0xff] }
 0x31e   : > { %v9633_v44 = vpop.permute.xlu1 %2190 }
 0x31f   : > { %4380 = vperm.xlu1 %7241, %v4174_v10   ;;  %v7374_v10 = vld [vmem:[%s10159_s2 + $0x168] ss:$16 sps:$4 sm:$0xff]  }
 0x320   : > { %4505 = vperm.xlu0 %7242, %v4199_v46   ;;  %v7377_v46 = vld [vmem:[%s10159_s2 + $0x188] ss:$16 sps:$4 sm:$0xff]  }
 0x322   : > { %v9644_v26 = vpop.permute.xlu1 %2200 }
 0x323   : > { %4230 = vperm.xlu1 %7241, %v4144_v51  }
 0x324   : > { %3519 = vmatmul.mubr.bf16.gmra.mrb[8].mxu0 %v7347_v47  ;;  %4355 = vperm.xlu0 %7242, %v4169_v0   ;;  %v7375_v47 = vld [vmem:[%s10159_s2 + $0x18c] ss:$16 sps:$4 sm:$0xff]  }
 0x325   : > { %3528 = vmatprep.mubr.bf16.mxu0 %v7348_v52  ;;  %v4194_v52 = vld [vmem:[%s10162_s5 + $0x1b8] sm:$0xff] }
 0x326   : > { %v9655_v48 = vpop.permute.xlu1 %2210 }
 0x327   : > { %4390 = vperm.xlu1 %7241, %v4176_v55   ;;  %v4164_v55 = vld [vmem:[%s10162_s5 + $0xc8] sm:$0xff] }
 0x328   : > { %4515 = vperm.xlu0 %7242, %v4201_v9   ;;  %v7380_v9 = vld [vmem:[%s10159_s2 + $0x1a8] ss:$16 sps:$4 sm:$0xff]  }
 0x32a   : > { %v9663_v38 = vpop.permute.xlu1 %2220 }
 0x32b   : > { %4240 = vperm.xlu1 %7241, %v4146_v25   ;;  %v4196_v25 = vld [vmem:[%s10162_s5 + $0x1c8] sm:$0xff] }
 0x32c   : > { %3529 = vmatmul.mubr.bf16.gmra.mrb[12].mxu0 %v7350_v4  ;;  %v7378_v4 = vld [vmem:[%s10159_s2 + $0x1ac] ss:$16 sps:$4 sm:$0xff]  }
 0x32d   : > { %3538 = vmatprep.mubr.bf16.mxu0 %v7351_v20 }
 0x32e   : > { %v9677_v59 = vpop.permute.xlu1 %2230 }
 0x32f   : > { %4400 = vperm.xlu1 %7241, %v4178_v57   ;;  %v4166_v57 = vld [vmem:[%s10162_s5 + $0xd8] sm:$0xff] }
 0x332   : > { %v9688_v51 = vpop.permute.xlu1 %2240 }
 0x333   : > { %4250 = vperm.xlu1 %7241, %v4148_v63   ;;  %v4198_v63 = vld [vmem:[%s10162_s5 + $0x1d8] sm:$0xff] }
 0x334   : > { %3539 = vmatmul.mubr.bf16.gmra.mrb[16].mxu0 %v7353_v41  ;;  %v7381_v41 = vld [vmem:[%s10159_s2 + $0x1cc] ss:$16 sps:$4 sm:$0xff]  }
 0x335   : > { %3548 = vmatprep.mubr.bf16.mxu0 %v7354_v5 }
 0x336   : > { %v9699_v0 = vpop.permute.xlu1 %2250 }
 0x337   : > { %4410 = vperm.xlu1 %7241, %v4180_v54   ;;  %v7383_v54 = vld [vmem:[%s10159_s2 + $0x1c8] ss:$16 sps:$4 sm:$0xff]  }
 0x33a   : > { %v9707_v20 = vpop.permute.xlu1 %2260 }
 0x33b   : > { %4260 = vperm.xlu1 %7241, %v4150_v42   ;;  %v7384_v42 = vld [vmem:[%s10159_s2 + $0x1ec] ss:$16 sps:$4 sm:$0xff]  }
 0x33c   : > { %3549 = vmatmul.mubr.bf16.gmra.mrb[20].mxu0 %v7356_v34  ;;  %v4168_v34 = vld [vmem:[%s10162_s5 + $0xe8] sm:$0xff] }
 0x33d   : > { %3558 = vmatprep.mubr.bf16.mxu0 %v7357_v27 }
 0x33e   : > { %v9721_v5 = vpop.permute.xlu1 %2270 }
 0x33f   : > { %4420 = vperm.xlu1 %7241, %v4182_v12   ;;  %v4200_v12 = vld [vmem:[%s10162_s5 + $0x1e8] sm:$0xff] }
 0x342   : > { %v9732_v27 = vpop.permute.xlu1 %2280 }
 0x343   : > { %4270 = vperm.xlu1 %7241, %v4152_v13   ;;  %v4170_v13 = vld [vmem:[%s10162_s5 + $0xf8] sm:$0xff] }
 0x344   : > { %3559 = vmatmul.mubr.bf16.gmra.mrb[24].mxu0 %v7359_v58  ;;  %v7386_v58 = vld [vmem:[%s10159_s2 + $0x1e8] ss:$16 sps:$4 sm:$0xff]  }
 0x345   : > { %3568 = vmatprep.mubr.bf16.mxu0 %v7360_v14 }
 0x346   : > { %v9743_v14 = vpop.permute.xlu1 %2290 }
 0x347   : > { %4430 = vperm.xlu1 %7241, %v4184_v36   ;;  %v7387_v36 = vld [vmem:[%s10159_s2 + $0x20c] ss:$16 sps:$4 sm:$0xff]  }
 0x34b   : > { %4280 = vperm.xlu1 %7241, %v4154_v53   ;;  %v9751_v53 = vpop.permute.xlu1 %2300 }
 0x34c   : > { %3569 = vmatmul.mubr.bf16.gmra.mrb[28].mxu0 %v7362_v24  ;;  %v4202_v24 = vld [vmem:[%s10162_s5 + $0x1f8] sm:$0xff] }
 0x34d   : > { %3578 = vmatprep.mubr.bf16.mxu0 %v7363_v45  ;;  %v7389_v45 = vld [vmem:[%s10159_s2 + $0x208] ss:$16 sps:$4 sm:$0xff]  }
 0x34f   : > { %4440 = vperm.xlu1 %7241, %v4186_v30   ;;  %v7390_v30 = vld [vmem:[%s10159_s2 + $0x22c] ss:$16 sps:$4 sm:$0xff]  }
 0x353   : > { %4290 = vperm.xlu1 %7241, %v4156_v49   ;;  %v7393_v49 = vld [vmem:[%s10159_s2 + $0x24c] ss:$16 sps:$4 sm:$0xff]  }
 0x354   : > { %3579 = vmatmul.mubr.bf16.gmra.mrb[32].mxu0 %v7365_v43  ;;  %v7392_v43 = vld [vmem:[%s10159_s2 + $0x228] ss:$16 sps:$4 sm:$0xff]  }
 0x355   : > { %3588 = vmatprep.mubr.bf16.mxu0 %v7366_v7  ;;  %v7395_v7 = vld [vmem:[%s10159_s2 + $0x248] ss:$16 sps:$4 sm:$0xff]  }
 0x357   : > { %4450 = vperm.xlu1 %7241, %v4188_v11   ;;  %v7396_v11 = vld [vmem:[%s10159_s2 + $0x26c] ss:$16 sps:$4 sm:$0xff]  }
 0x35b   : > { %4300 = vperm.xlu1 %7241, %v4158_v40   ;;  %v7399_v40 = vld [vmem:[%s10159_s2 + $0x28c] ss:$16 sps:$4 sm:$0xff]  }
 0x35c   : > { %3589 = vmatmul.mubr.bf16.gmra.mrb[36].mxu0 %v7368_v35  ;;  %v7398_v35 = vld [vmem:[%s10159_s2 + $0x268] ss:$16 sps:$4 sm:$0xff]  }
 0x35d   : > { %3598 = vmatprep.mubr.bf16.mxu0 %v7369_v6  ;;  %v7401_v6 = vld [vmem:[%s10159_s2 + $0x288] ss:$16 sps:$4 sm:$0xff]  }
 0x35f   : > { %4460 = vperm.xlu1 %7241, %v4190_v28   ;;  %v7402_v28 = vld [vmem:[%s10159_s2 + $0x2ac] ss:$16 sps:$4 sm:$0xff]  }
 0x363   : > { %4310 = vperm.xlu1 %7241, %v4160_v8   ;;  %v7405_v8 = vld [vmem:[%s10159_s2 + $0x2cc] ss:$16 sps:$4 sm:$0xff]  }
 0x364   : > { %3599 = vmatmul.mubr.bf16.gmra.mrb[40].mxu0 %v7371_v18  ;;  %v7404_v18 = vld [vmem:[%s10159_s2 + $0x2a8] ss:$16 sps:$4 sm:$0xff]  }
 0x365   : > { %3608 = vmatprep.mubr.bf16.mxu0 %v7372_v2  ;;  %v7407_v2 = vld [vmem:[%s10159_s2 + $0x2c8] ss:$16 sps:$4 sm:$0xff]  }
 0x367   : > { %4470 = vperm.xlu1 %7241, %v4192_v31   ;;  %v7408_v31 = vld [vmem:[%s10159_s2 + $0x2ec] ss:$16 sps:$4 sm:$0xff]  }
 0x36b   : > { %4320 = vperm.xlu1 %7241, %v4162_v17   ;;  %v7411_v17 = vld [vmem:[%s10159_s2 + $0x30c] ss:$16 sps:$4 sm:$0xff]  }
 0x36c   : > { %3609 = vmatmul.mubr.bf16.gmra.mrb[44].mxu0 %v7374_v10  ;;  %v7410_v10 = vld [vmem:[%s10159_s2 + $0x2e8] ss:$16 sps:$4 sm:$0xff]  }
 0x36d   : > { %3618 = vmatprep.mubr.bf16.mxu0 %v7375_v47  ;;  %v7413_v47 = vld [vmem:[%s10159_s2 + $0x308] ss:$16 sps:$4 sm:$0xff]  }
 0x36f   : > { %4480 = vperm.xlu1 %7241, %v4194_v52   ;;  %v7414_v52 = vld [vmem:[%s10159_s2 + $0x32c] ss:$16 sps:$4 sm:$0xff]  }
 0x373   : > { %4330 = vperm.xlu1 %7241, %v4164_v55   ;;  %v7417_v55 = vld [vmem:[%s10159_s2 + $0x34c] ss:$16 sps:$4 sm:$0xff]  }
 0x374   : > { %3619 = vmatmul.mubr.bf16.gmra.mrb[48].mxu0 %v7377_v46  ;;  %v7416_v46 = vld [vmem:[%s10159_s2 + $0x328] ss:$16 sps:$4 sm:$0xff]  }
 0x375   : > { %3628 = vmatprep.mubr.bf16.mxu0 %v7378_v4  ;;  %v7419_v4 = vld [vmem:[%s10159_s2 + $0x348] ss:$16 sps:$4 sm:$0xff]  }
 0x377   : > { %4490 = vperm.xlu1 %7241, %v4196_v25   ;;  %v7420_v25 = vld [vmem:[%s10159_s2 + $0x36c] ss:$16 sps:$4 sm:$0xff]  }
 0x37b   : > { %4340 = vperm.xlu1 %7241, %v4166_v57  }
 0x37c   : > { %3629 = vmatmul.mubr.bf16.gmra.mrb[52].mxu0 %v7380_v9 }
 0x37d   : > { %3638 = vmatprep.mubr.bf16.mxu0 %v7381_v41 }
 0x37f   : > { %4500 = vperm.xlu1 %7241, %v4198_v63   ;;  %v7422_v63 = vld [vmem:[%s10159_s2 + $0x368] ss:$16 sps:$4 sm:$0xff]  }
 0x383   : > { %4350 = vperm.xlu1 %7241, %v4168_v34  }
 0x384   : > { %3639 = vmatmul.mubr.bf16.gmra.mrb[56].mxu0 %v7383_v54 }
 0x385   : > { %3648 = vmatprep.mubr.bf16.mxu0 %v7384_v42  ;;  %v7423_v42 = vld [vmem:[%s10159_s2 + $0x38c] ss:$16 sps:$4 sm:$0xff]  }
 0x387   : > { %4510 = vperm.xlu1 %7241, %v4200_v12  }
 0x38b   : > { %4360 = vperm.xlu1 %7241, %v4170_v13   ;;  %v7437_v13 = vld [vmem:[#allocation3 + $0x4] ss:$16 sps:$4 sm:$0xff]  }
 0x38c   : > { %3649 = vmatmul.mubr.bf16.gmra.mrb[60].mxu0 %v7386_v58  ;;  %5195 = vmatprep.mubr.bf16.mxu1 %v7437_v13 }
 0x38d   : > { %3658 = vmatprep.mubr.bf16.mxu0 %v7387_v36 }
 0x38f   : > { %4520 = vperm.xlu1 %7241, %v4202_v24  }
 0x394   : > { %3659 = vmatmul.mubr.bf16.gmra.mrb[64].mxu0 %v7389_v45 }
 0x395   : > { %3668 = vmatprep.mubr.bf16.mxu0 %v7390_v30 }
 0x39c   : > { %3669 = vmatmul.mubr.bf16.gmra.mrb[68].mxu0 %v7392_v43 }
 0x39d   : > { %3678 = vmatprep.mubr.bf16.mxu0 %v7393_v49 }
 0x3a4   : > { %3679 = vmatmul.mubr.bf16.gmra.mrb[72].mxu0 %v7395_v7 }
 0x3a5   : > { %3688 = vmatprep.mubr.bf16.mxu0 %v7396_v11 }
 0x3ac   : > { %3689 = vmatmul.mubr.bf16.gmra.mrb[76].mxu0 %v7398_v35 }
 0x3ad   : > { %3698 = vmatprep.mubr.bf16.mxu0 %v7399_v40  ;;  %v7425_v40 = vld [vmem:[%s10159_s2 + $0x388] ss:$16 sps:$4 sm:$0xff]  }
 0x3b4   : > { %3699 = vmatmul.mubr.bf16.gmra.mrb[80].mxu0 %v7401_v6 }
 0x3b5   : > { %3708 = vmatprep.mubr.bf16.mxu0 %v7402_v28  ;;  %v7426_v28 = vld [vmem:[%s10159_s2 + $0x3ac] ss:$16 sps:$4 sm:$0xff]  }
 0x3bc   : > { %3709 = vmatmul.mubr.bf16.gmra.mrb[84].mxu0 %v7404_v18 }
 0x3bd   : > { %3718 = vmatprep.mubr.bf16.mxu0 %v7405_v8 }
 0x3c4   : > { %3719 = vmatmul.mubr.bf16.gmra.mrb[88].mxu0 %v7407_v2 }
 0x3c5   : > { %3728 = vmatprep.mubr.bf16.mxu0 %v7408_v31 }
 0x3cc   : > { %3729 = vmatmul.mubr.bf16.gmra.mrb[92].mxu0 %v7410_v10 }
 0x3cd   : > { %3738 = vmatprep.mubr.bf16.mxu0 %v7411_v17 }
 0x3d4   : > { %3739 = vmatmul.mubr.bf16.gmra.mrb[96].mxu0 %v7413_v47 }
 0x3d5   : > { %3748 = vmatprep.mubr.bf16.mxu0 %v7414_v52 }
 0x3dc   : > { %3749 = vmatmul.mubr.bf16.gmra.mrb[100].mxu0 %v7416_v46 }
 0x3dd   : > { %3758 = vmatprep.mubr.bf16.mxu0 %v7417_v55 }
 0x3e4   : > { %3759 = vmatmul.mubr.bf16.gmra.mrb[104].mxu0 %v7419_v4 }
 0x3e5   : > { %3768 = vmatprep.mubr.bf16.mxu0 %v7420_v25  ;;  %v7428_v25 = vld [vmem:[%s10159_s2 + $0x3a8] ss:$16 sps:$4 sm:$0xff]  }
 0x3e7   : > { %v3500_v9 = vpop.f32.mrb[0].mxu0 }
 0x3e8   : > { %v6570_v57 = vadd.f32 %v3500_v9, %v9589_v1  ;;  %v3502_v41 = vpop.f32.mrb[1].mxu0 }
 0x3e9   : > { %v6571_v54 = vadd.f32 %v3502_v41, %v9589_v1  ;;  %v3504_v34 = vpop.f32.mrb[2].mxu0 }
 0x3ea   : > { %v6572_v12 = vadd.f32 %v3504_v34, %v9360_v23  ;;  %v3506_v58 = vpop.f32.mrb[3].mxu0  ;;  %v3819_v24 = vmax.f32 %v6570_v57, 0.0 }
 0x3eb   : > { %v6573_v36 = vadd.f32 %v3506_v58, %v9360_v23  ;;  %v3820_v30 = vmax.f32 %v6571_v54, 0.0 }
 0x3ec   : > { %v3821_v45 = vmax.f32 %v6572_v12, 0.0  ;;  %3769 = vmatmul.mubr.bf16.gmra.mrb[108].mxu0 %v7422_v63 }
 0x3ed   : > { %v3822_v43 = vmax.f32 %v6573_v36, 0.0  ;;  %3778 = vmatprep.mubr.bf16.mxu0 %v7423_v42 }
 0x3ee   : > { %v4075_v49 = vpack.c.bf16 %v3821_v45, %v3819_v24 }
 0x3ef   : > { %v3510_v1 = vpop.f32.mrb[4].mxu0  ;;  %v4076_v7 = vpack.c.bf16 %v3822_v43, %v3820_v30  ;;  %v7431_v30 = vld [vmem:[%s10159_s2 + $0x3c8] ss:$16 sps:$4 sm:$0xff]  }
 0x3f0   : > { %v6574_v11 = vadd.f32 %v3510_v1, %v9600_v19  ;;  %v3512_v35 = vpop.f32.mrb[5].mxu0 }
 0x3f1   : > { %v6575_v6 = vadd.f32 %v3512_v35, %v9600_v19  ;;  %v3514_v23 = vpop.f32.mrb[6].mxu0  ;;  %5163 = vmatprep.subr.bf16.mxu1 %v4076_v7 }
 0x3f2   : > { %v6576_v18 = vadd.f32 %v3514_v23, %v9611_v3  ;;  %v3516_v8 = vpop.f32.mrb[7].mxu0  ;;  %5164 = vmatpush1.bf16.msra.mxu1 %v4075_v49  ;;  %v3823_v31 = vmax.f32 %v6574_v11, 0.0 }
 0x3f3   : > { %v6577_v2 = vadd.f32 %v3516_v8, %v9611_v3  ;;  %v3824_v17 = vmax.f32 %v6575_v6, 0.0  ;;  %v7429_v3 = vld [vmem:[%s10159_s2 + $0x3cc] ss:$16 sps:$4 sm:$0xff]  }
 0x3f4   : > { %v3825_v10 = vmax.f32 %v6576_v18, 0.0  ;;  %3779 = vmatmul.mubr.bf16.gmra.mrb[112].mxu0 %v7425_v40 }
 0x3f5   : > { %v3826_v47 = vmax.f32 %v6577_v2, 0.0  ;;  %3788 = vmatprep.mubr.bf16.mxu0 %v7426_v28 }
 0x3f6   : > { %v4077_v52 = vpack.c.bf16 %v3825_v10, %v3823_v31  ;;  %v7434_v31 = vld [vmem:[%s10159_s2 + $0x3e8] ss:$16 sps:$4 sm:$0xff]  }
 0x3f7   : > { %v4078_v19 = vpack.c.bf16 %v3826_v47, %v3824_v17  ;;  %v3520_v46 = vpop.f32.mrb[8].mxu0 }
 0x3f8   : > { %v6578_v55 = vadd.f32 %v3520_v46, %v9379_v37  ;;  %v3522_v4 = vpop.f32.mrb[9].mxu0 }
 0x3f9   : > { %v6579_v9 = vadd.f32 %v3522_v4, %v9379_v37  ;;  %v3524_v57 = vpop.f32.mrb[10].mxu0  ;;  %5165 = vmatprep.subr.bf16.mxu1 %v4078_v19 }
 0x3fa   : > { %v6580_v41 = vadd.f32 %v3524_v57, %v9619_v32  ;;  %v3526_v63 = vpop.f32.mrb[11].mxu0  ;;  %5166 = vmatpush1.bf16.msra.mxu1 %v4077_v52  ;;  %v3827_v34 = vmax.f32 %v6578_v55, 0.0 }
 0x3fb   : > { %v6581_v54 = vadd.f32 %v3526_v63, %v9619_v32  ;;  %v3828_v12 = vmax.f32 %v6579_v9, 0.0  ;;  %v7432_v32 = vld [vmem:[%s10159_s2 + $0x3ec] ss:$16 sps:$4 sm:$0xff]  }
 0x3fc   : > { %v3829_v42 = vmax.f32 %v6580_v41, 0.0  ;;  %3789 = vmatmul.mubr.bf16.gmra.mrb[116].mxu0 %v7428_v25 }
 0x3fd   : > { %v3830_v58 = vmax.f32 %v6581_v54, 0.0  ;;  %3798 = vmatprep.mubr.bf16.mxu0 %v7429_v3 }
 0x3fe   : > { %v4079_v13 = vpack.c.bf16 %v3829_v42, %v3827_v34 }
 0x3ff   : > { %v4080_v37 = vpack.c.bf16 %v3830_v58, %v3828_v12  ;;  %v3530_v36 = vpop.f32.mrb[12].mxu0 }
 0x400   : > { %v6582_v24 = vadd.f32 %v3530_v36, %v9392_v50  ;;  %v3532_v45 = vpop.f32.mrb[13].mxu0 }
 0x401   : > { %v6583_v43 = vadd.f32 %v3532_v45, %v9392_v50  ;;  %v3534_v49 = vpop.f32.mrb[14].mxu0  ;;  %5167 = vmatprep.subr.bf16.mxu1 %v4080_v37 }
 0x402   : > { %v6584_v1 = vadd.f32 %v3534_v49, %v9633_v44  ;;  %v3536_v7 = vpop.f32.mrb[15].mxu0  ;;  %5168 = vmatpush1.bf16.msra.mxu1 %v4079_v13  ;;  %v3831_v35 = vmax.f32 %v6582_v24, 0.0 }
 0x403   : > { %v6585_v11 = vadd.f32 %v3536_v7, %v9633_v44  ;;  %v3832_v6 = vmax.f32 %v6583_v43, 0.0 }
 0x404   : > { %v3833_v40 = vmax.f32 %v6584_v1, 0.0  ;;  %3799 = vmatmul.mubr.bf16.gmra.mrb[120].mxu0 %v7431_v30 }
 0x405   : > { %v3834_v23 = vmax.f32 %v6585_v11, 0.0  ;;  %3808 = vmatprep.mubr.bf16.mxu0 %v7432_v32 }
 0x406   : > { %v4081_v28 = vpack.c.bf16 %v3833_v40, %v3831_v35 }
 0x407   : > { %v4082_v50 = vpack.c.bf16 %v3834_v23, %v3832_v6  ;;  %v3540_v18 = vpop.f32.mrb[16].mxu0 }
 0x408   : > { %v6586_v8 = vadd.f32 %v3540_v18, %v9413_v33  ;;  %v3542_v2 = vpop.f32.mrb[17].mxu0 }
 0x409   : > { %v6587_v10 = vadd.f32 %v3542_v2, %v9413_v33  ;;  %v3544_v17 = vpop.f32.mrb[18].mxu0  ;;  %5169 = vmatprep.subr.bf16.mxu1 %v4082_v50 }
 0x40a   : > { %v6588_v44 = vadd.f32 %v3544_v17, %v9644_v26  ;;  %v3546_v47 = vpop.f32.mrb[19].mxu0  ;;  %5170 = vmatpush1.bf16.msra.mxu1 %v4081_v28  ;;  %v3835_v19 = vmax.f32 %v6586_v8, 0.0 }
 0x40b   : > { %v6589_v52 = vadd.f32 %v3546_v47, %v9644_v26  ;;  %v3836_v55 = vmax.f32 %v6587_v10, 0.0 }
 0x40c   : > { %v3837_v46 = vmax.f32 %v6588_v44, 0.0  ;;  %3809 = vmatmul.mubr.bf16.gmra.mrb[124].mxu0 %v7434_v31 }
 0x40d   : > { %v3838_v4 = vmax.f32 %v6589_v52, 0.0 }
 0x40e   : > { %v4083_v25 = vpack.c.bf16 %v3837_v46, %v3835_v19 }
 0x40f   : > { %v4084_v9 = vpack.c.bf16 %v3838_v4, %v3836_v55  ;;  %v3550_v57 = vpop.f32.mrb[20].mxu0 }
 0x410   : > { %v6590_v3 = vadd.f32 %v3550_v57, %v9426_v62  ;;  %v3552_v41 = vpop.f32.mrb[21].mxu0 }
 0x411   : > { %v6591_v33 = vadd.f32 %v3552_v41, %v9426_v62  ;;  %v3554_v63 = vpop.f32.mrb[22].mxu0  ;;  %5171 = vmatprep.subr.bf16.mxu1 %v4084_v9 }
 0x412   : > { %v6592_v54 = vadd.f32 %v3554_v63, %v9655_v48  ;;  %v3556_v34 = vpop.f32.mrb[23].mxu0  ;;  %5172 = vmatpush1.bf16.msra.mxu1 %v4083_v25  ;;  %v3839_v42 = vmax.f32 %v6590_v3, 0.0 }
 0x413   : > { %v6593_v26 = vadd.f32 %v3556_v34, %v9655_v48  ;;  %v3840_v58 = vmax.f32 %v6591_v33, 0.0 }
 0x414   : > { %v3841_v12 = vmax.f32 %v6592_v54, 0.0 }
 0x415   : > { %v3842_v13 = vmax.f32 %v6593_v26, 0.0 }
 0x416   : > { %v4085_v37 = vpack.c.bf16 %v3841_v12, %v3839_v42 }
 0x417   : > { %v4086_v36 = vpack.c.bf16 %v3842_v13, %v3840_v58  ;;  %v3560_v24 = vpop.f32.mrb[24].mxu0 }
 0x418   : > { %v6594_v45 = vadd.f32 %v3560_v24, %v9439_v22  ;;  %v3562_v30 = vpop.f32.mrb[25].mxu0 }
 0x419   : > { %v6595_v62 = vadd.f32 %v3562_v30, %v9439_v22  ;;  %v3564_v43 = vpop.f32.mrb[26].mxu0  ;;  %5173 = vmatprep.subr.bf16.mxu1 %v4086_v36 }
 0x41a   : > { %v6596_v49 = vadd.f32 %v3564_v43, %v9663_v38  ;;  %v3566_v32 = vpop.f32.mrb[27].mxu0  ;;  %5174 = vmatpush1.bf16.msra.mxu1 %v4085_v37  ;;  %v3843_v1 = vmax.f32 %v6594_v45, 0.0 }
 0x41b   : > { %v6597_v48 = vadd.f32 %v3566_v32, %v9663_v38  ;;  %v3844_v11 = vmax.f32 %v6595_v62, 0.0 }
 0x41c   : > { %v3845_v7 = vmax.f32 %v6596_v49, 0.0 }
 0x41d   : > { %v3846_v35 = vmax.f32 %v6597_v48, 0.0 }
 0x41e   : > { %v4087_v40 = vpack.c.bf16 %v3845_v7, %v3843_v1 }
 0x41f   : > { %v4088_v6 = vpack.c.bf16 %v3846_v35, %v3844_v11  ;;  %v3570_v23 = vpop.f32.mrb[28].mxu0 }
 0x420   : > { %v6598_v28 = vadd.f32 %v3570_v23, %v9466_v21  ;;  %v3572_v50 = vpop.f32.mrb[29].mxu0 }
 0x421   : > { %v6599_v22 = vadd.f32 %v3572_v50, %v9466_v21  ;;  %v3574_v18 = vpop.f32.mrb[30].mxu0  ;;  %5175 = vmatprep.subr.bf16.mxu1 %v4088_v6 }
 0x422   : > { %v6600_v8 = vadd.f32 %v3574_v18, %v9677_v59  ;;  %v3576_v2 = vpop.f32.mrb[31].mxu0  ;;  %5176 = vmatpush1.bf16.msra.mxu1 %v4087_v40  ;;  %v3847_v31 = vmax.f32 %v6598_v28, 0.0 }
 0x423   : > { %v6601_v38 = vadd.f32 %v3576_v2, %v9677_v59  ;;  %v3848_v17 = vmax.f32 %v6599_v22, 0.0 }
 0x424   : > { %v3849_v10 = vmax.f32 %v6600_v8, 0.0 }
 0x425   : > { %v3850_v44 = vmax.f32 %v6601_v38, 0.0 }
 0x426   : > { %v4089_v47 = vpack.c.bf16 %v3849_v10, %v3847_v31 }
 0x427   : > { %v4090_v52 = vpack.c.bf16 %v3850_v44, %v3848_v17  ;;  %v3580_v19 = vpop.f32.mrb[32].mxu0 }
 0x428   : > { %v6602_v46 = vadd.f32 %v3580_v19, %v9485_v29  ;;  %v3582_v55 = vpop.f32.mrb[33].mxu0 }
 0x429   : > { %v6603_v21 = vadd.f32 %v3582_v55, %v9485_v29  ;;  %v3584_v4 = vpop.f32.mrb[34].mxu0  ;;  %5177 = vmatprep.subr.bf16.mxu1 %v4090_v52 }
 0x42a   : > { %v6604_v25 = vadd.f32 %v3584_v4, %v9688_v51  ;;  %v3586_v9 = vpop.f32.mrb[35].mxu0  ;;  %5178 = vmatpush1.bf16.msra.mxu1 %v4089_v47  ;;  %v3851_v57 = vmax.f32 %v6602_v46, 0.0 }
 0x42b   : > { %v6605_v59 = vadd.f32 %v3586_v9, %v9688_v51  ;;  %v3852_v41 = vmax.f32 %v6603_v21, 0.0 }
 0x42c   : > { %v3853_v3 = vmax.f32 %v6604_v25, 0.0 }
 0x42d   : > { %v3854_v33 = vmax.f32 %v6605_v59, 0.0 }
 0x42e   : > { %v4091_v63 = vpack.c.bf16 %v3853_v3, %v3851_v57 }
 0x42f   : > { %v4092_v54 = vpack.c.bf16 %v3854_v33, %v3852_v41  ;;  %v3590_v34 = vpop.f32.mrb[36].mxu0 }
 0x430   : > { %v6606_v26 = vadd.f32 %v3590_v34, %v9496_v16  ;;  %v3592_v42 = vpop.f32.mrb[37].mxu0 }
 0x431   : > { %v6607_v29 = vadd.f32 %v3592_v42, %v9496_v16  ;;  %v3594_v12 = vpop.f32.mrb[38].mxu0  ;;  %5179 = vmatprep.subr.bf16.mxu1 %v4092_v54 }
 0x432   : > { %v6608_v58 = vadd.f32 %v3594_v12, %v9699_v0  ;;  %v3596_v13 = vpop.f32.mrb[39].mxu0  ;;  %5180 = vmatpush1.bf16.msra.mxu1 %v4091_v63  ;;  %v3855_v37 = vmax.f32 %v6606_v26, 0.0 }
 0x433   : > { %v6609_v51 = vadd.f32 %v3596_v13, %v9699_v0  ;;  %v3856_v24 = vmax.f32 %v6607_v29, 0.0 }
 0x434   : > { %v3857_v36 = vmax.f32 %v6608_v58, 0.0 }
 0x435   : > { %v3858_v45 = vmax.f32 %v6609_v51, 0.0 }
 0x436   : > { %v4093_v30 = vpack.c.bf16 %v3857_v36, %v3855_v37 }
 0x437   : > { %v4094_v62 = vpack.c.bf16 %v3858_v45, %v3856_v24  ;;  %v3600_v43 = vpop.f32.mrb[40].mxu0 }
 0x438   : > { %v6610_v49 = vadd.f32 %v3600_v43, %v9513_v39  ;;  %v3602_v32 = vpop.f32.mrb[41].mxu0 }
 0x439   : > { %v6611_v16 = vadd.f32 %v3602_v32, %v9513_v39  ;;  %v3604_v48 = vpop.f32.mrb[42].mxu0  ;;  %5181 = vmatprep.subr.bf16.mxu1 %v4094_v62 }
 0x43a   : > { %v6612_v1 = vadd.f32 %v3604_v48, %v9707_v20  ;;  %v3606_v7 = vpop.f32.mrb[43].mxu0  ;;  %5182 = vmatpush1.bf16.msra.mxu1 %v4093_v30  ;;  %v3859_v11 = vmax.f32 %v6610_v49, 0.0 }
 0x43b   : > { %v6613_v0 = vadd.f32 %v3606_v7, %v9707_v20  ;;  %v3860_v40 = vmax.f32 %v6611_v16, 0.0 }
 0x43c   : > { %v3861_v35 = vmax.f32 %v6612_v1, 0.0 }
 0x43d   : > { %v3862_v6 = vmax.f32 %v6613_v0, 0.0  ;;  %v2306_v0 = vpop.permute.xlu0 %2305 }
 0x43e   : > { %v4095_v23 = vpack.c.bf16 %v3861_v35, %v3859_v11 }
 0x43f   : > { %v4096_v28 = vpack.c.bf16 %v3862_v6, %v3860_v40  ;;  %v3610_v50 = vpop.f32.mrb[44].mxu0 }
 0x440   : > { %v6614_v22 = vadd.f32 %v3610_v50, %v9530_v56  ;;  %v3612_v18 = vpop.f32.mrb[45].mxu0 }
 0x441   : > { %v6615_v39 = vadd.f32 %v3612_v18, %v9530_v56  ;;  %v3614_v8 = vpop.f32.mrb[46].mxu0  ;;  %5183 = vmatprep.subr.bf16.mxu1 %v4096_v28 }
 0x442   : > { %v6616_v2 = vadd.f32 %v3614_v8, %v9721_v5  ;;  %v3616_v38 = vpop.f32.mrb[47].mxu0  ;;  %5184 = vmatpush1.bf16.msra.mxu1 %v4095_v23  ;;  %v3863_v31 = vmax.f32 %v6614_v22, 0.0  ;;  %v2311_v23 = vpop.permute.xlu1 %2310 }
 0x443   : > { %v6617_v20 = vadd.f32 %v3616_v38, %v9721_v5  ;;  %v3864_v17 = vmax.f32 %v6615_v39, 0.0 }
 0x444   : > { %v3865_v10 = vmax.f32 %v6616_v2, 0.0 }
 0x445   : > { %v3866_v44 = vmax.f32 %v6617_v20, 0.0  ;;  %v2316_v20 = vpop.permute.xlu0 %2315 }
 0x446   : > { %v4097_v47 = vpack.c.bf16 %v3865_v10, %v3863_v31 }
 0x447   : > { %v4098_v52 = vpack.c.bf16 %v3866_v44, %v3864_v17  ;;  %v3620_v19 = vpop.f32.mrb[48].mxu0 }
 0x448   : > { %v6618_v46 = vadd.f32 %v3620_v19, %v9544_v15  ;;  %v3622_v55 = vpop.f32.mrb[49].mxu0 }
 0x449   : > { %v6619_v56 = vadd.f32 %v3622_v55, %v9544_v15  ;;  %v3624_v21 = vpop.f32.mrb[50].mxu0  ;;  %5185 = vmatprep.subr.bf16.mxu1 %v4098_v52 }
 0x44a   : > { %v6620_v4 = vadd.f32 %v3624_v21, %v9732_v27  ;;  %v3626_v25 = vpop.f32.mrb[51].mxu0  ;;  %5186 = vmatpush1.bf16.msra.mxu1 %v4097_v47  ;;  %v3867_v9 = vmax.f32 %v6618_v46, 0.0  ;;  %v2321_v47 = vpop.permute.xlu1 %2320  ;;  %v7435_v46 = vld [vmem:[#allocation3] ss:$16 sps:$4 sm:$0xff]   ;;  %v7438_v21 = vld [vmem:[#allocation3 + $0x24] ss:$16 sps:$4 sm:$0xff]  }
 0x44b   : > { %v6621_v5 = vadd.f32 %v3626_v25, %v9732_v27  ;;  %v3868_v57 = vmax.f32 %v6619_v56, 0.0 }
 0x44c   : > { %v3869_v59 = vmax.f32 %v6620_v4, 0.0 }
 0x44d   : > { %v3870_v3 = vmax.f32 %v6621_v5, 0.0 }
 0x44e   : > { %v4099_v41 = vpack.c.bf16 %v3869_v59, %v3867_v9 }
 0x44f   : > { %v4100_v33 = vpack.c.bf16 %v3870_v3, %v3868_v57  ;;  %v3630_v63 = vpop.f32.mrb[52].mxu0  ;;  %v2326_v3 = vpop.permute.xlu0 %2325 }
 0x450   : > { %v6622_v54 = vadd.f32 %v3630_v63, %v9558_v60  ;;  %v3632_v34 = vpop.f32.mrb[53].mxu0 }
 0x451   : > { %v6623_v15 = vadd.f32 %v3632_v34, %v9558_v60  ;;  %v3634_v26 = vpop.f32.mrb[54].mxu0  ;;  %5187 = vmatprep.subr.bf16.mxu1 %v4100_v33  ;;  %v2331_v34 = vpop.permute.xlu1 %2330 }
 0x452   : > { %v6624_v42 = vadd.f32 %v3634_v26, %v9743_v14  ;;  %v3636_v29 = vpop.f32.mrb[55].mxu0  ;;  %5188 = vmatpush1.bf16.msra.mxu1 %v4099_v41  ;;  %v3871_v12 = vmax.f32 %v6622_v54, 0.0 }
 0x453   : > { %v6625_v27 = vadd.f32 %v3636_v29, %v9743_v14  ;;  %v3872_v13 = vmax.f32 %v6623_v15, 0.0 }
 0x454   : > { %v3873_v58 = vmax.f32 %v6624_v42, 0.0  ;;  %v7440_v42 = vld [vmem:[#allocation3 + $0x20] ss:$16 sps:$4 sm:$0xff]  }
 0x455   : > { %v3874_v51 = vmax.f32 %v6625_v27, 0.0 }
 0x456   : > { %v4101_v37 = vpack.c.bf16 %v3873_v58, %v3871_v12  ;;  %v7441_v12 = vld [vmem:[#allocation3 + $0x44] ss:$16 sps:$4 sm:$0xff]  }
 0x457   : > { %v4102_v36 = vpack.c.bf16 %v3874_v51, %v3872_v13  ;;  %v3640_v24 = vpop.f32.mrb[56].mxu0 }
 0x458   : > { %v6626_v45 = vadd.f32 %v3640_v24, %v9575_v61  ;;  %v3642_v30 = vpop.f32.mrb[57].mxu0 }
 0x459   : > { %v6627_v60 = vadd.f32 %v3642_v30, %v9575_v61  ;;  %v3644_v62 = vpop.f32.mrb[58].mxu0  ;;  %5189 = vmatprep.subr.bf16.mxu1 %v4102_v36 }
 0x45a   : > { %v6628_v43 = vadd.f32 %v3644_v62, %v9751_v53  ;;  %v3646_v49 = vpop.f32.mrb[59].mxu0  ;;  %5190 = vmatpush1.bf16.msra.mxu1 %v4101_v37  ;;  %v3875_v32 = vmax.f32 %v6626_v45, 0.0  ;;  %v2336_v45 = vpop.permute.xlu0 %2335 }
 0x45b   : > { %v6629_v14 = vadd.f32 %v3646_v49, %v9751_v53  ;;  %v3876_v48 = vmax.f32 %v6627_v60, 0.0  ;;  %v2341_v49 = vpop.permute.xlu1 %2340 }
 0x45c   : > { %v3877_v16 = vmax.f32 %v6628_v43, 0.0 }
 0x45d   : > { %v3878_v1 = vmax.f32 %v6629_v14, 0.0 }
 0x45e   : > { %v4103_v7 = vpack.c.bf16 %v3877_v16, %v3875_v32  ;;  %v7443_v16 = vld [vmem:[#allocation3 + $0x40] ss:$16 sps:$4 sm:$0xff]  }
 0x45f   : > { %v4104_v11 = vpack.c.bf16 %v3878_v1, %v3876_v48  ;;  %v3650_v35 = vpop.f32.mrb[60].mxu0 }
 0x460   : > { %v6630_v40 = vadd.f32 %v3650_v35, %v2306_v0  ;;  %v3652_v6 = vpop.f32.mrb[61].mxu0 }
 0x461   : > { %v6631_v61 = vadd.f32 %v3652_v6, %v2306_v0  ;;  %v3654_v28 = vpop.f32.mrb[62].mxu0  ;;  %5191 = vmatprep.subr.bf16.mxu1 %v4104_v11 }
 0x462   : > { %v6632_v50 = vadd.f32 %v3654_v28, %v2311_v23  ;;  %v3656_v22 = vpop.f32.mrb[63].mxu0  ;;  %5192 = vmatpush1.bf16.msra.mxu1 %v4103_v7  ;;  %v3879_v39 = vmax.f32 %v6630_v40, 0.0  ;;  %v7444_v7 = vld [vmem:[#allocation3 + $0x64] ss:$16 sps:$4 sm:$0xff]  }
 0x463   : > { %v6633_v18 = vadd.f32 %v3656_v22, %v2311_v23  ;;  %v3880_v8 = vmax.f32 %v6631_v61, 0.0  ;;  %v2346_v61 = vpop.permute.xlu0 %2345 }
 0x464   : > { %v3881_v53 = vmax.f32 %v6632_v50, 0.0 }
 0x465   : > { %v3882_v2 = vmax.f32 %v6633_v18, 0.0 }
 0x466   : > { %v4105_v38 = vpack.c.bf16 %v3881_v53, %v3879_v39  ;;  %v2351_v39 = vpop.permute.xlu1 %2350 }
 0x467   : > { %v4106_v31 = vpack.c.bf16 %v3882_v2, %v3880_v8  ;;  %v3660_v10 = vpop.f32.mrb[64].mxu0  ;;  %v7446_v2 = vld [vmem:[#allocation3 + $0x60] ss:$16 sps:$4 sm:$0xff]  }
 0x468   : > { %v6634_v17 = vadd.f32 %v3660_v10, %v2316_v20  ;;  %v3662_v44 = vpop.f32.mrb[65].mxu0 }
 0x469   : > { %v6635_v52 = vadd.f32 %v3662_v44, %v2316_v20  ;;  %v3664_v19 = vpop.f32.mrb[66].mxu0  ;;  %5193 = vmatprep.subr.bf16.mxu1 %v4106_v31  ;;  %v7447_v31 = vld [vmem:[#allocation3 + $0x84] ss:$16 sps:$4 sm:$0xff]  }
 0x46a   : > { %v6636_v55 = vadd.f32 %v3664_v19, %v2321_v47  ;;  %v3666_v56 = vpop.f32.mrb[67].mxu0  ;;  %5194 = vmatpush1.bf16.msra.mxu1 %v4105_v38  ;;  %v3883_v25 = vmax.f32 %v6634_v17, 0.0 }
 0x46b   : > { %v6637_v4 = vadd.f32 %v3666_v56, %v2321_v47  ;;  %v3884_v9 = vmax.f32 %v6635_v52, 0.0 }
 0x46c   : > { %v3885_v5 = vmax.f32 %v6636_v55, 0.0 }
 0x46d   : > { %v3886_v59 = vmax.f32 %v6637_v4, 0.0  ;;  %5196 = vmatmul.mubr.bf16.vlgmr.msra.gmra.mrb[0].mxu1 %v7435_v46  ;;  %v2356_v46 = vpop.permute.xlu0 %2355 }
 0x46e   : > { %v4107_v57 = vpack.c.bf16 %v3885_v5, %v3883_v25  ;;  %5205 = vmatprep.mubr.bf16.mxu1 %v7438_v21  ;;  %v2361_v25 = vpop.permute.xlu1 %2360 }
 0x46f   : > { %v4108_v41 = vpack.c.bf16 %v3886_v59, %v3884_v9  ;;  %v3670_v33 = vpop.f32.mrb[68].mxu0  ;;  %v7449_v59 = vld [vmem:[#allocation3 + $0x80] ss:$16 sps:$4 sm:$0xff]  }
 0x470   : > { %v6638_v63 = vadd.f32 %v3670_v33, %v2326_v3  ;;  %v3672_v54 = vpop.f32.mrb[69].mxu0 }
 0x471   : > { %v6639_v15 = vadd.f32 %v3672_v54, %v2326_v3  ;;  %v3674_v26 = vpop.f32.mrb[70].mxu0  ;;  %5516 = vmatprep.subr.bf16.mxu1 %v4108_v41  ;;  %v7450_v41 = vld [vmem:[#allocation3 + $0xa4] ss:$16 sps:$4 sm:$0xff]  }
 0x472   : > { %v6640_v29 = vadd.f32 %v3674_v26, %v2331_v34  ;;  %v3676_v27 = vpop.f32.mrb[71].mxu0  ;;  %5517 = vmatpush1.bf16.msra.mxu1 %v4107_v57  ;;  %v3887_v13 = vmax.f32 %v6638_v63, 0.0 }
 0x473   : > { %v6641_v58 = vadd.f32 %v3676_v27, %v2331_v34  ;;  %v3888_v37 = vmax.f32 %v6639_v15, 0.0 }
 0x474   : > { %v3889_v51 = vmax.f32 %v6640_v29, 0.0 }
 0x475   : > { %v3890_v36 = vmax.f32 %v6641_v58, 0.0  ;;  %5206 = vmatmul.mubr.bf16.gmra.mrb[4].mxu1 %v7440_v42  ;;  %v2366_v42 = vpop.permute.xlu0 %2365 }
 0x476   : > { %v4109_v24 = vpack.c.bf16 %v3889_v51, %v3887_v13  ;;  %5215 = vmatprep.mubr.bf16.mxu1 %v7441_v12  ;;  %v2371_v13 = vpop.permute.xlu1 %2370 }
 0x477   : > { %v4110_v30 = vpack.c.bf16 %v3890_v36, %v3888_v37  ;;  %v3680_v60 = vpop.f32.mrb[72].mxu0  ;;  %v7452_v36 = vld [vmem:[#allocation3 + $0xa0] ss:$16 sps:$4 sm:$0xff]  }
 0x478   : > { %v6642_v62 = vadd.f32 %v3680_v60, %v2336_v45  ;;  %v3682_v43 = vpop.f32.mrb[73].mxu0 }
 0x479   : > { %v6643_v14 = vadd.f32 %v3682_v43, %v2336_v45  ;;  %v3684_v32 = vpop.f32.mrb[74].mxu0  ;;  %5518 = vmatprep.subr.bf16.mxu1 %v4110_v30  ;;  %v7453_v30 = vld [vmem:[#allocation3 + $0xc4] ss:$16 sps:$4 sm:$0xff]  }
 0x47a   : > { %v6644_v48 = vadd.f32 %v3684_v32, %v2341_v49  ;;  %v3686_v1 = vpop.f32.mrb[75].mxu0  ;;  %5519 = vmatpush1.bf16.msra.mxu1 %v4109_v24  ;;  %v3891_v11 = vmax.f32 %v6642_v62, 0.0 }
 0x47b   : > { %v6645_v0 = vadd.f32 %v3686_v1, %v2341_v49  ;;  %v3892_v40 = vmax.f32 %v6643_v14, 0.0 }
 0x47c   : > { %v3893_v35 = vmax.f32 %v6644_v48, 0.0 }
 0x47d   : > { %v3894_v6 = vmax.f32 %v6645_v0, 0.0  ;;  %5216 = vmatmul.mubr.bf16.gmra.mrb[8].mxu1 %v7443_v16  ;;  %v2376_v16 = vpop.permute.xlu0 %2375 }
 0x47e   : > { %v4111_v23 = vpack.c.bf16 %v3893_v35, %v3891_v11  ;;  %5225 = vmatprep.mubr.bf16.mxu1 %v7444_v7  ;;  %v2381_v11 = vpop.permute.xlu1 %2380 }
 0x47f   : > { %v4112_v28 = vpack.c.bf16 %v3894_v6, %v3892_v40  ;;  %v3690_v50 = vpop.f32.mrb[76].mxu0  ;;  %v7455_v6 = vld [vmem:[#allocation3 + $0xc0] ss:$16 sps:$4 sm:$0xff]  }
 0x480   : > { %v6646_v22 = vadd.f32 %v3690_v50, %v2346_v61  ;;  %v3692_v18 = vpop.f32.mrb[77].mxu0 }
 0x481   : > { %v6647_v53 = vadd.f32 %v3692_v18, %v2346_v61  ;;  %v3694_v8 = vpop.f32.mrb[78].mxu0  ;;  %5520 = vmatprep.subr.bf16.mxu1 %v4112_v28  ;;  %v7456_v28 = vld [vmem:[#allocation3 + $0xe4] ss:$16 sps:$4 sm:$0xff]  }
 0x482   : > { %v6648_v38 = vadd.f32 %v3694_v8, %v2351_v39  ;;  %v3696_v20 = vpop.f32.mrb[79].mxu0  ;;  %5521 = vmatpush1.bf16.msra.mxu1 %v4111_v23  ;;  %v3895_v17 = vmax.f32 %v6646_v22, 0.0 }
 0x483   : > { %v6649_v10 = vadd.f32 %v3696_v20, %v2351_v39  ;;  %v3896_v47 = vmax.f32 %v6647_v53, 0.0 }
 0x484   : > { %v3897_v44 = vmax.f32 %v6648_v38, 0.0 }
 0x485   : > { %v3898_v52 = vmax.f32 %v6649_v10, 0.0  ;;  %5226 = vmatmul.mubr.bf16.gmra.mrb[12].mxu1 %v7446_v2  ;;  %v2386_v2 = vpop.permute.xlu0 %2385 }
 0x486   : > { %v4113_v19 = vpack.c.bf16 %v3897_v44, %v3895_v17  ;;  %5235 = vmatprep.mubr.bf16.mxu1 %v7447_v31  ;;  %v2391_v17 = vpop.permute.xlu1 %2390 }
 0x487   : > { %v4114_v55 = vpack.c.bf16 %v3898_v52, %v3896_v47  ;;  %v3700_v56 = vpop.f32.mrb[80].mxu0  ;;  %v7458_v52 = vld [vmem:[#allocation3 + $0xe0] ss:$16 sps:$4 sm:$0xff]  }
 0x488   : > { %v6650_v21 = vadd.f32 %v3700_v56, %v2356_v46  ;;  %v3702_v4 = vpop.f32.mrb[81].mxu0 }
 0x489   : > { %v6651_v5 = vadd.f32 %v3702_v4, %v2356_v46  ;;  %v3704_v9 = vpop.f32.mrb[82].mxu0  ;;  %5522 = vmatprep.subr.bf16.mxu1 %v4114_v55  ;;  %v7459_v55 = vld [vmem:[#allocation3 + $0x104] ss:$16 sps:$4 sm:$0xff]  }
 0x48a   : > { %v6652_v57 = vadd.f32 %v3704_v9, %v2361_v25  ;;  %v3706_v3 = vpop.f32.mrb[83].mxu0  ;;  %5523 = vmatpush1.bf16.msra.mxu1 %v4113_v19  ;;  %v3899_v63 = vmax.f32 %v6650_v21, 0.0 }
 0x48b   : > { %v6653_v33 = vadd.f32 %v3706_v3, %v2361_v25  ;;  %v3900_v34 = vmax.f32 %v6651_v5, 0.0 }
 0x48c   : > { %v3901_v54 = vmax.f32 %v6652_v57, 0.0 }
 0x48d   : > { %v3902_v15 = vmax.f32 %v6653_v33, 0.0  ;;  %5236 = vmatmul.mubr.bf16.gmra.mrb[16].mxu1 %v7449_v59  ;;  %v2396_v59 = vpop.permute.xlu0 %2395 }
 0x48e   : > { %v4115_v26 = vpack.c.bf16 %v3901_v54, %v3899_v63  ;;  %5245 = vmatprep.mubr.bf16.mxu1 %v7450_v41  ;;  %v2401_v63 = vpop.permute.xlu1 %2400 }
 0x48f   : > { %v4116_v29 = vpack.c.bf16 %v3902_v15, %v3900_v34  ;;  %v3710_v27 = vpop.f32.mrb[84].mxu0  ;;  %v7461_v15 = vld [vmem:[#allocation3 + $0x100] ss:$16 sps:$4 sm:$0xff]  }
 0x490   : > { %v6654_v12 = vadd.f32 %v3710_v27, %v2366_v42  ;;  %v3712_v58 = vpop.f32.mrb[85].mxu0 }
 0x491   : > { %v6655_v51 = vadd.f32 %v3712_v58, %v2366_v42  ;;  %v3714_v37 = vpop.f32.mrb[86].mxu0  ;;  %5524 = vmatprep.subr.bf16.mxu1 %v4116_v29  ;;  %v7462_v29 = vld [vmem:[#allocation3 + $0x124] ss:$16 sps:$4 sm:$0xff]  }
 0x492   : > { %v6656_v24 = vadd.f32 %v3714_v37, %v2371_v13  ;;  %v3716_v45 = vpop.f32.mrb[87].mxu0  ;;  %5525 = vmatpush1.bf16.msra.mxu1 %v4115_v26  ;;  %v3903_v62 = vmax.f32 %v6654_v12, 0.0 }
 0x493   : > { %v6657_v60 = vadd.f32 %v3716_v45, %v2371_v13  ;;  %v3904_v49 = vmax.f32 %v6655_v51, 0.0 }
 0x494   : > { %v3905_v43 = vmax.f32 %v6656_v24, 0.0 }
 0x495   : > { %v3906_v14 = vmax.f32 %v6657_v60, 0.0  ;;  %5246 = vmatmul.mubr.bf16.gmra.mrb[20].mxu1 %v7452_v36  ;;  %v2406_v36 = vpop.permute.xlu0 %2405 }
 0x496   : > { %v4117_v32 = vpack.c.bf16 %v3905_v43, %v3903_v62  ;;  %5255 = vmatprep.mubr.bf16.mxu1 %v7453_v30  ;;  %v2411_v62 = vpop.permute.xlu1 %2410 }
 0x497   : > { %v4118_v48 = vpack.c.bf16 %v3906_v14, %v3904_v49  ;;  %v3720_v1 = vpop.f32.mrb[88].mxu0  ;;  %v7464_v14 = vld [vmem:[#allocation3 + $0x120] ss:$16 sps:$4 sm:$0xff]  }
 0x498   : > { %v6658_v7 = vadd.f32 %v3720_v1, %v2376_v16  ;;  %v3722_v0 = vpop.f32.mrb[89].mxu0 }
 0x499   : > { %v6659_v35 = vadd.f32 %v3722_v0, %v2376_v16  ;;  %v3724_v40 = vpop.f32.mrb[90].mxu0  ;;  %5526 = vmatprep.subr.bf16.mxu1 %v4118_v48  ;;  %v7465_v48 = vld [vmem:[#allocation3 + $0x144] ss:$16 sps:$4 sm:$0xff]  }
 0x49a   : > { %v6660_v23 = vadd.f32 %v3724_v40, %v2381_v11  ;;  %v3726_v61 = vpop.f32.mrb[91].mxu0  ;;  %5527 = vmatpush1.bf16.msra.mxu1 %v4117_v32  ;;  %v3907_v22 = vmax.f32 %v6658_v7, 0.0 }
 0x49b   : > { %v6661_v50 = vadd.f32 %v3726_v61, %v2381_v11  ;;  %v3908_v39 = vmax.f32 %v6659_v35, 0.0 }
 0x49c   : > { %v3909_v18 = vmax.f32 %v6660_v23, 0.0 }
 0x49d   : > { %v3910_v53 = vmax.f32 %v6661_v50, 0.0  ;;  %5256 = vmatmul.mubr.bf16.gmra.mrb[24].mxu1 %v7455_v6  ;;  %v2416_v6 = vpop.permute.xlu0 %2415 }
 0x49e   : > { %v4119_v8 = vpack.c.bf16 %v3909_v18, %v3907_v22  ;;  %5265 = vmatprep.mubr.bf16.mxu1 %v7456_v28  ;;  %v2421_v22 = vpop.permute.xlu1 %2420 }
 0x49f   : > { %v4120_v38 = vpack.c.bf16 %v3910_v53, %v3908_v39  ;;  %v3730_v20 = vpop.f32.mrb[92].mxu0  ;;  %v7467_v53 = vld [vmem:[#allocation3 + $0x140] ss:$16 sps:$4 sm:$0xff]  }
 0x4a0   : > { %v6662_v31 = vadd.f32 %v3730_v20, %v2386_v2  ;;  %v3732_v10 = vpop.f32.mrb[93].mxu0 }
 0x4a1   : > { %v6663_v44 = vadd.f32 %v3732_v10, %v2386_v2  ;;  %v3734_v47 = vpop.f32.mrb[94].mxu0  ;;  %5528 = vmatprep.subr.bf16.mxu1 %v4120_v38  ;;  %v7468_v38 = vld [vmem:[#allocation3 + $0x164] ss:$16 sps:$4 sm:$0xff]  }
 0x4a2   : > { %v6664_v19 = vadd.f32 %v3734_v47, %v2391_v17  ;;  %v3736_v46 = vpop.f32.mrb[95].mxu0  ;;  %5529 = vmatpush1.bf16.msra.mxu1 %v4119_v8  ;;  %v3911_v21 = vmax.f32 %v6662_v31, 0.0 }
 0x4a3   : > { %v6665_v56 = vadd.f32 %v3736_v46, %v2391_v17  ;;  %v3912_v25 = vmax.f32 %v6663_v44, 0.0 }
 0x4a4   : > { %v3913_v4 = vmax.f32 %v6664_v19, 0.0 }
 0x4a5   : > { %v3914_v5 = vmax.f32 %v6665_v56, 0.0  ;;  %5266 = vmatmul.mubr.bf16.gmra.mrb[28].mxu1 %v7458_v52  ;;  %v2426_v52 = vpop.permute.xlu0 %2425 }
 0x4a6   : > { %v4121_v9 = vpack.c.bf16 %v3913_v4, %v3911_v21  ;;  %5275 = vmatprep.mubr.bf16.mxu1 %v7459_v55  ;;  %v2431_v21 = vpop.permute.xlu1 %2430 }
 0x4a7   : > { %v4122_v57 = vpack.c.bf16 %v3914_v5, %v3912_v25  ;;  %v3740_v3 = vpop.f32.mrb[96].mxu0  ;;  %v7470_v5 = vld [vmem:[#allocation3 + $0x160] ss:$16 sps:$4 sm:$0xff]  }
 0x4a8   : > { %v6666_v41 = vadd.f32 %v3740_v3, %v2396_v59  ;;  %v3742_v33 = vpop.f32.mrb[97].mxu0 }
 0x4a9   : > { %v6667_v54 = vadd.f32 %v3742_v33, %v2396_v59  ;;  %v3744_v34 = vpop.f32.mrb[98].mxu0  ;;  %5530 = vmatprep.subr.bf16.mxu1 %v4122_v57  ;;  %v7471_v57 = vld [vmem:[#allocation3 + $0x184] ss:$16 sps:$4 sm:$0xff]  }
 0x4aa   : > { %v6668_v26 = vadd.f32 %v3744_v34, %v2401_v63  ;;  %v3746_v42 = vpop.f32.mrb[99].mxu0  ;;  %5531 = vmatpush1.bf16.msra.mxu1 %v4121_v9  ;;  %v3915_v12 = vmax.f32 %v6666_v41, 0.0 }
 0x4ab   : > { %v6669_v27 = vadd.f32 %v3746_v42, %v2401_v63  ;;  %v3916_v13 = vmax.f32 %v6667_v54, 0.0 }
 0x4ac   : > { %v3917_v58 = vmax.f32 %v6668_v26, 0.0 }
 0x4ad   : > { %v3918_v51 = vmax.f32 %v6669_v27, 0.0  ;;  %5276 = vmatmul.mubr.bf16.gmra.mrb[32].mxu1 %v7461_v15  ;;  %v2436_v15 = vpop.permute.xlu0 %2435 }
 0x4ae   : > { %v4123_v37 = vpack.c.bf16 %v3917_v58, %v3915_v12  ;;  %5285 = vmatprep.mubr.bf16.mxu1 %v7462_v29  ;;  %v2441_v12 = vpop.permute.xlu1 %2440 }
 0x4af   : > { %v4124_v24 = vpack.c.bf16 %v3918_v51, %v3916_v13  ;;  %v3750_v45 = vpop.f32.mrb[100].mxu0  ;;  %v7473_v51 = vld [vmem:[#allocation3 + $0x180] ss:$16 sps:$4 sm:$0xff]  }
 0x4b0   : > { %v6670_v30 = vadd.f32 %v3750_v45, %v2406_v36  ;;  %v3752_v60 = vpop.f32.mrb[101].mxu0 }
 0x4b1   : > { %v6671_v43 = vadd.f32 %v3752_v60, %v2406_v36  ;;  %v3754_v49 = vpop.f32.mrb[102].mxu0  ;;  %5532 = vmatprep.subr.bf16.mxu1 %v4124_v24  ;;  %v7474_v24 = vld [vmem:[#allocation3 + $0x1a4] ss:$16 sps:$4 sm:$0xff]  }
 0x4b2   : > { %v6672_v32 = vadd.f32 %v3754_v49, %v2411_v62  ;;  %v3756_v16 = vpop.f32.mrb[103].mxu0  ;;  %5533 = vmatpush1.bf16.msra.mxu1 %v4123_v37  ;;  %v3919_v7 = vmax.f32 %v6670_v30, 0.0 }
 0x4b3   : > { %v6673_v1 = vadd.f32 %v3756_v16, %v2411_v62  ;;  %v3920_v11 = vmax.f32 %v6671_v43, 0.0 }
 0x4b4   : > { %v3921_v0 = vmax.f32 %v6672_v32, 0.0 }
 0x4b5   : > { %v3922_v35 = vmax.f32 %v6673_v1, 0.0  ;;  %5286 = vmatmul.mubr.bf16.gmra.mrb[36].mxu1 %v7464_v14  ;;  %v2446_v14 = vpop.permute.xlu0 %2445 }
 0x4b6   : > { %v4125_v40 = vpack.c.bf16 %v3921_v0, %v3919_v7  ;;  %5295 = vmatprep.mubr.bf16.mxu1 %v7465_v48  ;;  %v2451_v7 = vpop.permute.xlu1 %2450 }
 0x4b7   : > { %v4126_v23 = vpack.c.bf16 %v3922_v35, %v3920_v11  ;;  %v3760_v61 = vpop.f32.mrb[104].mxu0  ;;  %v7476_v35 = vld [vmem:[#allocation3 + $0x1a0] ss:$16 sps:$4 sm:$0xff]  }
 0x4b8   : > { %v6674_v28 = vadd.f32 %v3760_v61, %v2416_v6  ;;  %v3762_v50 = vpop.f32.mrb[105].mxu0 }
 0x4b9   : > { %v6675_v18 = vadd.f32 %v3762_v50, %v2416_v6  ;;  %v3764_v39 = vpop.f32.mrb[106].mxu0  ;;  %5534 = vmatprep.subr.bf16.mxu1 %v4126_v23  ;;  %v7477_v23 = vld [vmem:[#allocation3 + $0x1c4] ss:$16 sps:$4 sm:$0xff]  }
 0x4ba   : > { %v6676_v8 = vadd.f32 %v3764_v39, %v2421_v22  ;;  %v3766_v2 = vpop.f32.mrb[107].mxu0  ;;  %5535 = vmatpush1.bf16.msra.mxu1 %v4125_v40  ;;  %v3923_v31 = vmax.f32 %v6674_v28, 0.0 }
 0x4bb   : > { %v6677_v20 = vadd.f32 %v3766_v2, %v2421_v22  ;;  %v3924_v17 = vmax.f32 %v6675_v18, 0.0 }
 0x4bc   : > { %v3925_v10 = vmax.f32 %v6676_v8, 0.0 }
 0x4bd   : > { %v3926_v44 = vmax.f32 %v6677_v20, 0.0  ;;  %5296 = vmatmul.mubr.bf16.gmra.mrb[40].mxu1 %v7467_v53  ;;  %v2456_v53 = vpop.permute.xlu0 %2455 }
 0x4be   : > { %v4127_v47 = vpack.c.bf16 %v3925_v10, %v3923_v31  ;;  %5305 = vmatprep.mubr.bf16.mxu1 %v7468_v38  ;;  %v2461_v31 = vpop.permute.xlu1 %2460 }
 0x4bf   : > { %v4128_v19 = vpack.c.bf16 %v3926_v44, %v3924_v17  ;;  %v3770_v46 = vpop.f32.mrb[108].mxu0  ;;  %v7479_v44 = vld [vmem:[#allocation3 + $0x1c0] ss:$16 sps:$4 sm:$0xff]  }
 0x4c0   : > { %v6678_v55 = vadd.f32 %v3770_v46, %v2426_v52  ;;  %v3772_v56 = vpop.f32.mrb[109].mxu0 }
 0x4c1   : > { %v6679_v4 = vadd.f32 %v3772_v56, %v2426_v52  ;;  %v3774_v25 = vpop.f32.mrb[110].mxu0  ;;  %5536 = vmatprep.subr.bf16.mxu1 %v4128_v19  ;;  %v7480_v19 = vld [vmem:[#allocation3 + $0x1e4] ss:$16 sps:$4 sm:$0xff]  }
 0x4c2   : > { %v6680_v9 = vadd.f32 %v3774_v25, %v2431_v21  ;;  %v3776_v59 = vpop.f32.mrb[111].mxu0  ;;  %5537 = vmatpush1.bf16.msra.mxu1 %v4127_v47  ;;  %v3927_v41 = vmax.f32 %v6678_v55, 0.0 }
 0x4c3   : > { %v6681_v3 = vadd.f32 %v3776_v59, %v2431_v21  ;;  %v3928_v63 = vmax.f32 %v6679_v4, 0.0 }
 0x4c4   : > { %v3929_v33 = vmax.f32 %v6680_v9, 0.0 }
 0x4c5   : > { %v3930_v54 = vmax.f32 %v6681_v3, 0.0  ;;  %5306 = vmatmul.mubr.bf16.gmra.mrb[44].mxu1 %v7470_v5  ;;  %v2466_v5 = vpop.permute.xlu0 %2465 }
 0x4c6   : > { %v4129_v34 = vpack.c.bf16 %v3929_v33, %v3927_v41  ;;  %5315 = vmatprep.mubr.bf16.mxu1 %v7471_v57  ;;  %v2471_v41 = vpop.permute.xlu1 %2470 }
 0x4c7   : > { %v4130_v26 = vpack.c.bf16 %v3930_v54, %v3928_v63  ;;  %v3780_v42 = vpop.f32.mrb[112].mxu0  ;;  %v7482_v54 = vld [vmem:[#allocation3 + $0x1e0] ss:$16 sps:$4 sm:$0xff]  }
 0x4c8   : > { %v6682_v29 = vadd.f32 %v3780_v42, %v2436_v15  ;;  %v3782_v27 = vpop.f32.mrb[113].mxu0 }
 0x4c9   : > { %v6683_v58 = vadd.f32 %v3782_v27, %v2436_v15  ;;  %v3784_v13 = vpop.f32.mrb[114].mxu0  ;;  %5538 = vmatprep.subr.bf16.mxu1 %v4130_v26  ;;  %v7483_v26 = vld [vmem:[#allocation3 + $0x204] ss:$16 sps:$4 sm:$0xff]  }
 0x4ca   : > { %v6684_v37 = vadd.f32 %v3784_v13, %v2441_v12  ;;  %v3786_v36 = vpop.f32.mrb[115].mxu0  ;;  %5539 = vmatpush1.bf16.msra.mxu1 %v4129_v34  ;;  %v3931_v30 = vmax.f32 %v6682_v29, 0.0 }
 0x4cb   : > { %v6685_v45 = vadd.f32 %v3786_v36, %v2441_v12  ;;  %v3932_v62 = vmax.f32 %v6683_v58, 0.0  ;;  %v7486_v36 = vld [vmem:[#allocation3 + $0x224] ss:$16 sps:$4 sm:$0xff]  }
 0x4cc   : > { %v3933_v60 = vmax.f32 %v6684_v37, 0.0  ;;  %v7485_v37 = vld [vmem:[#allocation3 + $0x200] ss:$16 sps:$4 sm:$0xff]  }
 0x4cd   : > { %v3934_v43 = vmax.f32 %v6685_v45, 0.0  ;;  %5316 = vmatmul.mubr.bf16.gmra.mrb[48].mxu1 %v7473_v51  ;;  %v7489_v45 = vld [vmem:[#allocation3 + $0x244] ss:$16 sps:$4 sm:$0xff]  }
 0x4ce   : > { %v4131_v49 = vpack.c.bf16 %v3933_v60, %v3931_v30  ;;  %5325 = vmatprep.mubr.bf16.mxu1 %v7474_v24  ;;  %v7488_v24 = vld [vmem:[#allocation3 + $0x220] ss:$16 sps:$4 sm:$0xff]   ;;  %v7492_v60 = vld [vmem:[#allocation3 + $0x264] ss:$16 sps:$4 sm:$0xff]  }
 0x4cf   : > { %v4132_v32 = vpack.c.bf16 %v3934_v43, %v3932_v62  ;;  %v3790_v16 = vpop.f32.mrb[116].mxu0  ;;  %v7491_v30 = vld [vmem:[#allocation3 + $0x240] ss:$16 sps:$4 sm:$0xff]   ;;  %v7495_v43 = vld [vmem:[#allocation3 + $0x284] ss:$16 sps:$4 sm:$0xff]  }
 0x4d0   : > { %v6686_v48 = vadd.f32 %v3790_v16, %v2446_v14  ;;  %v3792_v1 = vpop.f32.mrb[117].mxu0  ;;  %v7494_v62 = vld [vmem:[#allocation3 + $0x260] ss:$16 sps:$4 sm:$0xff]   ;;  %v7501_v16 = vld [vmem:[#allocation3 + $0x2c4] ss:$16 sps:$4 sm:$0xff]  }
 0x4d1   : > { %v6687_v0 = vadd.f32 %v3792_v1, %v2446_v14  ;;  %v3794_v11 = vpop.f32.mrb[118].mxu0  ;;  %5540 = vmatprep.subr.bf16.mxu1 %v4132_v32  ;;  %v7498_v14 = vld [vmem:[#allocation3 + $0x2a4] ss:$16 sps:$4 sm:$0xff]   ;;  %v7500_v32 = vld [vmem:[#allocation3 + $0x2a0] ss:$16 sps:$4 sm:$0xff]  }
 0x4d2   : > { %v6688_v40 = vadd.f32 %v3794_v11, %v2451_v7  ;;  %v3796_v6 = vpop.f32.mrb[119].mxu0  ;;  %5541 = vmatpush1.bf16.msra.mxu1 %v4131_v49  ;;  %v3935_v28 = vmax.f32 %v6686_v48, 0.0  ;;  %v7497_v49 = vld [vmem:[#allocation3 + $0x280] ss:$16 sps:$4 sm:$0xff]   ;;  %v7504_v1 = vld [vmem:[#allocation3 + $0x2e4] ss:$16 sps:$4 sm:$0xff]  }
 0x4d3   : > { %v6689_v61 = vadd.f32 %v3796_v6, %v2451_v7  ;;  %v3936_v22 = vmax.f32 %v6687_v0, 0.0  ;;  %v7503_v48 = vld [vmem:[#allocation3 + $0x2c0] ss:$16 sps:$4 sm:$0xff]   ;;  %v7507_v0 = vld [vmem:[#allocation3 + $0x304] ss:$16 sps:$4 sm:$0xff]  }
 0x4d4   : > { %v3937_v50 = vmax.f32 %v6688_v40, 0.0  ;;  %v7506_v7 = vld [vmem:[#allocation3 + $0x2e0] ss:$16 sps:$4 sm:$0xff]   ;;  %v7513_v6 = vld [vmem:[#allocation3 + $0x344] ss:$16 sps:$4 sm:$0xff]  }
 0x4d5   : > { %v3938_v18 = vmax.f32 %v6689_v61, 0.0  ;;  %5326 = vmatmul.mubr.bf16.gmra.mrb[52].mxu1 %v7476_v35  ;;  %v7509_v11 = vld [vmem:[#allocation3 + $0x300] ss:$16 sps:$4 sm:$0xff]   ;;  %v7510_v35 = vld [vmem:[#allocation3 + $0x324] ss:$16 sps:$4 sm:$0xff]  }
 0x4d6   : > { %v4133_v39 = vpack.c.bf16 %v3937_v50, %v3935_v28  ;;  %5335 = vmatprep.mubr.bf16.mxu1 %v7477_v23  ;;  %v7512_v40 = vld [vmem:[#allocation3 + $0x320] ss:$16 sps:$4 sm:$0xff]   ;;  %v7516_v61 = vld [vmem:[#allocation3 + $0x364] ss:$16 sps:$4 sm:$0xff]  }
 0x4d7   : > { %v4134_v8 = vpack.c.bf16 %v3938_v18, %v3936_v22  ;;  %v3800_v2 = vpop.f32.mrb[120].mxu0  ;;  %v7515_v23 = vld [vmem:[#allocation3 + $0x340] ss:$16 sps:$4 sm:$0xff]   ;;  %v7519_v50 = vld [vmem:[#allocation3 + $0x384] ss:$16 sps:$4 sm:$0xff]  }
 0x4d8   : > { %v6690_v38 = vadd.f32 %v3800_v2, %v2456_v53  ;;  %v3802_v20 = vpop.f32.mrb[121].mxu0  ;;  %v7518_v28 = vld [vmem:[#allocation3 + $0x360] ss:$16 sps:$4 sm:$0xff]   ;;  %v7522_v18 = vld [vmem:[#allocation3 + $0x3a4] ss:$16 sps:$4 sm:$0xff]  }
 0x4d9   : > { %v6691_v10 = vadd.f32 %v3802_v20, %v2456_v53  ;;  %v3804_v17 = vpop.f32.mrb[122].mxu0  ;;  %5542 = vmatprep.subr.bf16.mxu1 %v4134_v8  ;;  %v7521_v22 = vld [vmem:[#allocation3 + $0x380] ss:$16 sps:$4 sm:$0xff]   ;;  %v7525_v53 = vld [vmem:[#allocation3 + $0x3c4] ss:$16 sps:$4 sm:$0xff]  }
 0x4da   : > { %v6692_v47 = vadd.f32 %v3804_v17, %v2461_v31  ;;  %v3806_v52 = vpop.f32.mrb[123].mxu0  ;;  %5543 = vmatpush1.bf16.msra.mxu1 %v4133_v39  ;;  %v3939_v55 = vmax.f32 %v6690_v38, 0.0  ;;  %v7524_v39 = vld [vmem:[#allocation3 + $0x3a0] ss:$16 sps:$4 sm:$0xff]   ;;  %v7528_v2 = vld [vmem:[#allocation3 + $0x3e4] ss:$16 sps:$4 sm:$0xff]  }
 0x4db   : > { %v6693_v46 = vadd.f32 %v3806_v52, %v2461_v31  ;;  %v3940_v21 = vmax.f32 %v6691_v10, 0.0  ;;  %v7527_v8 = vld [vmem:[#allocation3 + $0x3c0] ss:$16 sps:$4 sm:$0xff]   ;;  %v7533_v20 = vld [vmem:[#allocation3 + $0xc] ss:$16 sps:$4 sm:$0xff]  }
 0x4dc   : > { %v3941_v56 = vmax.f32 %v6692_v47, 0.0  ;;  %v7530_v38 = vld [vmem:[#allocation3 + $0x3e0] ss:$16 sps:$4 sm:$0xff]   ;;  %v7531_v31 = vld [vmem:[#allocation3 + $0x8] ss:$16 sps:$4 sm:$0xff]  }
 0x4dd   : > { %v3942_v4 = vmax.f32 %v6693_v46, 0.0  ;;  %5336 = vmatmul.mubr.bf16.gmra.mrb[56].mxu1 %v7479_v44  ;;  %v7534_v10 = vld [vmem:[#allocation3 + $0x2c] ss:$16 sps:$4 sm:$0xff]   ;;  %v7536_v17 = vld [vmem:[#allocation3 + $0x28] ss:$16 sps:$4 sm:$0xff]  }
 0x4de   : > { %v4135_v25 = vpack.c.bf16 %v3941_v56, %v3939_v55  ;;  %5345 = vmatprep.mubr.bf16.mxu1 %v7480_v19  ;;  %v7537_v44 = vld [vmem:[#allocation3 + $0x4c] ss:$16 sps:$4 sm:$0xff]   ;;  %v7539_v47 = vld [vmem:[#allocation3 + $0x48] ss:$16 sps:$4 sm:$0xff]  }
 0x4df   : > { %v4136_v9 = vpack.c.bf16 %v3942_v4, %v3940_v21  ;;  %v3810_v59 = vpop.f32.mrb[124].mxu0  ;;  %v7540_v52 = vld [vmem:[#allocation3 + $0x6c] ss:$16 sps:$4 sm:$0xff]   ;;  %v7542_v19 = vld [vmem:[#allocation3 + $0x68] ss:$16 sps:$4 sm:$0xff]  }
 0x4e0   : > { %v6694_v57 = vadd.f32 %v3810_v59, %v2466_v5  ;;  %v3812_v3 = vpop.f32.mrb[125].mxu0  ;;  %v7543_v46 = vld [vmem:[#allocation3 + $0x8c] ss:$16 sps:$4 sm:$0xff]   ;;  %v7545_v55 = vld [vmem:[#allocation3 + $0x88] ss:$16 sps:$4 sm:$0xff]  }
 0x4e1   : > { %v6695_v33 = vadd.f32 %v3812_v3, %v2466_v5  ;;  %v3814_v63 = vpop.f32.mrb[126].mxu0  ;;  %5544 = vmatprep.subr.bf16.mxu1 %v4136_v9  ;;  %v7546_v56 = vld [vmem:[#allocation3 + $0xac] ss:$16 sps:$4 sm:$0xff]   ;;  %v7548_v21 = vld [vmem:[#allocation3 + $0xa8] ss:$16 sps:$4 sm:$0xff]  }
 0x4e2   : > { %v6696_v34 = vadd.f32 %v3814_v63, %v2471_v41  ;;  %v3816_v15 = vpop.f32.mrb[127].mxu0  ;;  %5545 = vmatpush1.bf16.msra.mxu1 %v4135_v25  ;;  %v3943_v29 = vmax.f32 %v6694_v57, 0.0  ;;  %v7549_v4 = vld [vmem:[#allocation3 + $0xcc] ss:$16 sps:$4 sm:$0xff]   ;;  %v7551_v25 = vld [vmem:[#allocation3 + $0xc8] ss:$16 sps:$4 sm:$0xff]  }
 0x4e3   : > { %v6697_v42 = vadd.f32 %v3816_v15, %v2471_v41  ;;  %v3944_v12 = vmax.f32 %v6695_v33, 0.0  ;;  %v7552_v5 = vld [vmem:[#allocation3 + $0xec] ss:$16 sps:$4 sm:$0xff]   ;;  %v7554_v9 = vld [vmem:[#allocation3 + $0xe8] ss:$16 sps:$4 sm:$0xff]  }
 0x4e4   : > { %v3945_v27 = vmax.f32 %v6696_v34, 0.0  ;;  %v7555_v59 = vld [vmem:[#allocation3 + $0x10c] ss:$16 sps:$4 sm:$0xff]   ;;  %v7557_v57 = vld [vmem:[#allocation3 + $0x108] ss:$16 sps:$4 sm:$0xff]  }
 0x4e5   : > { %v3946_v58 = vmax.f32 %v6697_v42, 0.0  ;;  %5346 = vmatmul.mubr.bf16.gmra.mrb[60].mxu1 %v7482_v54  ;;  %v7558_v3 = vld [vmem:[#allocation3 + $0x12c] ss:$16 sps:$4 sm:$0xff]   ;;  %v7560_v41 = vld [vmem:[#allocation3 + $0x128] ss:$16 sps:$4 sm:$0xff]  }
 0x4e6   : > { %v4137_v13 = vpack.c.bf16 %v3945_v27, %v3943_v29  ;;  %5355 = vmatprep.mubr.bf16.mxu1 %v7483_v26  ;;  %v7561_v33 = vld [vmem:[#allocation3 + $0x14c] ss:$16 sps:$4 sm:$0xff]   ;;  %v7563_v63 = vld [vmem:[#allocation3 + $0x148] ss:$16 sps:$4 sm:$0xff]  }
 0x4e7   : > { %v4138_v51 = vpack.c.bf16 %v3946_v58, %v3944_v12  ;;  %v7564_v54 = vld [vmem:[#allocation3 + $0x16c] ss:$16 sps:$4 sm:$0xff]   ;;  %v7566_v34 = vld [vmem:[#allocation3 + $0x168] ss:$16 sps:$4 sm:$0xff]  }
 0x4e8   : > { %v7567_v15 = vld [vmem:[#allocation3 + $0x18c] ss:$16 sps:$4 sm:$0xff]   ;;  %v7569_v26 = vld [vmem:[#allocation3 + $0x188] ss:$16 sps:$4 sm:$0xff]  }
 0x4e9   : > { %5546 = vmatprep.subr.bf16.mxu1 %v4138_v51  ;;  %v7570_v42 = vld [vmem:[#allocation3 + $0x1ac] ss:$16 sps:$4 sm:$0xff]   ;;  %v7572_v29 = vld [vmem:[#allocation3 + $0x1a8] ss:$16 sps:$4 sm:$0xff]  }
 0x4ea   : > { %5547 = vmatpush1.bf16.msra.mxu1 %v4137_v13  ;;  %v7573_v27 = vld [vmem:[#allocation3 + $0x1cc] ss:$16 sps:$4 sm:$0xff]   ;;  %v7575_v12 = vld [vmem:[#allocation3 + $0x1c8] ss:$16 sps:$4 sm:$0xff]  }
 0x4eb   : > { %v7576_v58 = vld [vmem:[#allocation3 + $0x1ec] ss:$16 sps:$4 sm:$0xff]   ;;  %v7578_v13 = vld [vmem:[#allocation3 + $0x1e8] ss:$16 sps:$4 sm:$0xff]  }
 0x4ec   : > { %v7579_v51 = vld [vmem:[#allocation3 + $0x20c] ss:$16 sps:$4 sm:$0xff]  }
 0x4ed   : > { %5356 = vmatmul.mubr.bf16.gmra.mrb[64].mxu1 %v7485_v37  ;;  %v7581_v37 = vld [vmem:[#allocation3 + $0x208] ss:$16 sps:$4 sm:$0xff]  }
 0x4ee   : > { %5365 = vmatprep.mubr.bf16.mxu1 %v7486_v36  ;;  %v7582_v36 = vld [vmem:[#allocation3 + $0x22c] ss:$16 sps:$4 sm:$0xff]  }
 0x4f5   : > { %5366 = vmatmul.mubr.bf16.gmra.mrb[68].mxu1 %v7488_v24  ;;  %v7584_v24 = vld [vmem:[#allocation3 + $0x228] ss:$16 sps:$4 sm:$0xff]  }
 0x4f6   : > { %5375 = vmatprep.mubr.bf16.mxu1 %v7489_v45  ;;  %v7585_v45 = vld [vmem:[#allocation3 + $0x24c] ss:$16 sps:$4 sm:$0xff]  }
 0x4fd   : > { %5376 = vmatmul.mubr.bf16.gmra.mrb[72].mxu1 %v7491_v30  ;;  %v7587_v30 = vld [vmem:[#allocation3 + $0x248] ss:$16 sps:$4 sm:$0xff]  }
 0x4fe   : > { %5385 = vmatprep.mubr.bf16.mxu1 %v7492_v60  ;;  %v7588_v60 = vld [vmem:[#allocation3 + $0x26c] ss:$16 sps:$4 sm:$0xff]  }
 0x505   : > { %5386 = vmatmul.mubr.bf16.gmra.mrb[76].mxu1 %v7494_v62  ;;  %v7590_v62 = vld [vmem:[#allocation3 + $0x268] ss:$16 sps:$4 sm:$0xff]  }
 0x506   : > { %5395 = vmatprep.mubr.bf16.mxu1 %v7495_v43  ;;  %v7591_v43 = vld [vmem:[#allocation3 + $0x28c] ss:$16 sps:$4 sm:$0xff]  }
 0x50d   : > { %5396 = vmatmul.mubr.bf16.gmra.mrb[80].mxu1 %v7497_v49  ;;  %v4206_v49 = vpop.permute.xlu0 %4205 }
 0x50e   : > { %5405 = vmatprep.mubr.bf16.mxu1 %v7498_v14  ;;  %v4211_v14 = vpop.permute.xlu1 %4210 }
 0x515   : > { %5406 = vmatmul.mubr.bf16.gmra.mrb[84].mxu1 %v7500_v32  ;;  %v7593_v32 = vld [vmem:[#allocation3 + $0x288] ss:$16 sps:$4 sm:$0xff]  }
 0x516   : > { %5415 = vmatprep.mubr.bf16.mxu1 %v7501_v16  ;;  %v9906_v16 = vpop.permute.xlu0 %4365 }
 0x51d   : > { %5416 = vmatmul.mubr.bf16.gmra.mrb[88].mxu1 %v7503_v48  ;;  %v7594_v48 = vld [vmem:[#allocation3 + $0x2ac] ss:$16 sps:$4 sm:$0xff]  }
 0x51e   : > { %5425 = vmatprep.mubr.bf16.mxu1 %v7504_v1  ;;  %v9908_v1 = vpop.permute.xlu1 %4370 }
 0x525   : > { %5426 = vmatmul.mubr.bf16.gmra.mrb[92].mxu1 %v7506_v7  ;;  %v9910_v7 = vpop.permute.xlu0 %4215 }
 0x526   : > { %5435 = vmatprep.mubr.bf16.mxu1 %v7507_v0  ;;  %v7596_v0 = vld [vmem:[#allocation3 + $0x2a8] ss:$16 sps:$4 sm:$0xff]  }
 0x52d   : > { %5436 = vmatmul.mubr.bf16.gmra.mrb[96].mxu1 %v7509_v11  ;;  %v9912_v11 = vpop.permute.xlu1 %4220 }
 0x52e   : > { %5445 = vmatprep.mubr.bf16.mxu1 %v7510_v35  ;;  %v7597_v35 = vld [vmem:[#allocation3 + $0x2cc] ss:$16 sps:$4 sm:$0xff]  }
 0x535   : > { %5446 = vmatmul.mubr.bf16.gmra.mrb[100].mxu1 %v7512_v40  ;;  %v9914_v40 = vpop.permute.xlu0 %4375 }
 0x536   : > { %5455 = vmatprep.mubr.bf16.mxu1 %v7513_v6  ;;  %v9916_v6 = vpop.permute.xlu1 %4380 }
 0x53d   : > { %5456 = vmatmul.mubr.bf16.gmra.mrb[104].mxu1 %v7515_v23  ;;  %v7599_v23 = vld [vmem:[#allocation3 + $0x2c8] ss:$16 sps:$4 sm:$0xff]  }
 0x53e   : > { %5465 = vmatprep.mubr.bf16.mxu1 %v7516_v61  ;;  %v7600_v61 = vld [vmem:[#allocation3 + $0x2ec] ss:$16 sps:$4 sm:$0xff]  }
 0x545   : > { %5466 = vmatmul.mubr.bf16.gmra.mrb[108].mxu1 %v7518_v28  ;;  %v9918_v28 = vpop.permute.xlu0 %4225 }
 0x546   : > { %5475 = vmatprep.mubr.bf16.mxu1 %v7519_v50  ;;  %v9920_v50 = vpop.permute.xlu1 %4230 }
 0x54d   : > { %5476 = vmatmul.mubr.bf16.gmra.mrb[112].mxu1 %v7521_v22  ;;  %v7602_v22 = vld [vmem:[#allocation3 + $0x2e8] ss:$16 sps:$4 sm:$0xff]  }
 0x54e   : > { %5485 = vmatprep.mubr.bf16.mxu1 %v7522_v18  ;;  %v9922_v18 = vpop.permute.xlu0 %4385 }
 0x555   : > { %5486 = vmatmul.mubr.bf16.gmra.mrb[116].mxu1 %v7524_v39  ;;  %v7603_v39 = vld [vmem:[#allocation3 + $0x30c] ss:$16 sps:$4 sm:$0xff]  }
 0x556   : > { %5495 = vmatprep.mubr.bf16.mxu1 %v7525_v53  ;;  %v9924_v53 = vpop.permute.xlu1 %4390 }
 0x55d   : > { %5496 = vmatmul.mubr.bf16.gmra.mrb[120].mxu1 %v7527_v8  ;;  %v9926_v8 = vpop.permute.xlu0 %4235 }
 0x55e   : > { %5505 = vmatprep.mubr.bf16.mxu1 %v7528_v2  ;;  %v7605_v2 = vld [vmem:[#allocation3 + $0x308] ss:$16 sps:$4 sm:$0xff]  }
 0x565   : > { %5506 = vmatmul.mubr.bf16.gmra.mrb[124].mxu1 %v7530_v38  ;;  %v9928_v38 = vpop.permute.xlu1 %4240 }
 0x566   : > { %5548 = vmatprep.mubr.bf16.mxu1 %v7533_v20  ;;  %v7606_v20 = vld [vmem:[#allocation3 + $0x32c] ss:$16 sps:$4 sm:$0xff]  }
 0x56d   : > { %5549 = vmatmul.mubr.bf16.vlgmr.msra.gmra.mrb[0].mxu1 %v7531_v31  ;;  %v9930_v31 = vpop.permute.xlu0 %4395 }
 0x56e   : > { %5558 = vmatprep.mubr.bf16.mxu1 %v7534_v10  ;;  %v9932_v10 = vpop.permute.xlu1 %4400 }
 0x575   : > { %5559 = vmatmul.mubr.bf16.gmra.mrb[4].mxu1 %v7536_v17  ;;  %v7608_v17 = vld [vmem:[#allocation3 + $0x328] ss:$16 sps:$4 sm:$0xff]  }
 0x576   : > { %5568 = vmatprep.mubr.bf16.mxu1 %v7537_v44  ;;  %v7609_v44 = vld [vmem:[#allocation3 + $0x34c] ss:$16 sps:$4 sm:$0xff]  }
 0x57d   : > { %5569 = vmatmul.mubr.bf16.gmra.mrb[8].mxu1 %v7539_v47  ;;  %v9934_v47 = vpop.permute.xlu0 %4245 }
 0x57e   : > { %5578 = vmatprep.mubr.bf16.mxu1 %v7540_v52  ;;  %v9936_v52 = vpop.permute.xlu1 %4250 }
 0x585   : > { %5579 = vmatmul.mubr.bf16.gmra.mrb[12].mxu1 %v7542_v19  ;;  %v7611_v19 = vld [vmem:[#allocation3 + $0x348] ss:$16 sps:$4 sm:$0xff]  }
 0x586   : > { %5588 = vmatprep.mubr.bf16.mxu1 %v7543_v46  ;;  %v9938_v46 = vpop.permute.xlu0 %4405 }
 0x58d   : > { %5589 = vmatmul.mubr.bf16.gmra.mrb[16].mxu1 %v7545_v55  ;;  %v7612_v55 = vld [vmem:[#allocation3 + $0x36c] ss:$16 sps:$4 sm:$0xff]  }
 0x58e   : > { %5598 = vmatprep.mubr.bf16.mxu1 %v7546_v56  ;;  %v9940_v56 = vpop.permute.xlu1 %4410 }
 0x595   : > { %5599 = vmatmul.mubr.bf16.gmra.mrb[20].mxu1 %v7548_v21  ;;  %v9942_v21 = vpop.permute.xlu0 %4255 }
 0x596   : > { %5608 = vmatprep.mubr.bf16.mxu1 %v7549_v4 }
 0x59d   : > { %5609 = vmatmul.mubr.bf16.gmra.mrb[24].mxu1 %v7551_v25 }
 0x59e   : > { %5618 = vmatprep.mubr.bf16.mxu1 %v7552_v5 }
 0x5a5   : > { %5619 = vmatmul.mubr.bf16.gmra.mrb[28].mxu1 %v7554_v9  ;;  %v7614_v9 = vld [vmem:[#allocation3 + $0x368] ss:$16 sps:$4 sm:$0xff]  }
 0x5a6   : > { %5628 = vmatprep.mubr.bf16.mxu1 %v7555_v59  ;;  %v9944_v59 = vpop.permute.xlu1 %4260 }
 0x5ad   : > { %5629 = vmatmul.mubr.bf16.gmra.mrb[32].mxu1 %v7557_v57 }
 0x5ae   : > { %5638 = vmatprep.mubr.bf16.mxu1 %v7558_v3 }
 0x5b5   : > { %5639 = vmatmul.mubr.bf16.gmra.mrb[36].mxu1 %v7560_v41  ;;  %v7615_v41 = vld [vmem:[#allocation3 + $0x38c] ss:$16 sps:$4 sm:$0xff]  }
 0x5b6   : > { %5648 = vmatprep.mubr.bf16.mxu1 %v7561_v33 }
 0x5bd   : > { %5649 = vmatmul.mubr.bf16.gmra.mrb[40].mxu1 %v7563_v63 }
 0x5be   : > { %5658 = vmatprep.mubr.bf16.mxu1 %v7564_v54 }
 0x5c5   : > { %5659 = vmatmul.mubr.bf16.gmra.mrb[44].mxu1 %v7566_v34 }
 0x5c6   : > { %5668 = vmatprep.mubr.bf16.mxu1 %v7567_v15 }
 0x5cd   : > { %5669 = vmatmul.mubr.bf16.gmra.mrb[48].mxu1 %v7569_v26  ;;  %v9946_v26 = vpop.permute.xlu0 %4415 }
 0x5ce   : > { %5678 = vmatprep.mubr.bf16.mxu1 %v7570_v42 }
 0x5d5   : > { %5679 = vmatmul.mubr.bf16.gmra.mrb[52].mxu1 %v7572_v29 }
 0x5d6   : > { %5688 = vmatprep.mubr.bf16.mxu1 %v7573_v27 }
 0x5dd   : > { %5689 = vmatmul.mubr.bf16.gmra.mrb[56].mxu1 %v7575_v12  ;;  %v9948_v12 = vpop.permute.xlu1 %4420 }
 0x5de   : > { %5698 = vmatprep.mubr.bf16.mxu1 %v7576_v58 }
 0x5e5   : > { %5699 = vmatmul.mubr.bf16.gmra.mrb[60].mxu1 %v7578_v13 }
 0x5e6   : > { %5708 = vmatprep.mubr.bf16.mxu1 %v7579_v51 }
 0x5ed   : > { %5709 = vmatmul.mubr.bf16.gmra.mrb[64].mxu1 %v7581_v37 }
 0x5ee   : > { %5718 = vmatprep.mubr.bf16.mxu1 %v7582_v36  ;;  %v7617_v36 = vld [vmem:[#allocation3 + $0x388] ss:$16 sps:$4 sm:$0xff]  }
 0x5f5   : > { %5719 = vmatmul.mubr.bf16.gmra.mrb[68].mxu1 %v7584_v24 }
 0x5f6   : > { %5728 = vmatprep.mubr.bf16.mxu1 %v7585_v45 }
 0x5fd   : > { %5729 = vmatmul.mubr.bf16.gmra.mrb[72].mxu1 %v7587_v30  ;;  %v7618_v30 = vld [vmem:[#allocation3 + $0x3ac] ss:$16 sps:$4 sm:$0xff]  }
 0x5fe   : > { %5738 = vmatprep.mubr.bf16.mxu1 %v7588_v60 }
 0x605   : > { %5739 = vmatmul.mubr.bf16.gmra.mrb[76].mxu1 %v7590_v62 }
 0x606   : > { %5748 = vmatprep.mubr.bf16.mxu1 %v7591_v43  ;;  %v9953_v43 = vpop.permute.xlu0 %4265 }
 0x60d   : > { %5749 = vmatmul.mubr.bf16.gmra.mrb[80].mxu1 %v7593_v32 }
 0x60e   : > { %5758 = vmatprep.mubr.bf16.mxu1 %v7594_v48  ;;  %v9956_v48 = vpop.permute.xlu1 %4270 }
 0x615   : > { %5759 = vmatmul.mubr.bf16.gmra.mrb[84].mxu1 %v7596_v0 }
 0x616   : > { %5768 = vmatprep.mubr.bf16.mxu1 %v7597_v35 }
 0x61d   : > { %5769 = vmatmul.mubr.bf16.gmra.mrb[88].mxu1 %v7599_v23 }
 0x61e   : > { %5778 = vmatprep.mubr.bf16.mxu1 %v7600_v61 }
 0x625   : > { %5779 = vmatmul.mubr.bf16.gmra.mrb[92].mxu1 %v7602_v22 }
 0x626   : > { %5788 = vmatprep.mubr.bf16.mxu1 %v7603_v39 }
 0x62d   : > { %5789 = vmatmul.mubr.bf16.gmra.mrb[96].mxu1 %v7605_v2  ;;  %v7620_v2 = vld [vmem:[#allocation3 + $0x3a8] ss:$16 sps:$4 sm:$0xff]  }
 0x62e   : > { %5798 = vmatprep.mubr.bf16.mxu1 %v7606_v20  ;;  %v9959_v20 = vpop.permute.xlu0 %4425 }
 0x635   : > { %5799 = vmatmul.mubr.bf16.gmra.mrb[100].mxu1 %v7608_v17 }
 0x636   : > { %5808 = vmatprep.mubr.bf16.mxu1 %v7609_v44  ;;  %v7621_v44 = vld [vmem:[#allocation3 + $0x3cc] ss:$16 sps:$4 sm:$0xff]  }
 0x63d   : > { %5809 = vmatmul.mubr.bf16.gmra.mrb[104].mxu1 %v7611_v19 }
 0x63e   : > { %5818 = vmatprep.mubr.bf16.mxu1 %v7612_v55 }
 0x640   : > { %v5550_v4 = vpop.f32.mrb[0].mxu1 }
 0x641   : > { %v6698_v25 = vadd.f32 %v5550_v4, %v4206_v49  ;;  %v5552_v5 = vpop.f32.mrb[1].mxu1  ;;  %v9963_v4 = vpop.permute.xlu1 %4430 }
 0x642   : > { %v6699_v57 = vadd.f32 %v5552_v5, %v4206_v49  ;;  %v5554_v3 = vpop.f32.mrb[2].mxu1 }
 0x643   : > { %v6700_v33 = vadd.f32 %v5554_v3, %v4211_v14  ;;  %v5556_v63 = vpop.f32.mrb[3].mxu1  ;;  %v5869_v34 = vmax.f32 %v6698_v25, 0.0 }
 0x644   : > { %v6701_v54 = vadd.f32 %v5556_v63, %v4211_v14  ;;  %v5870_v42 = vmax.f32 %v6699_v57, 0.0 }
 0x645   : > { %v5871_v15 = vmax.f32 %v6700_v33, 0.0  ;;  %5819 = vmatmul.mubr.bf16.gmra.mrb[108].mxu1 %v7614_v9  ;;  %v9966_v33 = vpop.permute.xlu0 %4275 }
 0x646   : > { %v5872_v29 = vmax.f32 %v6701_v54, 0.0  ;;  %5828 = vmatprep.mubr.bf16.mxu1 %v7615_v41 }
 0x647   : > { %v5998_v27 = vpack.c.bf16 %v5871_v15, %v5869_v34  ;;  %v7623_v15 = vld [vmem:[#allocation3 + $0x3c8] ss:$16 sps:$4 sm:$0xff]  }
 0x648   : > { %v5999_v58 = vpack.c.bf16 %v5872_v29, %v5870_v42  ;;  %v5560_v13 = vpop.f32.mrb[4].mxu1  ;;  %v9969_v42 = vpop.permute.xlu1 %4280 }
 0x649   : > { %v6702_v51 = vadd.f32 %v5560_v13, %v9910_v7  ;;  %v5562_v37 = vpop.f32.mrb[5].mxu1 }
 0x64a   : > { %v6703_v24 = vadd.f32 %v5562_v37, %v9910_v7  ;;  %v5564_v45 = vpop.f32.mrb[6].mxu1  ;;  %6093 = vmatprep.subr.bf16.mxu1 %v5999_v58 }
 0x64b   : > { %v6704_v60 = vadd.f32 %v5564_v45, %v9912_v11  ;;  %v5566_v62 = vpop.f32.mrb[7].mxu1  ;;  %6094 = vmatpush1.bf16.msra.mxu1 %v5998_v27  ;;  %v5873_v14 = vmax.f32 %v6702_v51, 0.0  ;;  %v7624_v27 = vld [vmem:[#allocation3 + $0x3ec] ss:$16 sps:$4 sm:$0xff]  }
 0x64c   : > { %v6705_v49 = vadd.f32 %v5566_v62, %v9912_v11  ;;  %v5874_v0 = vmax.f32 %v6703_v24, 0.0  ;;  %v9974_v24 = vpop.permute.xlu0 %4435  ;;  %v9976_v62 = vpop.permute.xlu1 %4440 }
 0x64d   : > { %v5875_v32 = vmax.f32 %v6704_v60, 0.0  ;;  %5829 = vmatmul.mubr.bf16.gmra.mrb[112].mxu1 %v7617_v36 }
 0x64e   : > { %v5876_v35 = vmax.f32 %v6705_v49, 0.0  ;;  %5838 = vmatprep.mubr.bf16.mxu1 %v7618_v30 }
 0x64f   : > { %v6000_v7 = vpack.c.bf16 %v5875_v32, %v5873_v14 }
 0x650   : > { %v6001_v23 = vpack.c.bf16 %v5876_v35, %v5874_v0  ;;  %v5570_v61 = vpop.f32.mrb[8].mxu1  ;;  %v7626_v0 = vld [vmem:[#allocation3 + $0x3e8] ss:$16 sps:$4 sm:$0xff]  }
 0x651   : > { %v6706_v22 = vadd.f32 %v5570_v61, %v9918_v28  ;;  %v5572_v39 = vpop.f32.mrb[9].mxu1  ;;  %v9981_v61 = vpop.permute.xlu0 %4285 }
 0x652   : > { %v6707_v17 = vadd.f32 %v5572_v39, %v9918_v28  ;;  %v5574_v11 = vpop.f32.mrb[10].mxu1  ;;  %6095 = vmatprep.subr.bf16.mxu1 %v6001_v23 }
 0x653   : > { %v6708_v19 = vadd.f32 %v5574_v11, %v9920_v50  ;;  %v5576_v55 = vpop.f32.mrb[11].mxu1  ;;  %6096 = vmatpush1.bf16.msra.mxu1 %v6000_v7  ;;  %v5877_v5 = vmax.f32 %v6706_v22, 0.0 }
 0x654   : > { %v6709_v25 = vadd.f32 %v5576_v55, %v9920_v50  ;;  %v5878_v57 = vmax.f32 %v6707_v17, 0.0  ;;  %v9984_v17 = vpop.permute.xlu1 %4290 }
 0x655   : > { %v5879_v9 = vmax.f32 %v6708_v19, 0.0  ;;  %5839 = vmatmul.mubr.bf16.gmra.mrb[116].mxu1 %v7620_v2 }
 0x656   : > { %v5880_v3 = vmax.f32 %v6709_v25, 0.0  ;;  %5848 = vmatprep.mubr.bf16.mxu1 %v7621_v44 }
 0x657   : > { %v6002_v41 = vpack.c.bf16 %v5879_v9, %v5877_v5  ;;  %v9987_v9 = vpop.permute.xlu0 %4445 }
 0x658   : > { %v6003_v28 = vpack.c.bf16 %v5880_v3, %v5878_v57  ;;  %v5580_v63 = vpop.f32.mrb[12].mxu1 }
 0x659   : > { %v6710_v54 = vadd.f32 %v5580_v63, %v9926_v8  ;;  %v5582_v34 = vpop.f32.mrb[13].mxu1 }
 0x65a   : > { %v6711_v29 = vadd.f32 %v5582_v34, %v9926_v8  ;;  %v5584_v50 = vpop.f32.mrb[14].mxu1  ;;  %6097 = vmatprep.subr.bf16.mxu1 %v6003_v28  ;;  %v9991_v28 = vpop.permute.xlu1 %4450 }
 0x65b   : > { %v6712_v58 = vadd.f32 %v5584_v50, %v9928_v38  ;;  %v5586_v13 = vpop.f32.mrb[15].mxu1  ;;  %6098 = vmatpush1.bf16.msra.mxu1 %v6002_v41  ;;  %v5881_v37 = vmax.f32 %v6710_v54, 0.0 }
 0x65c   : > { %v6713_v51 = vadd.f32 %v5586_v13, %v9928_v38  ;;  %v5882_v45 = vmax.f32 %v6711_v29, 0.0 }
 0x65d   : > { %v5883_v36 = vmax.f32 %v6712_v58, 0.0  ;;  %5849 = vmatmul.mubr.bf16.gmra.mrb[120].mxu1 %v7623_v15 }
 0x65e   : > { %v5884_v30 = vmax.f32 %v6713_v51, 0.0  ;;  %5858 = vmatprep.mubr.bf16.mxu1 %v7624_v27  ;;  %v4296_v27 = vpop.permute.xlu0 %4295 }
 0x65f   : > { %v6004_v60 = vpack.c.bf16 %v5883_v36, %v5881_v37  ;;  %v9995_v37 = vpop.permute.xlu1 %4300 }
 0x660   : > { %v6005_v8 = vpack.c.bf16 %v5884_v30, %v5882_v45  ;;  %v5590_v49 = vpop.f32.mrb[16].mxu1 }
 0x661   : > { %v6714_v14 = vadd.f32 %v5590_v49, %v9934_v47  ;;  %v5592_v32 = vpop.f32.mrb[17].mxu1 }
 0x662   : > { %v6715_v35 = vadd.f32 %v5592_v32, %v9934_v47  ;;  %v5594_v38 = vpop.f32.mrb[18].mxu1  ;;  %6099 = vmatprep.subr.bf16.mxu1 %v6005_v8 }
 0x663   : > { %v6716_v7 = vadd.f32 %v5594_v38, %v9936_v52  ;;  %v5596_v23 = vpop.f32.mrb[19].mxu1  ;;  %6100 = vmatpush1.bf16.msra.mxu1 %v6004_v60  ;;  %v5885_v39 = vmax.f32 %v6714_v14, 0.0  ;;  %v10000_v14 = vpop.permute.xlu0 %4455 }
 0x664   : > { %v6717_v22 = vadd.f32 %v5596_v23, %v9936_v52  ;;  %v5886_v11 = vmax.f32 %v6715_v35, 0.0  ;;  %v10002_v38 = vpop.permute.xlu1 %4460 }
 0x665   : > { %v5887_v2 = vmax.f32 %v6716_v7, 0.0  ;;  %5859 = vmatmul.mubr.bf16.gmra.mrb[124].mxu1 %v7626_v0 }
 0x666   : > { %v5888_v44 = vmax.f32 %v6717_v22, 0.0 }
 0x667   : > { %v6006_v19 = vpack.c.bf16 %v5887_v2, %v5885_v39 }
 0x668   : > { %v6007_v55 = vpack.c.bf16 %v5888_v44, %v5886_v11  ;;  %v5600_v47 = vpop.f32.mrb[20].mxu1  ;;  %v4306_v44 = vpop.permute.xlu0 %4305 }
 0x669   : > { %v6718_v25 = vadd.f32 %v5600_v47, %v9942_v21  ;;  %v5602_v5 = vpop.f32.mrb[21].mxu1 }
 0x66a   : > { %v6719_v57 = vadd.f32 %v5602_v5, %v9942_v21  ;;  %v5604_v3 = vpop.f32.mrb[22].mxu1  ;;  %6101 = vmatprep.subr.bf16.mxu1 %v6007_v55 }
 0x66b   : > { %v6720_v52 = vadd.f32 %v5604_v3, %v9944_v59  ;;  %v5606_v41 = vpop.f32.mrb[23].mxu1  ;;  %6102 = vmatpush1.bf16.msra.mxu1 %v6006_v19  ;;  %v5889_v54 = vmax.f32 %v6718_v25, 0.0  ;;  %v4311_v25 = vpop.permute.xlu1 %4310 }
 0x66c   : > { %v6721_v63 = vadd.f32 %v5606_v41, %v9944_v59  ;;  %v5890_v15 = vmax.f32 %v6719_v57, 0.0 }
 0x66d   : > { %v5891_v34 = vmax.f32 %v6720_v52, 0.0 }
 0x66e   : > { %v5892_v29 = vmax.f32 %v6721_v63, 0.0 }
 0x66f   : > { %v6008_v50 = vpack.c.bf16 %v5891_v34, %v5889_v54  ;;  %v10009_v54 = vpop.permute.xlu0 %4465 }
 0x670   : > { %v6009_v58 = vpack.c.bf16 %v5892_v29, %v5890_v15  ;;  %v5610_v13 = vpop.f32.mrb[24].mxu1 }
 0x671   : > { %v6722_v21 = vadd.f32 %v5610_v13, %v9953_v43  ;;  %v5612_v51 = vpop.f32.mrb[25].mxu1 }
 0x672   : > { %v6723_v36 = vadd.f32 %v5612_v51, %v9953_v43  ;;  %v5614_v45 = vpop.f32.mrb[26].mxu1  ;;  %6103 = vmatprep.subr.bf16.mxu1 %v6009_v58 }
 0x673   : > { %v6724_v30 = vadd.f32 %v5614_v45, %v9956_v48  ;;  %v5616_v59 = vpop.f32.mrb[27].mxu1  ;;  %6104 = vmatpush1.bf16.msra.mxu1 %v6008_v50  ;;  %v5893_v8 = vmax.f32 %v6722_v21, 0.0  ;;  %v10013_v50 = vpop.permute.xlu1 %4470 }
 0x674   : > { %v6725_v60 = vadd.f32 %v5616_v59, %v9956_v48  ;;  %v5894_v32 = vmax.f32 %v6723_v36, 0.0 }
 0x675   : > { %v5895_v49 = vmax.f32 %v6724_v30, 0.0  ;;  %v4316_v30 = vpop.permute.xlu0 %4315 }
 0x676   : > { %v5896_v0 = vmax.f32 %v6725_v60, 0.0 }
 0x677   : > { %v6010_v35 = vpack.c.bf16 %v5895_v49, %v5893_v8  ;;  %v4321_v49 = vpop.permute.xlu1 %4320 }
 0x678   : > { %v6011_v7 = vpack.c.bf16 %v5896_v0, %v5894_v32  ;;  %v5620_v23 = vpop.f32.mrb[28].mxu1 }
 0x679   : > { %v6726_v43 = vadd.f32 %v5620_v23, %v9966_v33  ;;  %v5622_v22 = vpop.f32.mrb[29].mxu1 }
 0x67a   : > { %v6727_v39 = vadd.f32 %v5622_v22, %v9966_v33  ;;  %v5624_v2 = vpop.f32.mrb[30].mxu1  ;;  %6105 = vmatprep.subr.bf16.mxu1 %v6011_v7  ;;  %v10018_v22 = vpop.permute.xlu0 %4475 }
 0x67b   : > { %v6728_v48 = vadd.f32 %v5624_v2, %v9969_v42  ;;  %v5626_v11 = vpop.f32.mrb[31].mxu1  ;;  %6106 = vmatpush1.bf16.msra.mxu1 %v6010_v35  ;;  %v5897_v55 = vmax.f32 %v6726_v43, 0.0 }
 0x67c   : > { %v6729_v19 = vadd.f32 %v5626_v11, %v9969_v42  ;;  %v5898_v5 = vmax.f32 %v6727_v39, 0.0  ;;  %v10020_v11 = vpop.permute.xlu1 %4480 }
 0x67d   : > { %v5899_v47 = vmax.f32 %v6728_v48, 0.0 }
 0x67e   : > { %v5900_v57 = vmax.f32 %v6729_v19, 0.0 }
 0x67f   : > { %v6012_v3 = vpack.c.bf16 %v5899_v47, %v5897_v55 }
 0x680   : > { %v6013_v52 = vpack.c.bf16 %v5900_v57, %v5898_v5  ;;  %v5630_v41 = vpop.f32.mrb[32].mxu1 }
 0x681   : > { %v6730_v63 = vadd.f32 %v5630_v41, %v9981_v61  ;;  %v5632_v33 = vpop.f32.mrb[33].mxu1 }
 0x682   : > { %v6731_v34 = vadd.f32 %v5632_v33, %v9981_v61  ;;  %v5634_v15 = vpop.f32.mrb[34].mxu1  ;;  %6107 = vmatprep.subr.bf16.mxu1 %v6013_v52 }
 0x683   : > { %v6732_v29 = vadd.f32 %v5634_v15, %v9984_v17  ;;  %v5636_v42 = vpop.f32.mrb[35].mxu1  ;;  %6108 = vmatpush1.bf16.msra.mxu1 %v6012_v3  ;;  %v5901_v13 = vmax.f32 %v6730_v63, 0.0 }
 0x684   : > { %v6733_v58 = vadd.f32 %v5636_v42, %v9984_v17  ;;  %v5902_v51 = vmax.f32 %v6731_v34, 0.0  ;;  %v4331_v34 = vpop.permute.xlu1 %4330 }
 0x685   : > { %v5903_v21 = vmax.f32 %v6732_v29, 0.0 }
 0x686   : > { %v5904_v36 = vmax.f32 %v6733_v58, 0.0 }
 0x687   : > { %v6014_v45 = vpack.c.bf16 %v5903_v21, %v5901_v13 }
 0x688   : > { %v6015_v59 = vpack.c.bf16 %v5904_v36, %v5902_v51  ;;  %v5640_v60 = vpop.f32.mrb[36].mxu1 }
 0x689   : > { %v6734_v8 = vadd.f32 %v5640_v60, %v4296_v27  ;;  %v5642_v61 = vpop.f32.mrb[37].mxu1 }
 0x68a   : > { %v6735_v32 = vadd.f32 %v5642_v61, %v4296_v27  ;;  %v5644_v0 = vpop.f32.mrb[38].mxu1  ;;  %6109 = vmatprep.subr.bf16.mxu1 %v6015_v59 }
 0x68b   : > { %v6736_v35 = vadd.f32 %v5644_v0, %v9995_v37  ;;  %v5646_v7 = vpop.f32.mrb[39].mxu1  ;;  %6110 = vmatpush1.bf16.msra.mxu1 %v6014_v45  ;;  %v5905_v23 = vmax.f32 %v6734_v8, 0.0  ;;  %v10024_v8 = vpop.permute.xlu1 %4490 }
 0x68c   : > { %v6737_v17 = vadd.f32 %v5646_v7, %v9995_v37  ;;  %v5906_v39 = vmax.f32 %v6735_v32, 0.0  ;;  %v4326_v37 = vpop.permute.xlu0 %4325 }
 0x68d   : > { %v5907_v43 = vmax.f32 %v6736_v35, 0.0 }
 0x68e   : > { %v5908_v2 = vmax.f32 %v6737_v17, 0.0 }
 0x68f   : > { %v6016_v48 = vpack.c.bf16 %v5907_v43, %v5905_v23 }
 0x690   : > { %v6017_v19 = vpack.c.bf16 %v5908_v2, %v5906_v39  ;;  %v5650_v55 = vpop.f32.mrb[40].mxu1  ;;  %v10022_v36 = vpop.permute.xlu0 %4485 }
 0x691   : > { %v6738_v27 = vadd.f32 %v5650_v55, %v4306_v44  ;;  %v5652_v47 = vpop.f32.mrb[41].mxu1 }
 0x692   : > { %v6739_v5 = vadd.f32 %v5652_v47, %v4306_v44  ;;  %v5654_v57 = vpop.f32.mrb[42].mxu1  ;;  %6111 = vmatprep.subr.bf16.mxu1 %v6017_v19 }
 0x693   : > { %v6740_v3 = vadd.f32 %v5654_v57, %v4311_v25  ;;  %v5656_v52 = vpop.f32.mrb[43].mxu1  ;;  %6112 = vmatpush1.bf16.msra.mxu1 %v6016_v48  ;;  %v5909_v63 = vmax.f32 %v6738_v27, 0.0  ;;  %v4341_v48 = vpop.permute.xlu1 %4340 }
 0x694   : > { %v6741_v41 = vadd.f32 %v5656_v52, %v4311_v25  ;;  %v5910_v15 = vmax.f32 %v6739_v5, 0.0  ;;  %v4336_v17 = vpop.permute.xlu0 %4335 }
 0x695   : > { %v5911_v33 = vmax.f32 %v6740_v3, 0.0 }
 0x696   : > { %v5912_v29 = vmax.f32 %v6741_v41, 0.0 }
 0x697   : > { %v6018_v42 = vpack.c.bf16 %v5911_v33, %v5909_v63  ;;  %v10028_v63 = vpop.permute.xlu1 %4500 }
 0x698   : > { %v6019_v58 = vpack.c.bf16 %v5912_v29, %v5910_v15  ;;  %v5660_v13 = vpop.f32.mrb[44].mxu1  ;;  %v10026_v57 = vpop.permute.xlu0 %4495 }
 0x699   : > { %v6742_v21 = vadd.f32 %v5660_v13, %v4316_v30  ;;  %v5662_v51 = vpop.f32.mrb[45].mxu1 }
 0x69a   : > { %v6743_v44 = vadd.f32 %v5662_v51, %v4316_v30  ;;  %v5664_v45 = vpop.f32.mrb[46].mxu1  ;;  %6113 = vmatprep.subr.bf16.mxu1 %v6019_v58 }
 0x69b   : > { %v6744_v59 = vadd.f32 %v5664_v45, %v4321_v49  ;;  %v5666_v60 = vpop.f32.mrb[47].mxu1  ;;  %6114 = vmatpush1.bf16.msra.mxu1 %v6018_v42  ;;  %v5913_v61 = vmax.f32 %v6742_v21, 0.0 }
 0x69c   : > { %v6745_v25 = vadd.f32 %v5666_v60, %v4321_v49  ;;  %v5914_v0 = vmax.f32 %v6743_v44, 0.0 }
 0x69d   : > { %v5915_v32 = vmax.f32 %v6744_v59, 0.0  ;;  %v4351_v59 = vpop.permute.xlu1 %4350 }
 0x69e   : > { %v5916_v35 = vmax.f32 %v6745_v25, 0.0 }
 0x69f   : > { %v6020_v7 = vpack.c.bf16 %v5915_v32, %v5913_v61 }
 0x6a0   : > { %v6021_v23 = vpack.c.bf16 %v5916_v35, %v5914_v0  ;;  %v5670_v43 = vpop.f32.mrb[48].mxu1 }
 0x6a1   : > { %v6746_v39 = vadd.f32 %v5670_v43, %v4326_v37  ;;  %v5672_v2 = vpop.f32.mrb[49].mxu1 }
 0x6a2   : > { %v6747_v30 = vadd.f32 %v5672_v2, %v4326_v37  ;;  %v5674_v19 = vpop.f32.mrb[50].mxu1  ;;  %6115 = vmatprep.subr.bf16.mxu1 %v6021_v23 }
 0x6a3   : > { %v6748_v55 = vadd.f32 %v5674_v19, %v4331_v34  ;;  %v5676_v27 = vpop.f32.mrb[51].mxu1  ;;  %6116 = vmatpush1.bf16.msra.mxu1 %v6020_v7  ;;  %v5917_v5 = vmax.f32 %v6746_v39, 0.0 }
 0x6a4   : > { %v6749_v47 = vadd.f32 %v5676_v27, %v4331_v34  ;;  %v5918_v3 = vmax.f32 %v6747_v30, 0.0  ;;  %v4346_v34 = vpop.permute.xlu0 %4345  ;;  %v10032_v30 = vpop.permute.xlu1 %4510 }
 0x6a5   : > { %v5919_v49 = vmax.f32 %v6748_v55, 0.0 }
 0x6a6   : > { %v5920_v52 = vmax.f32 %v6749_v47, 0.0 }
 0x6a7   : > { %v6022_v41 = vpack.c.bf16 %v5919_v49, %v5917_v5 }
 0x6a8   : > { %v6023_v33 = vpack.c.bf16 %v5920_v52, %v5918_v3  ;;  %v5680_v15 = vpop.f32.mrb[52].mxu1  ;;  %v10030_v23 = vpop.permute.xlu0 %4505 }
 0x6a9   : > { %v6750_v29 = vadd.f32 %v5680_v15, %v4336_v17  ;;  %v5682_v42 = vpop.f32.mrb[53].mxu1 }
 0x6aa   : > { %v6751_v37 = vadd.f32 %v5682_v42, %v4336_v17  ;;  %v5684_v58 = vpop.f32.mrb[54].mxu1  ;;  %6117 = vmatprep.subr.bf16.mxu1 %v6023_v33  ;;  %v4361_v42 = vpop.permute.xlu1 %4360 }
 0x6ab   : > { %v6752_v13 = vadd.f32 %v5684_v58, %v4341_v48  ;;  %v5686_v21 = vpop.f32.mrb[55].mxu1  ;;  %6118 = vmatpush1.bf16.msra.mxu1 %v6022_v41  ;;  %v5921_v44 = vmax.f32 %v6750_v29, 0.0  ;;  %v7755_v41 = vmov 1966171168  }
 0x6ac   : > { %v6753_v51 = vadd.f32 %v5686_v21, %v4341_v48  ;;  %v5922_v60 = vmax.f32 %v6751_v37, 0.0  ;;  %v4356_v49 = vpop.permute.xlu0 %4355  ;;  %v6074_v33 = vunpack.c.l.s4 %v7755_v41 }
 0x6ad   : > { %v5923_v45 = vmax.f32 %v6752_v13, 0.0 }
 0x6ae   : > { %v5924_v25 = vmax.f32 %v6753_v51, 0.0  ;;  %v6075_v13 = vunpack.c.0.s8 %v6074_v33  ;;  %v6561_v51 = vld.sshfl [vmem:[%s10163_s6] sm:$0x33 pattern:$0x75316420] }
 0x6af   : > { %v6024_v61 = vpack.c.bf16 %v5923_v45, %v5921_v44  ;;  %v6072_v45 = vcombine.high %v6561_v51, %v6561_v51 }
 0x6b0   : > { %v6025_v32 = vpack.c.bf16 %v5924_v25, %v5922_v60  ;;  %v5690_v0 = vpop.f32.mrb[56].mxu1 }
 0x6b1   : > { %v6754_v35 = vadd.f32 %v5690_v0, %v4346_v34  ;;  %v5692_v7 = vpop.f32.mrb[57].mxu1 }
 0x6b2   : > { %v6755_v17 = vadd.f32 %v5692_v7, %v4346_v34  ;;  %v5694_v43 = vpop.f32.mrb[58].mxu1  ;;  %6119 = vmatprep.subr.bf16.mxu1 %v6025_v32 }
 0x6b3   : > { %v6756_v39 = vadd.f32 %v5694_v43, %v4351_v59  ;;  %v5696_v2 = vpop.f32.mrb[59].mxu1  ;;  %6120 = vmatpush1.bf16.msra.mxu1 %v6024_v61  ;;  %v5925_v19 = vmax.f32 %v6754_v35, 0.0 }
 0x6b4   : > { %v6757_v48 = vadd.f32 %v5696_v2, %v4351_v59  ;;  %v5926_v27 = vmax.f32 %v6755_v17, 0.0  ;;  %v10212_v59 = vld [vmem:[#allocation11_spill] sm:$0xff] }
 0x6b5   : > { %v5927_v55 = vmax.f32 %v6756_v39, 0.0  ;;  %v10038_v60 = vsub.s32 %v6075_v13, %v10212_v59 }
 0x6b6   : > { %v5928_v47 = vmax.f32 %v6757_v48, 0.0 }
 0x6b7   : > { %v6026_v5 = vpack.c.bf16 %v5927_v55, %v5925_v19  ;;  %v6086_v35 = vrot.slane %v6072_v45, %v10038_v60  ;;  %v10044_v55 = vrot.slane %v6561_v51, %v10038_v60 }
 0x6b8   : > { %v6027_v3 = vpack.c.bf16 %v5928_v47, %v5926_v27  ;;  %v5700_v52 = vpop.f32.mrb[60].mxu1 }
 0x6b9   : > { %v6758_v15 = vadd.f32 %v5700_v52, %v4356_v49  ;;  %v5702_v29 = vpop.f32.mrb[61].mxu1  ;;  %6125 = vmatprep.mubr.bf16.mxu1 %v6086_v35 }
 0x6ba   : > { %v6759_v37 = vadd.f32 %v5702_v29, %v4356_v49  ;;  %v5704_v58 = vpop.f32.mrb[62].mxu1  ;;  %6121 = vmatprep.subr.bf16.mxu1 %v6027_v3 }
 0x6bb   : > { %v6760_v21 = vadd.f32 %v5704_v58, %v4361_v42  ;;  %v5706_v34 = vpop.f32.mrb[63].mxu1  ;;  %6122 = vmatpush1.bf16.msra.mxu1 %v6026_v5  ;;  %v5929_v25 = vmax.f32 %v6758_v15, 0.0  ;;  %v6088_v5 = vcombine.high %v6086_v35, %v6086_v35 }
 0x6bc   : > { %v6761_v44 = vadd.f32 %v5706_v34, %v4361_v42  ;;  %v5930_v32 = vmax.f32 %v6759_v37, 0.0 }
 0x6bd   : > { %v5931_v61 = vmax.f32 %v6760_v21, 0.0  ;;  %6166 = vmatprep.mubr.bf16.mxu0 %v6088_v5 }
 0x6be   : > { %v5932_v0 = vmax.f32 %v6761_v44, 0.0 }
 0x6bf   : > { %v6028_v7 = vpack.c.bf16 %v5931_v61, %v5929_v25 }
 0x6c0   : > { %v6029_v17 = vpack.c.bf16 %v5932_v0, %v5930_v32  ;;  %v5710_v43 = vpop.f32.mrb[64].mxu1 }
 0x6c1   : > { %v6762_v39 = vadd.f32 %v5710_v43, %v9906_v16  ;;  %v5712_v2 = vpop.f32.mrb[65].mxu1 }
 0x6c2   : > { %v6763_v48 = vadd.f32 %v5712_v2, %v9906_v16  ;;  %v5714_v19 = vpop.f32.mrb[66].mxu1  ;;  %6123 = vmatprep.subr.bf16.mxu1 %v6029_v17 }
 0x6c3   : > { %v6764_v27 = vadd.f32 %v5714_v19, %v9908_v1  ;;  %v5716_v47 = vpop.f32.mrb[67].mxu1  ;;  %6124 = vmatpush1.bf16.msra.mxu1 %v6028_v7  ;;  %v5933_v3 = vmax.f32 %v6762_v39, 0.0 }
 0x6c4   : > { %v6765_v49 = vadd.f32 %v5716_v47, %v9908_v1  ;;  %v5934_v41 = vmax.f32 %v6763_v48, 0.0 }
 0x6c5   : > { %v5935_v52 = vmax.f32 %v6764_v27, 0.0 }
 0x6c6   : > { %v5936_v33 = vmax.f32 %v6765_v49, 0.0  ;;  %6126 = vmatmul.mubr.bf16.vlgmr.msra.gmra.mrb[128].mxu1 %v10044_v55 }
 0x6c7   : > { %v6030_v16 = vpack.c.bf16 %v5935_v52, %v5933_v3 }
 0x6c8   : > { %v6031_v15 = vpack.c.bf16 %v5936_v33, %v5934_v41  ;;  %v5720_v29 = vpop.f32.mrb[68].mxu1 }
 0x6c9   : > { %v6766_v42 = vadd.f32 %v5720_v29, %v9914_v40  ;;  %v5722_v37 = vpop.f32.mrb[69].mxu1 }
 0x6ca   : > { %v6767_v58 = vadd.f32 %v5722_v37, %v9914_v40  ;;  %v5724_v13 = vpop.f32.mrb[70].mxu1  ;;  %6134 = vmatprep.subr.bf16.mxu0 %v6031_v15 }
 0x6cb   : > { %v6768_v21 = vadd.f32 %v5724_v13, %v9916_v6  ;;  %v5726_v1 = vpop.f32.mrb[71].mxu1  ;;  %6135 = vmatpush1.bf16.msra.mxu0 %v6030_v16  ;;  %v5937_v51 = vmax.f32 %v6766_v42, 0.0 }
 0x6cc   : > { %v6769_v34 = vadd.f32 %v5726_v1, %v9916_v6  ;;  %v5938_v45 = vmax.f32 %v6767_v58, 0.0 }
 0x6cd   : > { %v5939_v44 = vmax.f32 %v6768_v21, 0.0 }
 0x6ce   : > { %v5940_v59 = vmax.f32 %v6769_v34, 0.0 }
 0x6cf   : > { %v6032_v25 = vpack.c.bf16 %v5939_v44, %v5937_v51 }
 0x6d0   : > { %v6033_v61 = vpack.c.bf16 %v5940_v59, %v5938_v45  ;;  %v5730_v32 = vpop.f32.mrb[72].mxu1 }
 0x6d1   : > { %v6770_v0 = vadd.f32 %v5730_v32, %v9922_v18  ;;  %v5732_v35 = vpop.f32.mrb[73].mxu1 }
 0x6d2   : > { %v6771_v40 = vadd.f32 %v5732_v35, %v9922_v18  ;;  %v5734_v7 = vpop.f32.mrb[74].mxu1  ;;  %6136 = vmatprep.subr.bf16.mxu0 %v6033_v61 }
 0x6d3   : > { %v6772_v17 = vadd.f32 %v5734_v7, %v9924_v53  ;;  %v5736_v43 = vpop.f32.mrb[75].mxu1  ;;  %6137 = vmatpush1.bf16.msra.mxu0 %v6032_v25  ;;  %v5941_v39 = vmax.f32 %v6770_v0, 0.0 }
 0x6d4   : > { %v6773_v6 = vadd.f32 %v5736_v43, %v9924_v53  ;;  %v5942_v48 = vmax.f32 %v6771_v40, 0.0 }
 0x6d5   : > { %v5943_v2 = vmax.f32 %v6772_v17, 0.0 }
 0x6d6   : > { %v5944_v19 = vmax.f32 %v6773_v6, 0.0 }
 0x6d7   : > { %v6034_v27 = vpack.c.bf16 %v5943_v2, %v5941_v39 }
 0x6d8   : > { %v6035_v47 = vpack.c.bf16 %v5944_v19, %v5942_v48  ;;  %v5740_v5 = vpop.f32.mrb[76].mxu1 }
 0x6d9   : > { %v6774_v49 = vadd.f32 %v5740_v5, %v9930_v31  ;;  %v5742_v3 = vpop.f32.mrb[77].mxu1 }
 0x6da   : > { %v6775_v18 = vadd.f32 %v5742_v3, %v9930_v31  ;;  %v5744_v52 = vpop.f32.mrb[78].mxu1  ;;  %6138 = vmatprep.subr.bf16.mxu0 %v6035_v47 }
 0x6db   : > { %v6776_v41 = vadd.f32 %v5744_v52, %v9932_v10  ;;  %v5746_v33 = vpop.f32.mrb[79].mxu1  ;;  %6139 = vmatpush1.bf16.msra.mxu0 %v6034_v27  ;;  %v5945_v16 = vmax.f32 %v6774_v49, 0.0 }
 0x6dc   : > { %v6777_v53 = vadd.f32 %v5746_v33, %v9932_v10  ;;  %v5946_v29 = vmax.f32 %v6775_v18, 0.0 }
 0x6dd   : > { %v5947_v15 = vmax.f32 %v6776_v41, 0.0 }
 0x6de   : > { %v5948_v42 = vmax.f32 %v6777_v53, 0.0 }
 0x6df   : > { %v6036_v37 = vpack.c.bf16 %v5947_v15, %v5945_v16 }
 0x6e0   : > { %v6037_v58 = vpack.c.bf16 %v5948_v42, %v5946_v29  ;;  %v5750_v13 = vpop.f32.mrb[80].mxu1 }
 0x6e1   : > { %v6778_v21 = vadd.f32 %v5750_v13, %v9938_v46  ;;  %v5752_v1 = vpop.f32.mrb[81].mxu1 }
 0x6e2   : > { %v6779_v31 = vadd.f32 %v5752_v1, %v9938_v46  ;;  %v5754_v34 = vpop.f32.mrb[82].mxu1  ;;  %6140 = vmatprep.subr.bf16.mxu0 %v6037_v58 }
 0x6e3   : > { %v6780_v51 = vadd.f32 %v5754_v34, %v9940_v56  ;;  %v5756_v44 = vpop.f32.mrb[83].mxu1  ;;  %6141 = vmatpush1.bf16.msra.mxu0 %v6036_v37  ;;  %v5949_v45 = vmax.f32 %v6778_v21, 0.0 }
 0x6e4   : > { %v6781_v10 = vadd.f32 %v5756_v44, %v9940_v56  ;;  %v5950_v25 = vmax.f32 %v6779_v31, 0.0 }
 0x6e5   : > { %v5951_v59 = vmax.f32 %v6780_v51, 0.0 }
 0x6e6   : > { %v5952_v61 = vmax.f32 %v6781_v10, 0.0 }
 0x6e7   : > { %v6038_v32 = vpack.c.bf16 %v5951_v59, %v5949_v45 }
 0x6e8   : > { %v6039_v0 = vpack.c.bf16 %v5952_v61, %v5950_v25  ;;  %v5760_v35 = vpop.f32.mrb[84].mxu1 }
 0x6e9   : > { %v6782_v40 = vadd.f32 %v5760_v35, %v9946_v26  ;;  %v5762_v7 = vpop.f32.mrb[85].mxu1 }
 0x6ea   : > { %v6783_v46 = vadd.f32 %v5762_v7, %v9946_v26  ;;  %v5764_v17 = vpop.f32.mrb[86].mxu1  ;;  %6142 = vmatprep.subr.bf16.mxu0 %v6039_v0 }
 0x6eb   : > { %v6784_v43 = vadd.f32 %v5764_v17, %v9948_v12  ;;  %v5766_v6 = vpop.f32.mrb[87].mxu1  ;;  %6143 = vmatpush1.bf16.msra.mxu0 %v6038_v32  ;;  %v5953_v39 = vmax.f32 %v6782_v40, 0.0 }
 0x6ec   : > { %v6785_v56 = vadd.f32 %v5766_v6, %v9948_v12  ;;  %v5954_v48 = vmax.f32 %v6783_v46, 0.0 }
 0x6ed   : > { %v5955_v2 = vmax.f32 %v6784_v43, 0.0 }
 0x6ee   : > { %v5956_v19 = vmax.f32 %v6785_v56, 0.0 }
 0x6ef   : > { %v6040_v27 = vpack.c.bf16 %v5955_v2, %v5953_v39 }
 0x6f0   : > { %v6041_v47 = vpack.c.bf16 %v5956_v19, %v5954_v48  ;;  %v5770_v5 = vpop.f32.mrb[88].mxu1 }
 0x6f1   : > { %v6786_v49 = vadd.f32 %v5770_v5, %v9959_v20  ;;  %v5772_v3 = vpop.f32.mrb[89].mxu1 }
 0x6f2   : > { %v6787_v26 = vadd.f32 %v5772_v3, %v9959_v20  ;;  %v5774_v18 = vpop.f32.mrb[90].mxu1  ;;  %6144 = vmatprep.subr.bf16.mxu0 %v6041_v47 }
 0x6f3   : > { %v6788_v52 = vadd.f32 %v5774_v18, %v9963_v4  ;;  %v5776_v41 = vpop.f32.mrb[91].mxu1  ;;  %6145 = vmatpush1.bf16.msra.mxu0 %v6040_v27  ;;  %v5957_v33 = vmax.f32 %v6786_v49, 0.0 }
 0x6f4   : > { %v6789_v12 = vadd.f32 %v5776_v41, %v9963_v4  ;;  %v5958_v16 = vmax.f32 %v6787_v26, 0.0 }
 0x6f5   : > { %v5959_v53 = vmax.f32 %v6788_v52, 0.0 }
 0x6f6   : > { %v5960_v15 = vmax.f32 %v6789_v12, 0.0 }
 0x6f7   : > { %v6042_v29 = vpack.c.bf16 %v5959_v53, %v5957_v33 }
 0x6f8   : > { %v6043_v42 = vpack.c.bf16 %v5960_v15, %v5958_v16  ;;  %v5780_v37 = vpop.f32.mrb[92].mxu1 }
 0x6f9   : > { %v6790_v58 = vadd.f32 %v5780_v37, %v9974_v24  ;;  %v5782_v13 = vpop.f32.mrb[93].mxu1 }
 0x6fa   : > { %v6791_v20 = vadd.f32 %v5782_v13, %v9974_v24  ;;  %v5784_v21 = vpop.f32.mrb[94].mxu1  ;;  %6146 = vmatprep.subr.bf16.mxu0 %v6043_v42 }
 0x6fb   : > { %v6792_v1 = vadd.f32 %v5784_v21, %v9976_v62  ;;  %v5786_v31 = vpop.f32.mrb[95].mxu1  ;;  %6147 = vmatpush1.bf16.msra.mxu0 %v6042_v29  ;;  %v5961_v34 = vmax.f32 %v6790_v58, 0.0 }
 0x6fc   : > { %v6793_v4 = vadd.f32 %v5786_v31, %v9976_v62  ;;  %v5962_v44 = vmax.f32 %v6791_v20, 0.0 }
 0x6fd   : > { %v5963_v51 = vmax.f32 %v6792_v1, 0.0 }
 0x6fe   : > { %v5964_v10 = vmax.f32 %v6793_v4, 0.0 }
 0x6ff   : > { %v6044_v45 = vpack.c.bf16 %v5963_v51, %v5961_v34 }
 0x700   : > { %v6045_v59 = vpack.c.bf16 %v5964_v10, %v5962_v44  ;;  %v5790_v25 = vpop.f32.mrb[96].mxu1 }
 0x701   : > { %v6794_v61 = vadd.f32 %v5790_v25, %v9987_v9  ;;  %v5792_v32 = vpop.f32.mrb[97].mxu1 }
 0x702   : > { %v6795_v24 = vadd.f32 %v5792_v32, %v9987_v9  ;;  %v5794_v0 = vpop.f32.mrb[98].mxu1  ;;  %6148 = vmatprep.subr.bf16.mxu0 %v6045_v59 }
 0x703   : > { %v6796_v35 = vadd.f32 %v5794_v0, %v9991_v28  ;;  %v5796_v40 = vpop.f32.mrb[99].mxu1  ;;  %6149 = vmatpush1.bf16.msra.mxu0 %v6044_v45  ;;  %v5965_v7 = vmax.f32 %v6794_v61, 0.0 }
 0x704   : > { %v6797_v62 = vadd.f32 %v5796_v40, %v9991_v28  ;;  %v5966_v17 = vmax.f32 %v6795_v24, 0.0 }
 0x705   : > { %v5967_v46 = vmax.f32 %v6796_v35, 0.0 }
 0x706   : > { %v5968_v43 = vmax.f32 %v6797_v62, 0.0 }
 0x707   : > { %v6046_v6 = vpack.c.bf16 %v5967_v46, %v5965_v7 }
 0x708   : > { %v6047_v56 = vpack.c.bf16 %v5968_v43, %v5966_v17  ;;  %v5800_v39 = vpop.f32.mrb[100].mxu1 }
 0x709   : > { %v6798_v2 = vadd.f32 %v5800_v39, %v10000_v14  ;;  %v5802_v48 = vpop.f32.mrb[101].mxu1 }
 0x70a   : > { %v6799_v9 = vadd.f32 %v5802_v48, %v10000_v14  ;;  %v5804_v19 = vpop.f32.mrb[102].mxu1  ;;  %6150 = vmatprep.subr.bf16.mxu0 %v6047_v56 }
 0x70b   : > { %v6800_v27 = vadd.f32 %v5804_v19, %v10002_v38  ;;  %v5806_v47 = vpop.f32.mrb[103].mxu1  ;;  %6151 = vmatpush1.bf16.msra.mxu0 %v6046_v6  ;;  %v5969_v5 = vmax.f32 %v6798_v2, 0.0 }
 0x70c   : > { %v6801_v28 = vadd.f32 %v5806_v47, %v10002_v38  ;;  %v5970_v3 = vmax.f32 %v6799_v9, 0.0 }
 0x70d   : > { %v5971_v49 = vmax.f32 %v6800_v27, 0.0 }
 0x70e   : > { %v5972_v26 = vmax.f32 %v6801_v28, 0.0 }
 0x70f   : > { %v6048_v18 = vpack.c.bf16 %v5971_v49, %v5969_v5 }
 0x710   : > { %v6049_v52 = vpack.c.bf16 %v5972_v26, %v5970_v3  ;;  %v5810_v41 = vpop.f32.mrb[104].mxu1 }
 0x711   : > { %v6802_v12 = vadd.f32 %v5810_v41, %v10009_v54  ;;  %v5812_v33 = vpop.f32.mrb[105].mxu1 }
 0x712   : > { %v6803_v14 = vadd.f32 %v5812_v33, %v10009_v54  ;;  %v5814_v53 = vpop.f32.mrb[106].mxu1  ;;  %6152 = vmatprep.subr.bf16.mxu0 %v6049_v52 }
 0x713   : > { %v6804_v16 = vadd.f32 %v5814_v53, %v10013_v50  ;;  %v5816_v15 = vpop.f32.mrb[107].mxu1  ;;  %6153 = vmatpush1.bf16.msra.mxu0 %v6048_v18  ;;  %v5973_v29 = vmax.f32 %v6802_v12, 0.0 }
 0x714   : > { %v6805_v38 = vadd.f32 %v5816_v15, %v10013_v50  ;;  %v5974_v37 = vmax.f32 %v6803_v14, 0.0 }
 0x715   : > { %v5975_v42 = vmax.f32 %v6804_v16, 0.0 }
 0x716   : > { %v5976_v58 = vmax.f32 %v6805_v38, 0.0 }
 0x717   : > { %v6050_v13 = vpack.c.bf16 %v5975_v42, %v5973_v29  ;;  %v4516_v42 = vpop.permute.xlu0 %4515 }
 0x718   : > { %v6051_v20 = vpack.c.bf16 %v5976_v58, %v5974_v37  ;;  %v5820_v21 = vpop.f32.mrb[108].mxu1 }
 0x719   : > { %v6806_v1 = vadd.f32 %v5820_v21, %v10018_v22  ;;  %v5822_v31 = vpop.f32.mrb[109].mxu1  ;;  %v4521_v21 = vpop.permute.xlu1 %4520 }
 0x71a   : > { %v6807_v54 = vadd.f32 %v5822_v31, %v10018_v22  ;;  %v5824_v4 = vpop.f32.mrb[110].mxu1  ;;  %6154 = vmatprep.subr.bf16.mxu0 %v6051_v20 }
 0x71b   : > { %v6808_v34 = vadd.f32 %v5824_v4, %v10020_v11  ;;  %v5826_v51 = vpop.f32.mrb[111].mxu1  ;;  %6155 = vmatpush1.bf16.msra.mxu0 %v6050_v13  ;;  %v5977_v44 = vmax.f32 %v6806_v1, 0.0 }
 0x71c   : > { %v6809_v50 = vadd.f32 %v5826_v51, %v10020_v11  ;;  %v5978_v45 = vmax.f32 %v6807_v54, 0.0 }
 0x71d   : > { %v5979_v10 = vmax.f32 %v6808_v34, 0.0 }
 0x71e   : > { %v5980_v59 = vmax.f32 %v6809_v50, 0.0 }
 0x71f   : > { %v6052_v25 = vpack.c.bf16 %v5979_v10, %v5977_v44 }
 0x720   : > { %v6053_v61 = vpack.c.bf16 %v5980_v59, %v5978_v45  ;;  %v5830_v32 = vpop.f32.mrb[112].mxu1  ;;  %v6087_v45 = vcombine.high %v10044_v55, %v10044_v55 }
 0x721   : > { %v6810_v24 = vadd.f32 %v5830_v32, %v10022_v36  ;;  %v5832_v0 = vpop.f32.mrb[113].mxu1 }
 0x722   : > { %v6811_v22 = vadd.f32 %v5832_v0, %v10022_v36  ;;  %v5834_v35 = vpop.f32.mrb[114].mxu1  ;;  %6156 = vmatprep.subr.bf16.mxu0 %v6053_v61 }
 0x723   : > { %v6812_v40 = vadd.f32 %v5834_v35, %v10024_v8  ;;  %v5836_v62 = vpop.f32.mrb[115].mxu1  ;;  %6157 = vmatpush1.bf16.msra.mxu0 %v6052_v25  ;;  %v5981_v7 = vmax.f32 %v6810_v24, 0.0  ;;  %v6063_v24 = vstv %s6062_s14 }
 0x724   : > { %v6813_v11 = vadd.f32 %v5836_v62, %v10024_v8  ;;  %v5982_v17 = vmax.f32 %v6811_v22, 0.0 }
 0x725   : > { %v5983_v46 = vmax.f32 %v6812_v40, 0.0 }
 0x726   : > { %v5984_v43 = vmax.f32 %v6813_v11, 0.0 }
 0x727   : > { %v6054_v6 = vpack.c.bf16 %v5983_v46, %v5981_v7 }
 0x728   : > { %v6055_v56 = vpack.c.bf16 %v5984_v43, %v5982_v17  ;;  %v5840_v39 = vpop.f32.mrb[116].mxu1 }
 0x729   : > { %v6814_v2 = vadd.f32 %v5840_v39, %v10026_v57  ;;  %v5842_v48 = vpop.f32.mrb[117].mxu1 }
 0x72a   : > { %v6815_v36 = vadd.f32 %v5842_v48, %v10026_v57  ;;  %v5844_v9 = vpop.f32.mrb[118].mxu1  ;;  %6158 = vmatprep.subr.bf16.mxu0 %v6055_v56 }
 0x72b   : > { %v6816_v19 = vadd.f32 %v5844_v9, %v10028_v63  ;;  %v5846_v27 = vpop.f32.mrb[119].mxu1  ;;  %6159 = vmatpush1.bf16.msra.mxu0 %v6054_v6  ;;  %v5985_v47 = vmax.f32 %v6814_v2, 0.0 }
 0x72c   : > { %v6817_v8 = vadd.f32 %v5846_v27, %v10028_v63  ;;  %v5986_v5 = vmax.f32 %v6815_v36, 0.0 }
 0x72d   : > { %v5987_v28 = vmax.f32 %v6816_v19, 0.0  ;;  %v10213_v19 = vlaneseq }
 0x72e   : > { %v5988_v49 = vmax.f32 %v6817_v8, 0.0 }
 0x72f   : > { %v6056_v3 = vpack.c.bf16 %v5987_v28, %v5985_v47  ;;  %vm6207_vm0 = vcmp.lt.s32.totalorder %v10213_v19, 256 }
 0x730   : > { %v6057_v26 = vpack.c.bf16 %v5988_v49, %v5986_v5  ;;  %v5850_v18 = vpop.f32.mrb[120].mxu1 }
 0x731   : > { %v6818_v52 = vadd.f32 %v5850_v18, %v10030_v23  ;;  %v5852_v41 = vpop.f32.mrb[121].mxu1 }
 0x732   : > { %v6819_v57 = vadd.f32 %v5852_v41, %v10030_v23  ;;  %v5854_v12 = vpop.f32.mrb[122].mxu1  ;;  %6160 = vmatprep.subr.bf16.mxu0 %v6057_v26 }
 0x733   : > { %v6820_v33 = vadd.f32 %v5854_v12, %v10032_v30  ;;  %v5856_v14 = vpop.f32.mrb[123].mxu1  ;;  %6161 = vmatpush1.bf16.msra.mxu0 %v6056_v3  ;;  %v5989_v53 = vmax.f32 %v6818_v52, 0.0 }
 0x734   : > { %v6821_v63 = vadd.f32 %v5856_v14, %v10032_v30  ;;  %v5990_v15 = vmax.f32 %v6819_v57, 0.0 }
 0x735   : > { %v5991_v16 = vmax.f32 %v6820_v33, 0.0 }
 0x736   : > { %v5992_v38 = vmax.f32 %v6821_v63, 0.0 }
 0x737   : > { %v6058_v29 = vpack.c.bf16 %v5991_v16, %v5989_v53 }
 0x738   : > { %v6059_v37 = vpack.c.bf16 %v5992_v38, %v5990_v15  ;;  %v5860_v58 = vpop.f32.mrb[124].mxu1 }
 0x739   : > { %v6822_v13 = vadd.f32 %v5860_v58, %v4516_v42  ;;  %v5862_v20 = vpop.f32.mrb[125].mxu1 }
 0x73a   : > { %v6823_v23 = vadd.f32 %v5862_v20, %v4516_v42  ;;  %v5864_v1 = vpop.f32.mrb[126].mxu1  ;;  %6162 = vmatprep.subr.bf16.mxu0 %v6059_v37 }
 0x73b   : > { %v6824_v31 = vadd.f32 %v5864_v1, %v4521_v21  ;;  %v5866_v54 = vpop.f32.mrb[127].mxu1  ;;  %6163 = vmatpush1.bf16.msra.mxu0 %v6058_v29  ;;  %v5993_v34 = vmax.f32 %v6822_v13, 0.0 }
 0x73c   : > { %v6825_v4 = vadd.f32 %v5866_v54, %v4521_v21  ;;  %v5994_v51 = vmax.f32 %v6823_v23, 0.0 }
 0x73d   : > { %v5995_v30 = vmax.f32 %v6824_v31, 0.0 }
 0x73e   : > { %v5996_v50 = vmax.f32 %v6825_v4, 0.0 }
 0x73f   : > { %v6060_v44 = vpack.c.bf16 %v5995_v30, %v5993_v34 }
 0x740   : > { %v6061_v10 = vpack.c.bf16 %v5996_v50, %v5994_v51 }
 0x742   : > { %6164 = vmatprep.subr.bf16.mxu0 %v6061_v10 }
 0x743   : > { %6165 = vmatpush1.bf16.msra.mxu0 %v6060_v44 }
 0x746   : > { %6167 = vmatmul.mubr.bf16.vlgmr.msra.gmra.mrb[128].mxu0 %v6087_v45 }
 0x799   : > { %v6127_v59 = vpop.f32.mrb[128].mxu1 }
 0x79a   : > { %v6129_v25 = vpop.f32.mrb[129].mxu1  ;;  %v6128_v0 = vadd.f32 %v6127_v59, %v6063_v24 }
 0x79b   : > { %v6131_v61 = vpop.f32.mrb[130].mxu1  ;;  %v6130_v22 = vadd.f32 %v6129_v25, %v6063_v24 }
 0x79c   : > { %v6132_v32 = vpop.f32.mrb[131].mxu1 }
 0x819   : > { %v6168_v35 = vpop.f32.mrb[128].mxu0 }
 0x81a   : > { %v6169_v40 = vadd.f32 %v6168_v35, %v6128_v0  ;;  %v6170_v62 = vpop.f32.mrb[129].mxu0 }
 0x81b   : > { %v6171_v11 = vadd.f32 %v6170_v62, %v6130_v22  ;;  %v6172_v7 = vpop.f32.mrb[130].mxu0 }
 0x81c   : > { %v6562_v46 = vmul.f32 -1.442695, %v6169_v40  ;;  %v6173_v17 = vpop.f32.mrb[131].mxu0 }
 0x81d   : > { %v6563_v55 = vmul.f32 -1.442695, %v6171_v11 }
 0x81e   : > { %7627 = vpow2.f32 %v6562_v46 }
 0x81f   : > { %7629 = vpow2.f32 %v6563_v55 }
 0x828   : > { %v7628_v43 = vpop.eup %7627 }
 0x829   : > { %v7630_v6 = vpop.eup %7629  ;;  %v6181_v56 = vadd.f32 1.0, %v7628_v43 }
 0x82a   : > { %v6182_v39 = vadd.f32 1.0, %v7630_v6 }
 0x82b   : > { %7631 = vrcp.f32 %v6181_v56 }
 0x82c   : > { %7633 = vrcp.f32 %v6182_v39 }
 0x835   : > { %v7632_v2 = vpop.eup %7631 }
 0x836   : > { %v7634_v48 = vpop.eup %7633 }
 0x837   : > { %v6189_v36 = vcombine.low %v7632_v2, %v7634_v48 }
 0x839   : > { %v6196_v9 = vrot.slane %v6189_v36, %v10038_v60 }
 0x83b   : > { %v6203_v27 = vrot.slane %v6196_v9, %v10038_v60 }
 0x83d   : > { %6209 = vst.msk [vmem:[%s315_s23] sm:$0x3] %vm6207_vm0, %v6203_v27 }
 0x83e   : > { %7694 = shalt.err (!%p7691_p7)
}
 0x83f   : > { %s7695_s13 = scalar_lea.hbm %s10115_s25, 32  ;;  %s7699_s22 = scalar_lea.hbm %s10165_s8, 64 }
 0x840   : > { %p7696_p8 = scmp.ne.s32.totalorder %s10115_s25, %s7695_s13  ;;  %p7700_p1 = scmp.lt.u32.totalorder %s10115_s25, %s10165_s8 }
 0x841   : > { %p7701_p0 = scmp.lt.u32.totalorder %s7699_s22, %s7695_s13  ;;  %p7703_p6 = scmp.lt.u32.totalorder %s7695_s13, %s10115_s25 }
 0x842   : > { %p7697_p11 = pnand %p7696_p8, %p10214_p9 }
 0x843   : > { %p7702_p5 = por %p7701_p0, %p7700_p1 }
 0x844   : > { %p7698_p13 = pneg %p7697_p11 }
 0x845   : > { %p7704_p10 = por %p7703_p6, %p7702_p5 }
 0x847   : > { %p7705_p12 = pnand %p7704_p10, %p7698_p13 }
 0x849   : > { %7708 = shalt.err (!%p7705_p12)
}
 0x84a   : > { %7090 = dma.vmem_to_hbm [thread:$0]  (%p10214_p9), %s10117_s18, 32, %s10115_s25, %s6211_s7  }
 0x84b PF: > { %p7102_p2 = scmp.ge.s32.totalorder %s7747_s10, 2  ;;  %s6237_s20 = sand.u32 1, %s7735_s29  }
 0x84c   : > { %p10215_p3 = scmp.ne.s32.totalorder %s10186_s17, 0  ;;  %s6238_s24 = scalar_lea.sflag [#allocation5], %s6237_s20 }
 0x84e   : > { %p7097_p4 = pnand %p7102_p2, %p10215_p3 }
 0x850   : > { %7730 = dma.done.wait (!%p7097_p4), %s6238_s24, 32  }
 0x851   : > { %7732 = vsyncadd (!%p7097_p4), %s6238_s24, 4294967264  ;;  %p20_p7 = scmp.ge.s32.totalorder %s7830_s12, 4   ;;  %s10216_s29 = smov %s7739_s30 }
 0x852   : > { %s10217_s30 = smov %s7743_s9  ;;  %s10218_s9 = smov %s7841_s15 }
 0x853   : > { %s10219_s10 = smov %s7830_s12  ;;  %22 = sbr.rel (!%p20_p7) target bundleno = 6 (0x6), region = 92 }
 0x85a   :  { %6243 = vsyncpa [#allocation4], 1 }
 0x85b   :  { %6245 = vsyncpa [#allocation4 + $0x1], 1 }
 0x85c   :  { %6246 = vsyncpa [#allocation5], 1 }
 0x85d   :  { %6248 = vsyncpa [#allocation5 + $0x1], 1 }

</bundles_post_ra>
